<compile_context>
chip_gen: v5e
topology: v5e:2x2
jax: 0.10.0
libtpu: 0.0.40
codegen_flags: <defaults>
</compile_context>

<pallas_src>
import functools

import jax
import jax.numpy as jnp
from jax.experimental import pallas as pl
from jax.experimental.pallas import tpu as pltpu

F32 = jnp.float32
BF16 = jnp.bfloat16
BN_EPS = 1e-5


def _rup(x, m):
    return ((x + m - 1) // m) * m


def _pick_tile(dim, cap, mult):
    """Largest multiple of `mult` that divides `dim` and is <= cap.

    `dim` is always a multiple of `mult`, so `mult` is a valid fallback."""
    t = min(cap, dim)
    t -= t % mult
    while t > mult and dim % t != 0:
        t -= mult
    return max(t, mult)


# ---------------------------------------------------------------------------
# Pallas kernel 1: tiled matmul (bf16 MXU operands, f32 accumulator) with the
# per-column BatchNorm statistics (sum, sum of squares) fused into the epilogue
# ---------------------------------------------------------------------------
def _matmul_bn_kernel(a_ref, b_ref, o_ref, sum_ref, sq_ref, acc_ref):
    @pl.when(pl.program_id(2) == 0)
    def _():
        acc_ref[...] = jnp.zeros_like(acc_ref)

    acc_ref[...] += jnp.dot(a_ref[...], b_ref[...],
                            preferred_element_type=jnp.float32)

    @pl.when(pl.program_id(2) == pl.num_programs(2) - 1)
    def _():
        acc = acc_ref[...]
        o_ref[...] = acc.astype(o_ref.dtype)
        # Statistics are taken from the f32 accumulator so the bf16 output
        # rounding does not degrade the BatchNorm batch statistics.
        sum_ref[...] = jnp.sum(acc, axis=0, keepdims=True)[None]
        sq_ref[...] = jnp.sum(acc * acc, axis=0, keepdims=True)[None]


@functools.lru_cache(maxsize=None)
def _matmul_bn_call(Mp, Kp, Np, tm, tk, tn, out_dtype):
    gm = Mp // tm
    return pl.pallas_call(
        _matmul_bn_kernel,
        out_shape=(
            jax.ShapeDtypeStruct((Mp, Np), out_dtype),
            jax.ShapeDtypeStruct((gm, 1, Np), F32),
            jax.ShapeDtypeStruct((gm, 1, Np), F32),
        ),
        grid_spec=pltpu.PrefetchScalarGridSpec(
            num_scalar_prefetch=0,
            grid=(gm, Np // tn, Kp // tk),
            in_specs=[
                pl.BlockSpec((tm, tk), lambda i, j, k: (i, k)),
                # TODO(synk): on v6e, if DMA is still exposed at the roofline,
                # add pipeline_mode=pl.Buffered(3) to this B-operand spec.
                pl.BlockSpec((tk, tn), lambda i, j, k: (k, j)),
            ],
            out_specs=[
                pl.BlockSpec((tm, tn), lambda i, j, k: (i, j)),
                pl.BlockSpec((1, 1, tn), lambda i, j, k: (i, 0, j)),
                pl.BlockSpec((1, 1, tn), lambda i, j, k: (i, 0, j)),
            ],
            scratch_shapes=[pltpu.VMEM((tm, tn), F32)],
        ),
        compiler_params=pltpu.CompilerParams(
            dimension_semantics=("parallel", "parallel", "arbitrary"),
            vmem_limit_bytes=48 * 1024 * 1024,
        ),
    )


def matmul_bn(a_p, b_p, out_dtype=BF16):
    """a_p: (Mp, Kp) bf16, Mp % 16 == 0, Kp % 128 == 0.  b_p: (Kp, Np) bf16,
    Np % 128 == 0.  Returns (out (Mp, Np), col-sums (gm,1,Np), col-sumsq)."""
    Mp, Kp = a_p.shape
    Kp2, Np = b_p.shape
    assert Kp == Kp2
    tm = _pick_tile(Mp, 512, 16)
    tn = _pick_tile(Np, 1024, 128)
    tk = _pick_tile(Kp, 512, 128)
    # v7x megacore: make sure the 'parallel' grid axes give >= 2 blocks.
    if (Mp // tm) * (Np // tn) < 2:
        if tm % 32 == 0:
            tm //= 2
        elif tn % 256 == 0:
            tn //= 2
    return _matmul_bn_call(Mp, Kp, Np, tm, tk, tn, out_dtype)(a_p, b_p)


# ---------------------------------------------------------------------------
# Pallas kernel 2: fused BN-apply (+ optional [BN'd] residual) + activation
#   out = act( x*s + b  [ + r (*rs + rb) ] ),  bf16 in / bf16 out, f32 math
# ---------------------------------------------------------------------------
def _bn_act_kernel(*refs, res_mode, act):
    if res_mode == "scaled":
        x_ref, s_ref, b_ref, r_ref, rs_ref, rb_ref, o_ref = refs
    elif res_mode == "plain":
        x_ref, s_ref, b_ref, r_ref, o_ref = refs
    else:
        x_ref, s_ref, b_ref, o_ref = refs
    v = x_ref[...].astype(jnp.float32) * s_ref[...] + b_ref[...]
    if res_mode == "scaled":
        v = v + r_ref[...].astype(jnp.float32) * rs_ref[...] + rb_ref[...]
    elif res_mode == "plain":
        v = v + r_ref[...].astype(jnp.float32)
    if act == "relu":
        v = jnp.maximum(v, 0.0)
    o_ref[...] = v.astype(o_ref.dtype)


@functools.lru_cache(maxsize=None)
def _bn_act_call(Mp, Cp, tm, tc, res_mode, act, out_dtype):
    full = pl.BlockSpec((tm, tc), lambda i, j: (i, j))
    row = pl.BlockSpec((1, tc), lambda i, j: (0, j))
    in_specs = [full, row, row]
    if res_mode == "scaled":
        in_specs += [full, row, row]
    elif res_mode == "plain":
        in_specs += [full]
    return pl.pallas_call(
        functools.partial(_bn_act_kernel, res_mode=res_mode, act=act),
        out_shape=jax.ShapeDtypeStruct((Mp, Cp), out_dtype),
        grid_spec=pltpu.PrefetchScalarGridSpec(
            num_scalar_prefetch=0,
            grid=(Mp // tm, Cp // tc),
            in_specs=in_specs,
            out_specs=pl.BlockSpec((tm, tc), lambda i, j: (i, j)),
        ),
        compiler_params=pltpu.CompilerParams(
            dimension_semantics=("parallel", "parallel"),
            vmem_limit_bytes=32 * 1024 * 1024,
        ),
    )


def bn_act(x_p, scale_p, bias_p, residual=None, res_scale=None, res_bias=None,
           act="relu", out_dtype=BF16):
    Mp, Cp = x_p.shape
    tm = _pick_tile(Mp, 512, 8)
    tc = _pick_tile(Cp, 1024, 128)
    if (Mp // tm) * (Cp // tc) < 2:  # v7x: >= 2 blocks so both TCs have work
        if tm % 16 == 0 and tm > 8:
            tm //= 2
        elif tc % 256 == 0:
            tc //= 2
    args = [x_p, scale_p.reshape(1, Cp), bias_p.reshape(1, Cp)]
    if residual is not None and res_scale is not None:
        res_mode = "scaled"
        args += [residual, res_scale.reshape(1, Cp), res_bias.reshape(1, Cp)]
    elif residual is not None:
        res_mode = "plain"
        args += [residual]
    else:
        res_mode = "none"
    return _bn_act_call(Mp, Cp, tm, tc, res_mode, act, out_dtype)(*args)


# ---------------------------------------------------------------------------
# Glue: conv-as-matmul with fused BN statistics (train-mode batch stats)
# ---------------------------------------------------------------------------
def conv_bn(a_p, w_p, gamma, beta, m_real, c_real, out_dtype=BF16):
    out, ssum, ssq = matmul_bn(a_p, w_p, out_dtype)
    total = jnp.sum(ssum, axis=0)[0]       # (Np,) f32
    total_sq = jnp.sum(ssq, axis=0)[0]
    mean = total[:c_real] / m_real
    # E[x^2]-E[x]^2 (clamped) is fine at this tolerance; stats are f32.
    var = jnp.maximum(total_sq[:c_real] / m_real - mean * mean, 0.0)
    scale = gamma * jax.lax.rsqrt(var + BN_EPS)
    bias = beta - mean * scale
    pad = w_p.shape[1] - c_real            # zero-pad so dead channels stay 0
    return out, jnp.pad(scale, (0, pad)), jnp.pad(bias, (0, pad))


# ---------------------------------------------------------------------------
# One-time parameter preparation (outside the per-forward hot path)
# ---------------------------------------------------------------------------
def prepare_bottleneck_params(P):
    def prep_1x1(w):                       # (Co, Ci, 1, 1) -> (Cip, Cop) bf16
        co, ci = w.shape[:2]
        m = w.reshape(co, ci).T.astype(BF16)
        return jnp.pad(m, ((0, _rup(ci, 128) - ci), (0, _rup(co, 128) - co)))

    def prep_3x3(w):                       # (Co, Ci, 3, 3) -> (9*Cip, Cop) bf16
        co, ci = w.shape[:2]
        m = jnp.transpose(w, (2, 3, 1, 0)).astype(BF16)    # (3, 3, Ci, Co)
        m = jnp.pad(m, ((0, 0), (0, 0),
                        (0, _rup(ci, 128) - ci), (0, _rup(co, 128) - co)))
        return m.reshape(9 * _rup(ci, 128), _rup(co, 128))

    Q = {
        "w1": prep_1x1(P["conv1"]["w"]), "bn1": P["bn1"],
        "w2": prep_3x3(P["conv2"]["w"]), "bn2": P["bn2"],
        "w3": prep_1x1(P["conv3"]["w"]), "bn3": P["bn3"],
    }
    if "down_conv" in P:
        Q["wd"] = prep_1x1(P["down_conv"]["w"])
        Q["bnd"] = P["down_bn"]
    return Q


# ---------------------------------------------------------------------------
# Bottleneck forward (matches the PyTorch module, BN in train mode)
# ---------------------------------------------------------------------------
def bottleneck_forward(Q, x_nchw, *, planes, stride, dilation):
    N, Cin, H, W = x_nchw.shape
    C3 = planes * 4
    Cinp, P1p, C3p = _rup(Cin, 128), _rup(planes, 128), _rup(C3, 128)
    d, s = dilation, stride
    OH = (H - 1) // s + 1
    OW = (W - 1) // s + 1
    M0, M1 = N * H * W, N * OH * OW
    M0p, M1p = _rup(M0, 16), _rup(M1, 16)

    # Single entry pad: NCHW f32 -> channel-padded bf16 (M0p, Cinp).
    # This array doubles as the identity residual.
    x_nhwc = jnp.transpose(x_nchw, (0, 2, 3, 1))
    x_p = jnp.pad(x_nhwc.reshape(M0, Cin).astype(BF16),
                  ((0, M0p - M0), (0, Cinp - Cin)))

    # conv1 (1x1) with bn1 batch stats fused into the matmul, then bn1 + relu
    y, s1, b1 = conv_bn(x_p, Q["w1"], Q["bn1"]["gamma"], Q["bn1"]["beta"],
                        M0, planes)
    y = bn_act(y, s1, b1)                                   # bf16 (M0p, P1p)

    # conv2 (3x3, stride, dilation, padding=dilation)
    # TODO(synk): the 3x3 taps are still materialised as one bf16 patch matrix;
    # folding them into the matmul reduction grid (element-offset index_map)
    # would remove this copy but is awkward for the strided/dilated case.
    y_sp = (y if M0p == M0 else y[:M0]).reshape(N, H, W, P1p)
    yp = jnp.pad(y_sp, ((0, 0), (d, d), (d, d), (0, 0)))
    cols = []
    for kh in range(3):
        for kw in range(3):
            cols.append(yp[:, kh * d: kh * d + (OH - 1) * s + 1: s,
                              kw * d: kw * d + (OW - 1) * s + 1: s, :])
    a2 = jnp.concatenate(cols, axis=-1).reshape(M1, 9 * P1p)
    if M1p != M1:
        a2 = jnp.pad(a2, ((0, M1p - M1), (0, 0)))
    y2, s2, b2 = conv_bn(a2, Q["w2"], Q["bn2"]["gamma"], Q["bn2"]["beta"],
                         M1, planes)
    y2 = bn_act(y2, s2, b2)                                 # bf16 (M1p, P1p)

    # conv3 (1x1 -> planes*4); its bn3 fuses with the residual epilogue below
    y3, s3, b3 = conv_bn(y2, Q["w3"], Q["bn3"]["gamma"], Q["bn3"]["beta"],
                         M1, C3)

    # residual branch
    if "wd" in Q:
        xs = (x_p if M0p == M0 else x_p[:M0]).reshape(N, H, W, Cinp)
        xs = xs[:, ::s, ::s, :].reshape(M1, Cinp)
        if M1p != M1:
            xs = jnp.pad(xs, ((0, M1p - M1), (0, 0)))
        r, rs, rb = conv_bn(xs, Q["wd"], Q["bnd"]["gamma"], Q["bnd"]["beta"],
                            M1, C3)
        out = bn_act(y3, s3, b3, residual=r, res_scale=rs, res_bias=rb,
                     act="relu", out_dtype=F32)
    else:
        assert stride == 1 and Cin == C3, \
            "identity residual requires stride==1 and inplanes==planes*4"
        out = bn_act(y3, s3, b3, residual=x_p, act="relu", out_dtype=F32)

    # single exit slice back to the logical shape
    out = out[:M1, :C3].reshape(N, OH, OW, C3)
    return jnp.transpose(out, (0, 3, 1, 2))


# ---------------------------------------------------------------------------
# Pure-JAX reference (for correctness check)
# ---------------------------------------------------------------------------
def reference_forward(P, x, *, stride, dilation):
    def conv(z, w, s=1, d=1, p=0):
        return jax.lax.conv_general_dilated(
            z, w, window_strides=(s, s), padding=((p, p), (p, p)),
            rhs_dilation=(d, d), dimension_numbers=("NCHW", "OIHW", "NCHW"))

    def bn(z, g, b):
        m = jnp.mean(z, axis=(0, 2, 3), keepdims=True)
        v = jnp.var(z, axis=(0, 2, 3), keepdims=True)
        return (z - m) * jax.lax.rsqrt(v + BN_EPS) * g[None, :, None, None] \
            + b[None, :, None, None]

    out = jax.nn.relu(bn(conv(x, P["conv1"]["w"]),
                         P["bn1"]["gamma"], P["bn1"]["beta"]))
    out = jax.nn.relu(bn(conv(out, P["conv2"]["w"], stride, dilation, dilation),
                         P["bn2"]["gamma"], P["bn2"]["beta"]))
    out = bn(conv(out, P["conv3"]["w"]), P["bn3"]["gamma"], P["bn3"]["beta"])
    if "down_conv" in P:
        res = bn(conv(x, P["down_conv"]["w"], stride),
                 P["down_bn"]["gamma"], P["down_bn"]["beta"])
    else:
        res = x
    return jax.nn.relu(out + res)


# ---------------------------------------------------------------------------
# Deterministic parameter construction
# ---------------------------------------------------------------------------
def make_bottleneck_params(key, inplanes, planes, with_downsample):
    expansion = 4
    ks = jax.random.split(key, 8)

    def conv_w(k, co, ci, kh, kw):
        std = (2.0 / (ci * kh * kw)) ** 0.5
        return jax.random.normal(k, (co, ci, kh, kw), F32) * std

    def bn(k, c):
        kg, kb = jax.random.split(k)
        return {"gamma": 1.0 + 0.1 * jax.random.normal(kg, (c,), F32),
                "beta": 0.1 * jax.random.normal(kb, (c,), F32)}

    P = {
        "conv1": {"w": conv_w(ks[0], planes, inplanes, 1, 1)},
        "bn1": bn(ks[1], planes),
        "conv2": {"w": conv_w(ks[2], planes, planes, 3, 3)},
        "bn2": bn(ks[3], planes),
        "conv3": {"w": conv_w(ks[4], planes * expansion, planes, 1, 1)},
        "bn3": bn(ks[5], planes * expansion),
    }
    if with_downsample:
        P["down_conv"] = {"w": conv_w(ks[6], planes * expansion, inplanes, 1, 1)}
        P["down_bn"] = bn(ks[7], planes * expansion)
    return P


if __name__ == "__main__":
    key = jax.random.PRNGKey(0)
    kp_a, kx, kp_b = jax.random.split(key, 3)

    # Config A: identity residual (inplanes == planes*4, stride=1, dilation=1)
    P_a = make_bottleneck_params(kp_a, inplanes=64, planes=16, with_downsample=False)
    Q_a = prepare_bottleneck_params(P_a)
    x_a = jax.random.normal(kx, (2, 64, 16, 16), F32)
    fwd_a = jax.jit(functools.partial(bottleneck_forward,
                                      planes=16, stride=1, dilation=1))
    out_a = jax.block_until_ready(fwd_a(Q_a, x_a))
    assert out_a.shape == (2, 64, 16, 16), out_a.shape
    assert bool(jnp.isfinite(out_a).all())
    ref_a = reference_forward(P_a, x_a, stride=1, dilation=1)
    assert bool(jnp.allclose(out_a, ref_a, atol=0.1, rtol=0.05)), \
        float(jnp.max(jnp.abs(out_a - ref_a)))

    # Config B: strided + dilated conv2 with a 1x1 downsample residual
    P_b = make_bottleneck_params(kp_b, inplanes=32, planes=16, with_downsample=True)
    Q_b = prepare_bottleneck_params(P_b)
    x_b = jax.random.normal(kx, (2, 32, 16, 16), F32)
    fwd_b = jax.jit(functools.partial(bottleneck_forward,
                                      planes=16, stride=2, dilation=2))
    out_b = jax.block_until_ready(fwd_b(Q_b, x_b))
    assert out_b.shape == (2, 64, 8, 8), out_b.shape
    assert bool(jnp.isfinite(out_b).all())
    ref_b = reference_forward(P_b, x_b, stride=2, dilation=2)
    assert bool(jnp.allclose(out_b, ref_b, atol=0.1, rtol=0.05)), \
        float(jnp.max(jnp.abs(out_b - ref_b)))

    print("KERNEL_OK")
</pallas_src>

<mosaic_0001>
module attributes {stable_mosaic.version = 11 : i64} {
  func.func @_matmul_bn_kernel(%arg0: i32, %arg1: i32, %arg2: i32, %arg3: memref<256x128xbf16, #tpu.memory_space<vmem>>, %arg4: memref<128x128xbf16, #tpu.memory_space<vmem>>, %arg5: memref<256x128xbf16, #tpu.memory_space<vmem>>, %arg6: memref<1x1x128xf32, #tpu.memory_space<vmem>>, %arg7: memref<1x1x128xf32, #tpu.memory_space<vmem>>, %arg8: memref<256x128xf32, #tpu.memory_space<vmem>>) attributes {dimension_semantics = [#tpu.dimension_semantics<parallel>, #tpu.dimension_semantics<parallel>, #tpu.dimension_semantics<arbitrary>], iteration_bounds = array<i64: 2, 1, 1>, scalar_prefetch = 0 : i64, scratch_operands = 1 : i64, tpu.core_type = #tpu.core_type<tc>, window_params = [{transform_indices = @transform_0, window_bounds = array<i64: 256, 128>}, {transform_indices = @transform_1, window_bounds = array<i64: 128, 128>}, {transform_indices = @transform_2, window_bounds = array<i64: 256, 128>}, {transform_indices = @transform_3, window_bounds = array<i64: 1, 1, 128>}, {transform_indices = @transform_4, window_bounds = array<i64: 1, 1, 128>}]} {
    %c0_i32 = arith.constant 0 : i32
    %0 = arith.cmpi eq, %arg2, %c0_i32 : i32
    %1 = arith.extui %0 : i1 to i32
    %c0_i32_0 = arith.constant 0 : i32
    %2 = arith.cmpi ne, %1, %c0_i32_0 : i32
    scf.if %2 {
      %cst_10 = arith.constant 0.000000e+00 : f32
      %12 = vector.broadcast %cst_10 : f32 to vector<256x128xf32>
      %c0_11 = arith.constant 0 : index
      %c0_12 = arith.constant 0 : index
      %13 = vector.load %arg8[%c0_11, %c0_12] : memref<256x128xf32, #tpu.memory_space<vmem>>, vector<256x128xf32>
      tpu.vector_store %arg8[%c0_11, %c0_12], %12 {strides = array<i32>} : memref<256x128xf32, #tpu.memory_space<vmem>>, vector<256x128xf32>,
    } else {
    }
    %c0 = arith.constant 0 : index
    %c0_1 = arith.constant 0 : index
    %3 = vector.load %arg8[%c0, %c0_1] : memref<256x128xf32, #tpu.memory_space<vmem>>, vector<256x128xf32>
    %c0_2 = arith.constant 0 : index
    %c0_3 = arith.constant 0 : index
    %4 = vector.load %arg3[%c0_2, %c0_3] : memref<256x128xbf16, #tpu.memory_space<vmem>>, vector<256x128xbf16>
    %c0_4 = arith.constant 0 : index
    %c0_5 = arith.constant 0 : index
    %5 = vector.load %arg4[%c0_4, %c0_5] : memref<128x128xbf16, #tpu.memory_space<vmem>>, vector<128x128xbf16>
    %cst = arith.constant dense<0.000000e+00> : vector<256x128xf32>
    %6 = tpu.matmul %4, %5, %cst {dimension_numbers = #tpu.dot_dimension_numbers<[1], [0], [0], [1], [0, 0, 1, 1], [], []>} : vector<256x128xbf16>, vector<128x128xbf16>, vector<256x128xf32> -> vector<256x128xf32>
    %7 = arith.addf %3, %6 : vector<256x128xf32>
    %c0_6 = arith.constant 0 : index
    %c0_7 = arith.constant 0 : index
    %8 = vector.load %arg8[%c0_6, %c0_7] : memref<256x128xf32, #tpu.memory_space<vmem>>, vector<256x128xf32>
    tpu.vector_store %arg8[%c0_6, %c0_7], %7 {strides = array<i32>} : memref<256x128xf32, #tpu.memory_space<vmem>>, vector<256x128xf32>,
    %c0_i32_8 = arith.constant 0 : i32
    %9 = arith.cmpi eq, %arg2, %c0_i32_8 : i32
    %10 = arith.extui %9 : i1 to i32
    %c0_i32_9 = arith.constant 0 : i32
    %11 = arith.cmpi ne, %10, %c0_i32_9 : i32
    scf.if %11 {
      %c0_10 = arith.constant 0 : index
      %c0_11 = arith.constant 0 : index
      %12 = vector.load %arg8[%c0_10, %c0_11] : memref<256x128xf32, #tpu.memory_space<vmem>>, vector<256x128xf32>
      %13 = arith.truncf %12 : vector<256x128xf32> to vector<256x128xbf16>
      %c0_12 = arith.constant 0 : index
      %c0_13 = arith.constant 0 : index
      %14 = vector.load %arg5[%c0_12, %c0_13] : memref<256x128xbf16, #tpu.memory_space<vmem>>, vector<256x128xbf16>
      tpu.vector_store %arg5[%c0_12, %c0_13], %13 {strides = array<i32>} : memref<256x128xbf16, #tpu.memory_space<vmem>>, vector<256x128xbf16>,
      %cst_14 = arith.constant dense<0.000000e+00> : vector<128xf32>
      %15 = vector.multi_reduction <add>, %12, %cst_14 [0] : vector<256x128xf32> to vector<128xf32>
      %16 = vector.shape_cast %15 : vector<128xf32> to vector<1x128xf32>
      %17 = vector.shape_cast %16 : vector<1x128xf32> to vector<1x1x128xf32>
      %c0_15 = arith.constant 0 : index
      %c0_16 = arith.constant 0 : index
      %c0_17 = arith.constant 0 : index
      %18 = vector.load %arg6[%c0_15, %c0_16, %c0_17] : memref<1x1x128xf32, #tpu.memory_space<vmem>>, vector<1x1x128xf32>
      tpu.vector_store %arg6[%c0_15, %c0_16, %c0_17], %17 {strides = array<i32>} : memref<1x1x128xf32, #tpu.memory_space<vmem>>, vector<1x1x128xf32>,
      %19 = arith.mulf %12, %12 : vector<256x128xf32>
      %cst_18 = arith.constant dense<0.000000e+00> : vector<128xf32>
      %20 = vector.multi_reduction <add>, %19, %cst_18 [0] : vector<256x128xf32> to vector<128xf32>
      %21 = vector.shape_cast %20 : vector<128xf32> to vector<1x128xf32>
      %22 = vector.shape_cast %21 : vector<1x128xf32> to vector<1x1x128xf32>
      %c0_19 = arith.constant 0 : index
      %c0_20 = arith.constant 0 : index
      %c0_21 = arith.constant 0 : index
      %23 = vector.load %arg7[%c0_19, %c0_20, %c0_21] : memref<1x1x128xf32, #tpu.memory_space<vmem>>, vector<1x1x128xf32>
      tpu.vector_store %arg7[%c0_19, %c0_20, %c0_21], %22 {strides = array<i32>} : memref<1x1x128xf32, #tpu.memory_space<vmem>>, vector<1x1x128xf32>,
    } else {
    }
    return
  }
  func.func @transform_0(%arg0: i32, %arg1: i32, %arg2: i32) -> (i32, i32) {
    %c0_i32 = arith.constant 0 : i32
    return %arg0, %arg2 : i32, i32
  }
  func.func @transform_1(%arg0: i32, %arg1: i32, %arg2: i32) -> (i32, i32) {
    %c0_i32 = arith.constant 0 : i32
    return %arg2, %arg1 : i32, i32
  }
  func.func @transform_2(%arg0: i32, %arg1: i32, %arg2: i32) -> (i32, i32) {
    %c0_i32 = arith.constant 0 : i32
    return %arg0, %arg1 : i32, i32
  }
  func.func @transform_3(%arg0: i32, %arg1: i32, %arg2: i32) -> (i32, i32, i32) {
    %c0_i32 = arith.constant 0 : i32
    %c0_i32_0 = arith.constant 0 : i32
    return %arg0, %c0_i32, %arg1 : i32, i32, i32
  }
  func.func @transform_4(%arg0: i32, %arg1: i32, %arg2: i32) -> (i32, i32, i32) {
    %c0_i32 = arith.constant 0 : i32
    %c0_i32_0 = arith.constant 0 : i32
    return %arg0, %c0_i32, %arg1 : i32, i32, i32
  }
}

module attributes {stable_mosaic.version = 11 : i64} {
  func.func @_bn_act_kernel(%arg0: i32, %arg1: i32, %arg2: memref<256x128xbf16, #tpu.memory_space<vmem>>, %arg3: memref<1x128xf32, #tpu.memory_space<vmem>>, %arg4: memref<1x128xf32, #tpu.memory_space<vmem>>, %arg5: memref<256x128xbf16, #tpu.memory_space<vmem>>) attributes {dimension_semantics = [#tpu.dimension_semantics<parallel>, #tpu.dimension_semantics<parallel>], iteration_bounds = array<i64: 2, 1>, scalar_prefetch = 0 : i64, scratch_operands = 0 : i64, tpu.core_type = #tpu.core_type<tc>, window_params = [{transform_indices = @transform_0, window_bounds = array<i64: 256, 128>}, {transform_indices = @transform_1, window_bounds = array<i64: 1, 128>}, {transform_indices = @transform_2, window_bounds = array<i64: 1, 128>}, {transform_indices = @transform_3, window_bounds = array<i64: 256, 128>}]} {
    %c0 = arith.constant 0 : index
    %c0_0 = arith.constant 0 : index
    %0 = vector.load %arg2[%c0, %c0_0] : memref<256x128xbf16, #tpu.memory_space<vmem>>, vector<256x128xbf16>
    %1 = arith.extf %0 : vector<256x128xbf16> to vector<256x128xf32>
    %c0_1 = arith.constant 0 : index
    %c0_2 = arith.constant 0 : index
    %2 = vector.load %arg3[%c0_1, %c0_2] : memref<1x128xf32, #tpu.memory_space<vmem>>, vector<1x128xf32>
    %3 = vector.broadcast %2 : vector<1x128xf32> to vector<256x128xf32>
    %4 = arith.mulf %1, %3 : vector<256x128xf32>
    %c0_3 = arith.constant 0 : index
    %c0_4 = arith.constant 0 : index
    %5 = vector.load %arg4[%c0_3, %c0_4] : memref<1x128xf32, #tpu.memory_space<vmem>>, vector<1x128xf32>
    %6 = vector.broadcast %5 : vector<1x128xf32> to vector<256x128xf32>
    %7 = arith.addf %4, %6 : vector<256x128xf32>
    %cst = arith.constant 0.000000e+00 : f32
    %8 = vector.broadcast %cst : f32 to vector<256x128xf32>
    %9 = arith.maximumf %7, %8 : vector<256x128xf32>
    %10 = arith.truncf %9 : vector<256x128xf32> to vector<256x128xbf16>
    %c0_5 = arith.constant 0 : index
    %c0_6 = arith.constant 0 : index
    %11 = vector.load %arg5[%c0_5, %c0_6] : memref<256x128xbf16, #tpu.memory_space<vmem>>, vector<256x128xbf16>
    tpu.vector_store %arg5[%c0_5, %c0_6], %10 {strides = array<i32>} : memref<256x128xbf16, #tpu.memory_space<vmem>>, vector<256x128xbf16>,
    return
  }
  func.func @transform_0(%arg0: i32, %arg1: i32) -> (i32, i32) {
    %c0_i32 = arith.constant 0 : i32
    return %arg0, %arg1 : i32, i32
  }
  func.func @transform_1(%arg0: i32, %arg1: i32) -> (i32, i32) {
    %c0_i32 = arith.constant 0 : i32
    %c0_i32_0 = arith.constant 0 : i32
    return %c0_i32, %arg1 : i32, i32
  }
  func.func @transform_2(%arg0: i32, %arg1: i32) -> (i32, i32) {
    %c0_i32 = arith.constant 0 : i32
    %c0_i32_0 = arith.constant 0 : i32
    return %c0_i32, %arg1 : i32, i32
  }
  func.func @transform_3(%arg0: i32, %arg1: i32) -> (i32, i32) {
    %c0_i32 = arith.constant 0 : i32
    return %arg0, %arg1 : i32, i32
  }
}

module attributes {stable_mosaic.version = 11 : i64} {
  func.func @_matmul_bn_kernel(%arg0: i32, %arg1: i32, %arg2: i32, %arg3: memref<256x384xbf16, #tpu.memory_space<vmem>>, %arg4: memref<384x128xbf16, #tpu.memory_space<vmem>>, %arg5: memref<256x128xbf16, #tpu.memory_space<vmem>>, %arg6: memref<1x1x128xf32, #tpu.memory_space<vmem>>, %arg7: memref<1x1x128xf32, #tpu.memory_space<vmem>>, %arg8: memref<256x128xf32, #tpu.memory_space<vmem>>) attributes {dimension_semantics = [#tpu.dimension_semantics<parallel>, #tpu.dimension_semantics<parallel>, #tpu.dimension_semantics<arbitrary>], iteration_bounds = array<i64: 2, 1, 3>, scalar_prefetch = 0 : i64, scratch_operands = 1 : i64, tpu.core_type = #tpu.core_type<tc>, window_params = [{transform_indices = @transform_0, window_bounds = array<i64: 256, 384>}, {transform_indices = @transform_1, window_bounds = array<i64: 384, 128>}, {transform_indices = @transform_2, window_bounds = array<i64: 256, 128>}, {transform_indices = @transform_3, window_bounds = array<i64: 1, 1, 128>}, {transform_indices = @transform_4, window_bounds = array<i64: 1, 1, 128>}]} {
    %c0_i32 = arith.constant 0 : i32
    %0 = arith.cmpi eq, %arg2, %c0_i32 : i32
    %1 = arith.extui %0 : i1 to i32
    %c0_i32_0 = arith.constant 0 : i32
    %2 = arith.cmpi ne, %1, %c0_i32_0 : i32
    scf.if %2 {
      %cst_9 = arith.constant 0.000000e+00 : f32
      %12 = vector.broadcast %cst_9 : f32 to vector<256x128xf32>
      %c0_10 = arith.constant 0 : index
      %c0_11 = arith.constant 0 : index
      %13 = vector.load %arg8[%c0_10, %c0_11] : memref<256x128xf32, #tpu.memory_space<vmem>>, vector<256x128xf32>
      tpu.vector_store %arg8[%c0_10, %c0_11], %12 {strides = array<i32>} : memref<256x128xf32, #tpu.memory_space<vmem>>, vector<256x128xf32>,
    } else {
    }
    %c0 = arith.constant 0 : index
    %c0_1 = arith.constant 0 : index
    %3 = vector.load %arg8[%c0, %c0_1] : memref<256x128xf32, #tpu.memory_space<vmem>>, vector<256x128xf32>
    %c0_2 = arith.constant 0 : index
    %c0_3 = arith.constant 0 : index
    %4 = vector.load %arg3[%c0_2, %c0_3] : memref<256x384xbf16, #tpu.memory_space<vmem>>, vector<256x384xbf16>
    %c0_4 = arith.constant 0 : index
    %c0_5 = arith.constant 0 : index
    %5 = vector.load %arg4[%c0_4, %c0_5] : memref<384x128xbf16, #tpu.memory_space<vmem>>, vector<384x128xbf16>
    %cst = arith.constant dense<0.000000e+00> : vector<256x128xf32>
    %6 = tpu.matmul %4, %5, %cst {dimension_numbers = #tpu.dot_dimension_numbers<[1], [0], [0], [1], [0, 0, 1, 1], [], []>} : vector<256x384xbf16>, vector<384x128xbf16>, vector<256x128xf32> -> vector<256x128xf32>
    %7 = arith.addf %3, %6 : vector<256x128xf32>
    %c0_6 = arith.constant 0 : index
    %c0_7 = arith.constant 0 : index
    %8 = vector.load %arg8[%c0_6, %c0_7] : memref<256x128xf32, #tpu.memory_space<vmem>>, vector<256x128xf32>
    tpu.vector_store %arg8[%c0_6, %c0_7], %7 {strides = array<i32>} : memref<256x128xf32, #tpu.memory_space<vmem>>, vector<256x128xf32>,
    %c2_i32 = arith.constant 2 : i32
    %9 = arith.cmpi eq, %arg2, %c2_i32 : i32
    %10 = arith.extui %9 : i1 to i32
    %c0_i32_8 = arith.constant 0 : i32
    %11 = arith.cmpi ne, %10, %c0_i32_8 : i32
    scf.if %11 {
      %c0_9 = arith.constant 0 : index
      %c0_10 = arith.constant 0 : index
      %12 = vector.load %arg8[%c0_9, %c0_10] : memref<256x128xf32, #tpu.memory_space<vmem>>, vector<256x128xf32>
      %13 = arith.truncf %12 : vector<256x128xf32> to vector<256x128xbf16>
      %c0_11 = arith.constant 0 : index
      %c0_12 = arith.constant 0 : index
      %14 = vector.load %arg5[%c0_11, %c0_12] : memref<256x128xbf16, #tpu.memory_space<vmem>>, vector<256x128xbf16>
      tpu.vector_store %arg5[%c0_11, %c0_12], %13 {strides = array<i32>} : memref<256x128xbf16, #tpu.memory_space<vmem>>, vector<256x128xbf16>,
      %cst_13 = arith.constant dense<0.000000e+00> : vector<128xf32>
      %15 = vector.multi_reduction <add>, %12, %cst_13 [0] : vector<256x128xf32> to vector<128xf32>
      %16 = vector.shape_cast %15 : vector<128xf32> to vector<1x128xf32>
      %17 = vector.shape_cast %16 : vector<1x128xf32> to vector<1x1x128xf32>
      %c0_14 = arith.constant 0 : index
      %c0_15 = arith.constant 0 : index
      %c0_16 = arith.constant 0 : index
      %18 = vector.load %arg6[%c0_14, %c0_15, %c0_16] : memref<1x1x128xf32, #tpu.memory_space<vmem>>, vector<1x1x128xf32>
      tpu.vector_store %arg6[%c0_14, %c0_15, %c0_16], %17 {strides = array<i32>} : memref<1x1x128xf32, #tpu.memory_space<vmem>>, vector<1x1x128xf32>,
      %19 = arith.mulf %12, %12 : vector<256x128xf32>
      %cst_17 = arith.constant dense<0.000000e+00> : vector<128xf32>
      %20 = vector.multi_reduction <add>, %19, %cst_17 [0] : vector<256x128xf32> to vector<128xf32>
      %21 = vector.shape_cast %20 : vector<128xf32> to vector<1x128xf32>
      %22 = vector.shape_cast %21 : vector<1x128xf32> to vector<1x1x128xf32>
      %c0_18 = arith.constant 0 : index
      %c0_19 = arith.constant 0 : index
      %c0_20 = arith.constant 0 : index
      %23 = vector.load %arg7[%c0_18, %c0_19, %c0_20] : memref<1x1x128xf32, #tpu.memory_space<vmem>>, vector<1x1x128xf32>
      tpu.vector_store %arg7[%c0_18, %c0_19, %c0_20], %22 {strides = array<i32>} : memref<1x1x128xf32, #tpu.memory_space<vmem>>, vector<1x1x128xf32>,
    } else {
    }
    return
  }
  func.func @transform_0(%arg0: i32, %arg1: i32, %arg2: i32) -> (i32, i32) {
    %c0_i32 = arith.constant 0 : i32
    return %arg0, %arg2 : i32, i32
  }
  func.func @transform_1(%arg0: i32, %arg1: i32, %arg2: i32) -> (i32, i32) {
    %c0_i32 = arith.constant 0 : i32
    return %arg2, %arg1 : i32, i32
  }
  func.func @transform_2(%arg0: i32, %arg1: i32, %arg2: i32) -> (i32, i32) {
    %c0_i32 = arith.constant 0 : i32
    return %arg0, %arg1 : i32, i32
  }
  func.func @transform_3(%arg0: i32, %arg1: i32, %arg2: i32) -> (i32, i32, i32) {
    %c0_i32 = arith.constant 0 : i32
    %c0_i32_0 = arith.constant 0 : i32
    return %arg0, %c0_i32, %arg1 : i32, i32, i32
  }
  func.func @transform_4(%arg0: i32, %arg1: i32, %arg2: i32) -> (i32, i32, i32) {
    %c0_i32 = arith.constant 0 : i32
    %c0_i32_0 = arith.constant 0 : i32
    return %arg0, %c0_i32, %arg1 : i32, i32, i32
  }
}

module attributes {stable_mosaic.version = 11 : i64} {
  func.func @_bn_act_kernel(%arg0: i32, %arg1: i32, %arg2: memref<256x128xbf16, #tpu.memory_space<vmem>>, %arg3: memref<1x128xf32, #tpu.memory_space<vmem>>, %arg4: memref<1x128xf32, #tpu.memory_space<vmem>>, %arg5: memref<256x128xbf16, #tpu.memory_space<vmem>>, %arg6: memref<256x128xf32, #tpu.memory_space<vmem>>) attributes {dimension_semantics = [#tpu.dimension_semantics<parallel>, #tpu.dimension_semantics<parallel>], iteration_bounds = array<i64: 2, 1>, scalar_prefetch = 0 : i64, scratch_operands = 0 : i64, tpu.core_type = #tpu.core_type<tc>, window_params = [{transform_indices = @transform_0, window_bounds = array<i64: 256, 128>}, {transform_indices = @transform_1, window_bounds = array<i64: 1, 128>}, {transform_indices = @transform_2, window_bounds = array<i64: 1, 128>}, {transform_indices = @transform_3, window_bounds = array<i64: 256, 128>}, {transform_indices = @transform_4, window_bounds = array<i64: 256, 128>}]} {
    %c0 = arith.constant 0 : index
    %c0_0 = arith.constant 0 : index
    %0 = vector.load %arg2[%c0, %c0_0] : memref<256x128xbf16, #tpu.memory_space<vmem>>, vector<256x128xbf16>
    %1 = arith.extf %0 : vector<256x128xbf16> to vector<256x128xf32>
    %c0_1 = arith.constant 0 : index
    %c0_2 = arith.constant 0 : index
    %2 = vector.load %arg3[%c0_1, %c0_2] : memref<1x128xf32, #tpu.memory_space<vmem>>, vector<1x128xf32>
    %3 = vector.broadcast %2 : vector<1x128xf32> to vector<256x128xf32>
    %4 = arith.mulf %1, %3 : vector<256x128xf32>
    %c0_3 = arith.constant 0 : index
    %c0_4 = arith.constant 0 : index
    %5 = vector.load %arg4[%c0_3, %c0_4] : memref<1x128xf32, #tpu.memory_space<vmem>>, vector<1x128xf32>
    %6 = vector.broadcast %5 : vector<1x128xf32> to vector<256x128xf32>
    %7 = arith.addf %4, %6 : vector<256x128xf32>
    %c0_5 = arith.constant 0 : index
    %c0_6 = arith.constant 0 : index
    %8 = vector.load %arg5[%c0_5, %c0_6] : memref<256x128xbf16, #tpu.memory_space<vmem>>, vector<256x128xbf16>
    %9 = arith.extf %8 : vector<256x128xbf16> to vector<256x128xf32>
    %10 = arith.addf %7, %9 : vector<256x128xf32>
    %cst = arith.constant 0.000000e+00 : f32
    %11 = vector.broadcast %cst : f32 to vector<256x128xf32>
    %12 = arith.maximumf %10, %11 : vector<256x128xf32>
    %c0_7 = arith.constant 0 : index
    %c0_8 = arith.constant 0 : index
    %13 = vector.load %arg6[%c0_7, %c0_8] : memref<256x128xf32, #tpu.memory_space<vmem>>, vector<256x128xf32>
    tpu.vector_store %arg6[%c0_7, %c0_8], %12 {strides = array<i32>} : memref<256x128xf32, #tpu.memory_space<vmem>>, vector<256x128xf32>,
    return
  }
  func.func @transform_0(%arg0: i32, %arg1: i32) -> (i32, i32) {
    %c0_i32 = arith.constant 0 : i32
    return %arg0, %arg1 : i32, i32
  }
  func.func @transform_1(%arg0: i32, %arg1: i32) -> (i32, i32) {
    %c0_i32 = arith.constant 0 : i32
    %c0_i32_0 = arith.constant 0 : i32
    return %c0_i32, %arg1 : i32, i32
  }
  func.func @transform_2(%arg0: i32, %arg1: i32) -> (i32, i32) {
    %c0_i32 = arith.constant 0 : i32
    %c0_i32_0 = arith.constant 0 : i32
    return %c0_i32, %arg1 : i32, i32
  }
  func.func @transform_3(%arg0: i32, %arg1: i32) -> (i32, i32) {
    %c0_i32 = arith.constant 0 : i32
    return %arg0, %arg1 : i32, i32
  }
  func.func @transform_4(%arg0: i32, %arg1: i32) -> (i32, i32) {
    %c0_i32 = arith.constant 0 : i32
    return %arg0, %arg1 : i32, i32
  }
}

module attributes {stable_mosaic.version = 11 : i64} {
  func.func @_matmul_bn_kernel(%arg0: i32, %arg1: i32, %arg2: i32, %arg3: memref<256x128xbf16, #tpu.memory_space<vmem>>, %arg4: memref<128x128xbf16, #tpu.memory_space<vmem>>, %arg5: memref<256x128xbf16, #tpu.memory_space<vmem>>, %arg6: memref<1x1x128xf32, #tpu.memory_space<vmem>>, %arg7: memref<1x1x128xf32, #tpu.memory_space<vmem>>, %arg8: memref<256x128xf32, #tpu.memory_space<vmem>>) attributes {dimension_semantics = [#tpu.dimension_semantics<parallel>, #tpu.dimension_semantics<parallel>, #tpu.dimension_semantics<arbitrary>], iteration_bounds = array<i64: 2, 1, 1>, scalar_prefetch = 0 : i64, scratch_operands = 1 : i64, tpu.core_type = #tpu.core_type<tc>, window_params = [{transform_indices = @transform_0, window_bounds = array<i64: 256, 128>}, {transform_indices = @transform_1, window_bounds = array<i64: 128, 128>}, {transform_indices = @transform_2, window_bounds = array<i64: 256, 128>}, {transform_indices = @transform_3, window_bounds = array<i64: 1, 1, 128>}, {transform_indices = @transform_4, window_bounds = array<i64: 1, 1, 128>}]} {
    %c0_i32 = arith.constant 0 : i32
    %0 = arith.cmpi eq, %arg2, %c0_i32 : i32
    %1 = arith.extui %0 : i1 to i32
    %c0_i32_0 = arith.constant 0 : i32
    %2 = arith.cmpi ne, %1, %c0_i32_0 : i32
    scf.if %2 {
      %cst_10 = arith.constant 0.000000e+00 : f32
      %12 = vector.broadcast %cst_10 : f32 to vector<256x128xf32>
      %c0_11 = arith.constant 0 : index
      %c0_12 = arith.constant 0 : index
      %13 = vector.load %arg8[%c0_11, %c0_12] : memref<256x128xf32, #tpu.memory_space<vmem>>, vector<256x128xf32>
      tpu.vector_store %arg8[%c0_11, %c0_12], %12 {strides = array<i32>} : memref<256x128xf32, #tpu.memory_space<vmem>>, vector<256x128xf32>,
    } else {
    }
    %c0 = arith.constant 0 : index
    %c0_1 = arith.constant 0 : index
    %3 = vector.load %arg8[%c0, %c0_1] : memref<256x128xf32, #tpu.memory_space<vmem>>, vector<256x128xf32>
    %c0_2 = arith.constant 0 : index
    %c0_3 = arith.constant 0 : index
    %4 = vector.load %arg3[%c0_2, %c0_3] : memref<256x128xbf16, #tpu.memory_space<vmem>>, vector<256x128xbf16>
    %c0_4 = arith.constant 0 : index
    %c0_5 = arith.constant 0 : index
    %5 = vector.load %arg4[%c0_4, %c0_5] : memref<128x128xbf16, #tpu.memory_space<vmem>>, vector<128x128xbf16>
    %cst = arith.constant dense<0.000000e+00> : vector<256x128xf32>
    %6 = tpu.matmul %4, %5, %cst {dimension_numbers = #tpu.dot_dimension_numbers<[1], [0], [0], [1], [0, 0, 1, 1], [], []>} : vector<256x128xbf16>, vector<128x128xbf16>, vector<256x128xf32> -> vector<256x128xf32>
    %7 = arith.addf %3, %6 : vector<256x128xf32>
    %c0_6 = arith.constant 0 : index
    %c0_7 = arith.constant 0 : index
    %8 = vector.load %arg8[%c0_6, %c0_7] : memref<256x128xf32, #tpu.memory_space<vmem>>, vector<256x128xf32>
    tpu.vector_store %arg8[%c0_6, %c0_7], %7 {strides = array<i32>} : memref<256x128xf32, #tpu.memory_space<vmem>>, vector<256x128xf32>,
    %c0_i32_8 = arith.constant 0 : i32
    %9 = arith.cmpi eq, %arg2, %c0_i32_8 : i32
    %10 = arith.extui %9 : i1 to i32
    %c0_i32_9 = arith.constant 0 : i32
    %11 = arith.cmpi ne, %10, %c0_i32_9 : i32
    scf.if %11 {
      %c0_10 = arith.constant 0 : index
      %c0_11 = arith.constant 0 : index
      %12 = vector.load %arg8[%c0_10, %c0_11] : memref<256x128xf32, #tpu.memory_space<vmem>>, vector<256x128xf32>
      %13 = arith.truncf %12 : vector<256x128xf32> to vector<256x128xbf16>
      %c0_12 = arith.constant 0 : index
      %c0_13 = arith.constant 0 : index
      %14 = vector.load %arg5[%c0_12, %c0_13] : memref<256x128xbf16, #tpu.memory_space<vmem>>, vector<256x128xbf16>
      tpu.vector_store %arg5[%c0_12, %c0_13], %13 {strides = array<i32>} : memref<256x128xbf16, #tpu.memory_space<vmem>>, vector<256x128xbf16>,
      %cst_14 = arith.constant dense<0.000000e+00> : vector<128xf32>
      %15 = vector.multi_reduction <add>, %12, %cst_14 [0] : vector<256x128xf32> to vector<128xf32>
      %16 = vector.shape_cast %15 : vector<128xf32> to vector<1x128xf32>
      %17 = vector.shape_cast %16 : vector<1x128xf32> to vector<1x1x128xf32>
      %c0_15 = arith.constant 0 : index
      %c0_16 = arith.constant 0 : index
      %c0_17 = arith.constant 0 : index
      %18 = vector.load %arg6[%c0_15, %c0_16, %c0_17] : memref<1x1x128xf32, #tpu.memory_space<vmem>>, vector<1x1x128xf32>
      tpu.vector_store %arg6[%c0_15, %c0_16, %c0_17], %17 {strides = array<i32>} : memref<1x1x128xf32, #tpu.memory_space<vmem>>, vector<1x1x128xf32>,
      %19 = arith.mulf %12, %12 : vector<256x128xf32>
      %cst_18 = arith.constant dense<0.000000e+00> : vector<128xf32>
      %20 = vector.multi_reduction <add>, %19, %cst_18 [0] : vector<256x128xf32> to vector<128xf32>
      %21 = vector.shape_cast %20 : vector<128xf32> to vector<1x128xf32>
      %22 = vector.shape_cast %21 : vector<1x128xf32> to vector<1x1x128xf32>
      %c0_19 = arith.constant 0 : index
      %c0_20 = arith.constant 0 : index
      %c0_21 = arith.constant 0 : index
      %23 = vector.load %arg7[%c0_19, %c0_20, %c0_21] : memref<1x1x128xf32, #tpu.memory_space<vmem>>, vector<1x1x128xf32>
      tpu.vector_store %arg7[%c0_19, %c0_20, %c0_21], %22 {strides = array<i32>} : memref<1x1x128xf32, #tpu.memory_space<vmem>>, vector<1x1x128xf32>,
    } else {
    }
    return
  }
  func.func @transform_0(%arg0: i32, %arg1: i32, %arg2: i32) -> (i32, i32) {
    %c0_i32 = arith.constant 0 : i32
    return %arg0, %arg2 : i32, i32
  }
  func.func @transform_1(%arg0: i32, %arg1: i32, %arg2: i32) -> (i32, i32) {
    %c0_i32 = arith.constant 0 : i32
    return %arg2, %arg1 : i32, i32
  }
  func.func @transform_2(%arg0: i32, %arg1: i32, %arg2: i32) -> (i32, i32) {
    %c0_i32 = arith.constant 0 : i32
    return %arg0, %arg1 : i32, i32
  }
  func.func @transform_3(%arg0: i32, %arg1: i32, %arg2: i32) -> (i32, i32, i32) {
    %c0_i32 = arith.constant 0 : i32
    %c0_i32_0 = arith.constant 0 : i32
    return %arg0, %c0_i32, %arg1 : i32, i32, i32
  }
  func.func @transform_4(%arg0: i32, %arg1: i32, %arg2: i32) -> (i32, i32, i32) {
    %c0_i32 = arith.constant 0 : i32
    %c0_i32_0 = arith.constant 0 : i32
    return %arg0, %c0_i32, %arg1 : i32, i32, i32
  }
}

</mosaic_0001>

<bundles_post_ra>
// kernel: bottleneck_forward.7
= control target key start
LH: loop header
LB: loop body
LE: loop exit
PB: predicated region body
PF: predicated region fallthrough
CT: control target
= control target key end

     0   :  { %s824_s12 = smov 0   ;;  %s826_s13 = smov 0   ;;  %s974_s0 = inlined_call_operand.vmem [shape: bf16[512,128], index: 0, kind: input, shape index: {}]   ;;  %s975_s1 = inlined_call_operand.vmem [shape: f32[1,128], index: 1, kind: input, shape index: {}]   ;;  %s976_s2 = inlined_call_operand.vmem [shape: f32[1,128], index: 2, kind: input, shape index: {}]   ;;  %s977_s3 = inlined_call_operand.vmem [shape: bf16[512,128], index: 3, kind: output, shape index: {}]  }
   0x1   :  { %s828_s14 = smov 0  }
   0x2 LB: > { %s25_s15 = sadd.s32 1, %s798_s13  ;;  %p573_p0 = scmp.ge.s32.totalorder %s802_s14, 1  ;;  %s802_s14 = sphi %s828_s14, %s13_s14   ;;  %s798_s13 = sphi %s826_s13, %s979_s13   ;;  %s794_s12 = sphi %s824_s12, %s978_s12  }
   0x3   : > { %p27_p1 = scmp.ge.s32.totalorder %s25_s15, 2  ;;  %p173_p2 = scmp.lt.s32.totalorder %s802_s14, 3 }
   0x5   : > { %s981_s15 = smov (%p27_p1, %s25_s15), 0  ;;  %p174_p3 = pnand %p573_p0, %p173_p2 }
   0x6   : > { %s574_s16 = sshll.u32 (!%p174_p3), %s794_s12, 5 }
   0x7   : > { %177 = sbr.rel (%p174_p3) target bundleno = 58 (0x3a), region = 32  ;;  %p210_p4 = scmp.lt.s32.totalorder (!%p174_p3), %s574_s16, 63 }
   0xc   : > { %s983_s16 = smov (!%p210_p4, %s574_s16), 63  ;;  %v855_v0 = vld [vmem:[%s975_s1] ss:$0 sm:$0xff] }
   0xd   : > { %s575_s17 = sshll.u32 %s983_s16, 2  ;;  %v863_v6 = vld [vmem:[%s976_s2] ss:$0 sm:$0xff] }
   0xe   : > { %s850_s20 = scalar_lea.vmem %s974_s0, %s575_s17  ;;  %s889_s27 = scalar_lea.vmem %s977_s3, %s575_s17 }
   0xf   : > { %v581_v1 = vld [vmem:[%s850_s20] sm:$0xff]   ;;  %v724_v2 = vld [vmem:[%s850_s20 + $0x8] sm:$0xff]   ;;  %v725_v3 = vld [vmem:[%s850_s20 + $0x10] sm:$0xff]  }
  0x10   : > { %v582_v4 = vunpack.c.l.bf16 %v581_v1  ;;  %v583_v5 = vunpack.c.h.bf16 %v581_v1  ;;  %v586_v7 = vunpack.c.l.bf16 %v724_v2  ;;  %v587_v8 = vunpack.c.h.bf16 %v724_v2  ;;  %v726_v9 = vld [vmem:[%s850_s20 + $0x18] sm:$0xff]   ;;  %v727_v30 = vld [vmem:[%s850_s20 + $0x20] sm:$0xff]   ;;  %v728_v35 = vld [vmem:[%s850_s20 + $0x28] sm:$0xff]  }
  0x11   : > { %v590_v10 = vunpack.c.l.bf16 %v725_v3  ;;  %v591_v11 = vunpack.c.h.bf16 %v725_v3  ;;  %v594_v12 = vunpack.c.l.bf16 %v726_v9  ;;  %v595_v13 = vunpack.c.h.bf16 %v726_v9  ;;  %v729_v40 = vld [vmem:[%s850_s20 + $0x30] sm:$0xff]   ;;  %v730_v45 = vld [vmem:[%s850_s20 + $0x38] sm:$0xff]   ;;  %v731_v3 = vld [vmem:[%s850_s20 + $0x40] sm:$0xff]  }
  0x12   : > { %v301_v14 = vmul.f32 %v855_v0, %v582_v4  ;;  %v302_v15 = vmul.f32 %v855_v0, %v583_v5  ;;  %v303_v16 = vmul.f32 %v855_v0, %v586_v7  ;;  %v304_v17 = vmul.f32 %v855_v0, %v587_v8 }
  0x13   : > { %v305_v18 = vmul.f32 %v855_v0, %v590_v10  ;;  %v306_v19 = vmul.f32 %v855_v0, %v591_v11  ;;  %v307_v20 = vmul.f32 %v855_v0, %v594_v12  ;;  %v308_v21 = vmul.f32 %v855_v0, %v595_v13  ;;  %v732_v13 = vld [vmem:[%s850_s20 + $0x48] sm:$0xff]  }
  0x14   : > { %v337_v22 = vadd.f32 %v863_v6, %v301_v14  ;;  %v338_v23 = vadd.f32 %v863_v6, %v302_v15  ;;  %v339_v24 = vadd.f32 %v863_v6, %v303_v16  ;;  %v340_v25 = vadd.f32 %v863_v6, %v304_v17 }
  0x15   : > { %v341_v26 = vadd.f32 %v863_v6, %v305_v18  ;;  %v342_v27 = vadd.f32 %v863_v6, %v306_v19  ;;  %v343_v28 = vadd.f32 %v863_v6, %v307_v20  ;;  %v344_v29 = vadd.f32 %v863_v6, %v308_v21  ;;  %v733_v18 = vld [vmem:[%s850_s20 + $0x50] sm:$0xff]  }
  0x16   : > { %v369_v31 = vmax.f32 %v337_v22, 0.0  ;;  %v370_v32 = vmax.f32 %v338_v23, 0.0  ;;  %v371_v33 = vmax.f32 %v339_v24, 0.0  ;;  %v372_v34 = vmax.f32 %v340_v25, 0.0  ;;  %v734_v23 = vld [vmem:[%s850_s20 + $0x58] sm:$0xff]  }
  0x17   : > { %v373_v36 = vmax.f32 %v341_v26, 0.0  ;;  %v374_v37 = vmax.f32 %v342_v27, 0.0  ;;  %v375_v38 = vmax.f32 %v343_v28, 0.0  ;;  %v376_v39 = vmax.f32 %v344_v29, 0.0 }
  0x18   : > { %v647_v41 = vpack.c.bf16 %v370_v32, %v369_v31  ;;  %v652_v42 = vpack.c.bf16 %v372_v34, %v371_v33  ;;  %v598_v43 = vunpack.c.l.bf16 %v727_v30  ;;  %v599_v44 = vunpack.c.h.bf16 %v727_v30 }
  0x19   : > { %v657_v46 = vpack.c.bf16 %v374_v37, %v373_v36  ;;  %v662_v47 = vpack.c.bf16 %v376_v39, %v375_v38  ;;  %v602_v48 = vunpack.c.l.bf16 %v728_v35  ;;  %v603_v49 = vunpack.c.h.bf16 %v728_v35 }
  0x1a   : > { %648 = vst [vmem:[%s889_s27] sm:$0xff] %v647_v41   ;;  %v309_v50 = vmul.f32 %v855_v0, %v598_v43  ;;  %v310_v51 = vmul.f32 %v855_v0, %v599_v44  ;;  %v606_v52 = vunpack.c.l.bf16 %v729_v40  ;;  %v607_v53 = vunpack.c.h.bf16 %v729_v40  ;;  %v735_v40 = vld [vmem:[%s850_s20 + $0x60] sm:$0xff]  }
  0x1b   : > { %739 = vst [vmem:[%s889_s27 + $0x8] sm:$0xff] %v652_v42   ;;  %v311_v54 = vmul.f32 %v855_v0, %v602_v48  ;;  %v312_v55 = vmul.f32 %v855_v0, %v603_v49  ;;  %v610_v56 = vunpack.c.l.bf16 %v730_v45  ;;  %v611_v57 = vunpack.c.h.bf16 %v730_v45 }
  0x1c   : > { %740 = vst [vmem:[%s889_s27 + $0x10] sm:$0xff] %v657_v46   ;;  %v345_v58 = vadd.f32 %v863_v6, %v309_v50  ;;  %v346_v59 = vadd.f32 %v863_v6, %v310_v51  ;;  %v313_v60 = vmul.f32 %v855_v0, %v606_v52  ;;  %v314_v61 = vmul.f32 %v855_v0, %v607_v53  ;;  %v736_v53 = vld [vmem:[%s850_s20 + $0x68] sm:$0xff]  }
  0x1d   : > { %741 = vst [vmem:[%s889_s27 + $0x18] sm:$0xff] %v662_v47   ;;  %v347_v62 = vadd.f32 %v863_v6, %v311_v54  ;;  %v348_v63 = vadd.f32 %v863_v6, %v312_v55  ;;  %v315_v1 = vmul.f32 %v855_v0, %v610_v56  ;;  %v316_v2 = vmul.f32 %v855_v0, %v611_v57 }
  0x1e   : > { %v377_v4 = vmax.f32 %v345_v58, 0.0  ;;  %v378_v5 = vmax.f32 %v346_v59, 0.0  ;;  %v349_v7 = vadd.f32 %v863_v6, %v313_v60  ;;  %v350_v8 = vadd.f32 %v863_v6, %v314_v61  ;;  %v737_v58 = vld [vmem:[%s850_s20 + $0x70] sm:$0xff]  }
  0x1f   : > { %v379_v9 = vmax.f32 %v347_v62, 0.0  ;;  %v380_v10 = vmax.f32 %v348_v63, 0.0  ;;  %v351_v11 = vadd.f32 %v863_v6, %v315_v1  ;;  %v352_v12 = vadd.f32 %v863_v6, %v316_v2  ;;  %v738_v63 = vld [vmem:[%s850_s20 + $0x78] sm:$0xff]  }
  0x20   : > { %v667_v14 = vpack.c.bf16 %v378_v5, %v377_v4  ;;  %v381_v15 = vmax.f32 %v349_v7, 0.0  ;;  %v382_v16 = vmax.f32 %v350_v8, 0.0  ;;  %v614_v17 = vunpack.c.l.bf16 %v731_v3 }
  0x21   : > { %v672_v19 = vpack.c.bf16 %v380_v10, %v379_v9  ;;  %v383_v20 = vmax.f32 %v351_v11, 0.0  ;;  %v384_v21 = vmax.f32 %v352_v12, 0.0  ;;  %v615_v22 = vunpack.c.h.bf16 %v731_v3 }
  0x22   : > { %742 = vst [vmem:[%s889_s27 + $0x20] sm:$0xff] %v667_v14   ;;  %v677_v24 = vpack.c.bf16 %v382_v16, %v381_v15  ;;  %v317_v25 = vmul.f32 %v855_v0, %v614_v17  ;;  %v618_v26 = vunpack.c.l.bf16 %v732_v13  ;;  %v619_v27 = vunpack.c.h.bf16 %v732_v13 }
  0x23   : > { %743 = vst [vmem:[%s889_s27 + $0x28] sm:$0xff] %v672_v19   ;;  %v682_v28 = vpack.c.bf16 %v384_v21, %v383_v20  ;;  %v318_v29 = vmul.f32 %v855_v0, %v615_v22  ;;  %v622_v30 = vunpack.c.l.bf16 %v733_v18  ;;  %v623_v31 = vunpack.c.h.bf16 %v733_v18 }
  0x24   : > { %744 = vst [vmem:[%s889_s27 + $0x30] sm:$0xff] %v677_v24   ;;  %v353_v32 = vadd.f32 %v863_v6, %v317_v25  ;;  %v319_v33 = vmul.f32 %v855_v0, %v618_v26  ;;  %v320_v34 = vmul.f32 %v855_v0, %v619_v27  ;;  %v626_v35 = vunpack.c.l.bf16 %v734_v23 }
  0x25   : > { %745 = vst [vmem:[%s889_s27 + $0x38] sm:$0xff] %v682_v28   ;;  %v354_v36 = vadd.f32 %v863_v6, %v318_v29  ;;  %v321_v37 = vmul.f32 %v855_v0, %v622_v30  ;;  %v322_v38 = vmul.f32 %v855_v0, %v623_v31  ;;  %v627_v39 = vunpack.c.h.bf16 %v734_v23 }
  0x26   : > { %v385_v41 = vmax.f32 %v353_v32, 0.0  ;;  %v355_v42 = vadd.f32 %v863_v6, %v319_v33  ;;  %v356_v43 = vadd.f32 %v863_v6, %v320_v34  ;;  %v323_v44 = vmul.f32 %v855_v0, %v626_v35 }
  0x27   : > { %v386_v45 = vmax.f32 %v354_v36, 0.0  ;;  %v357_v46 = vadd.f32 %v863_v6, %v321_v37  ;;  %v358_v47 = vadd.f32 %v863_v6, %v322_v38  ;;  %v324_v48 = vmul.f32 %v855_v0, %v627_v39 }
  0x28   : > { %v387_v49 = vmax.f32 %v355_v42, 0.0  ;;  %v388_v50 = vmax.f32 %v356_v43, 0.0  ;;  %v359_v51 = vadd.f32 %v863_v6, %v323_v44  ;;  %v630_v52 = vunpack.c.l.bf16 %v735_v40 }
  0x29   : > { %v687_v54 = vpack.c.bf16 %v386_v45, %v385_v41  ;;  %v389_v55 = vmax.f32 %v357_v46, 0.0  ;;  %v390_v56 = vmax.f32 %v358_v47, 0.0  ;;  %v360_v57 = vadd.f32 %v863_v6, %v324_v48 }
  0x2a   : > { %v692_v59 = vpack.c.bf16 %v388_v50, %v387_v49  ;;  %v391_v60 = vmax.f32 %v359_v51, 0.0  ;;  %v631_v61 = vunpack.c.h.bf16 %v735_v40  ;;  %v325_v62 = vmul.f32 %v855_v0, %v630_v52 }
  0x2b   : > { %746 = vst [vmem:[%s889_s27 + $0x40] sm:$0xff] %v687_v54   ;;  %v697_v1 = vpack.c.bf16 %v390_v56, %v389_v55  ;;  %v392_v2 = vmax.f32 %v360_v57, 0.0  ;;  %v634_v3 = vunpack.c.l.bf16 %v736_v53  ;;  %v635_v4 = vunpack.c.h.bf16 %v736_v53 }
  0x2c   : > { %747 = vst [vmem:[%s889_s27 + $0x48] sm:$0xff] %v692_v59   ;;  %v326_v5 = vmul.f32 %v855_v0, %v631_v61  ;;  %v361_v7 = vadd.f32 %v863_v6, %v325_v62  ;;  %v638_v8 = vunpack.c.l.bf16 %v737_v58  ;;  %v639_v9 = vunpack.c.h.bf16 %v737_v58 }
  0x2d   : > { %748 = vst [vmem:[%s889_s27 + $0x50] sm:$0xff] %v697_v1   ;;  %v702_v10 = vpack.c.bf16 %v392_v2, %v391_v60  ;;  %v327_v11 = vmul.f32 %v855_v0, %v634_v3  ;;  %v328_v12 = vmul.f32 %v855_v0, %v635_v4  ;;  %v642_v13 = vunpack.c.l.bf16 %v738_v63 }
  0x2e   : > { %v362_v14 = vadd.f32 %v863_v6, %v326_v5  ;;  %v393_v15 = vmax.f32 %v361_v7, 0.0  ;;  %v329_v16 = vmul.f32 %v855_v0, %v638_v8  ;;  %v330_v17 = vmul.f32 %v855_v0, %v639_v9 }
  0x2f   : > { %749 = vst [vmem:[%s889_s27 + $0x58] sm:$0xff] %v702_v10   ;;  %v363_v18 = vadd.f32 %v863_v6, %v327_v11  ;;  %v364_v19 = vadd.f32 %v863_v6, %v328_v12  ;;  %v643_v20 = vunpack.c.h.bf16 %v738_v63  ;;  %v331_v21 = vmul.f32 %v855_v0, %v642_v13 }
  0x30   : > { %v394_v22 = vmax.f32 %v362_v14, 0.0  ;;  %v365_v23 = vadd.f32 %v863_v6, %v329_v16  ;;  %v366_v24 = vadd.f32 %v863_v6, %v330_v17 }
  0x31   : > { %v395_v25 = vmax.f32 %v363_v18, 0.0  ;;  %v396_v26 = vmax.f32 %v364_v19, 0.0  ;;  %v332_v27 = vmul.f32 %v855_v0, %v643_v20  ;;  %v367_v28 = vadd.f32 %v863_v6, %v331_v21 }
  0x32   : > { %v707_v29 = vpack.c.bf16 %v394_v22, %v393_v15  ;;  %v397_v30 = vmax.f32 %v365_v23, 0.0  ;;  %v398_v31 = vmax.f32 %v366_v24, 0.0 }
  0x33   : > { %v712_v32 = vpack.c.bf16 %v396_v26, %v395_v25  ;;  %v368_v33 = vadd.f32 %v863_v6, %v332_v27  ;;  %v399_v34 = vmax.f32 %v367_v28, 0.0 }
  0x34   : > { %750 = vst [vmem:[%s889_s27 + $0x60] sm:$0xff] %v707_v29   ;;  %v717_v35 = vpack.c.bf16 %v398_v31, %v397_v30 }
  0x35   : > { %751 = vst [vmem:[%s889_s27 + $0x68] sm:$0xff] %v712_v32   ;;  %v400_v36 = vmax.f32 %v368_v33, 0.0 }
  0x36   : > { %752 = vst [vmem:[%s889_s27 + $0x70] sm:$0xff] %v717_v35  }
  0x37   : > { %v722_v37 = vpack.c.bf16 %v400_v36, %v399_v34 }
  0x39   : > { %753 = vst [vmem:[%s889_s27 + $0x78] sm:$0xff] %v722_v37  }
  0x3a PF: > { %s13_s14 = sadd.s32 1, %s802_s14   ;;  %s978_s12 = smov %s798_s13 }
  0x3b   : > { %p10_p5 = scmp.ge.s32.totalorder %s13_s14, 4   ;;  %s979_s13 = smov %s981_s15 }
  0x3d   :  { %12 = sbr.rel (!%p10_p5) target bundleno = 2 (0x2), region = 68 }

// kernel: bottleneck_forward.6
= control target key start
LH: loop header
LB: loop body
LE: loop exit
PB: predicated region body
PF: predicated region fallthrough
CT: control target
= control target key end

     0   :  { %10 = vsyncpa [#allocation4], 0  ;;  %s1463_s15 = smov 0   ;;  %s1465_s16 = smov 0   ;;  %s1668_s0 = inlined_call_operand.vmem [shape: bf16[512,128], index: 0, kind: input, shape index: {}]   ;;  %s1669_s1 = inlined_call_operand.hbm [shape: bf16[128,128], index: 1, kind: input, shape index: {}]   ;;  %s1670_s2 = inlined_call_operand.vmem [shape: bf16[512,128], index: 2, kind: output, shape index: {0}]   ;;  %s1671_s3 = inlined_call_operand.vmem [shape: f32[2,1,128], index: 3, kind: output, shape index: {1}]   ;;  %s1672_s4 = inlined_call_operand.vmem [shape: f32[2,1,128], index: 4, kind: output, shape index: {2}]  }
   0x1   :  { %s1467_s17 = smov 0  }
   0x2 LB: > { %s1088_s18 = sadd.s32 4294967295, %s1433_s17   ;;  %s35_s19 = sadd.s32 1, %s1429_s16  ;;  %s1433_s17 = sphi %s1467_s17, %s16_s17   ;;  %s1429_s16 = sphi %s1465_s16, %s1674_s16   ;;  %s1425_s15 = sphi %s1463_s15, %s1673_s15  }
   0x3   : > { %p37_p0 = scmp.ge.s32.totalorder %s35_s19, 2  ;;  %p1090_p1 = scmp.ge.s32.totalorder %s1433_s17, 1 }
   0x4   : > { %p180_p2 = scmp.lt.s32.totalorder %s1433_s17, 3  ;;  %p1348_p4 = scmp.eq.s32.totalorder %s1088_s18, 0 }
   0x5   : > { %s1676_s19 = smov (%p37_p0, %s35_s19), 0  ;;  %s195_s22 = sshll.u32 %s1669_s1, 4  ;;  %s196_s22 = int_to_ptr.hbm [resolvable:$true] %s195_s22 }
   0x6   : > { %p181_p3 = pnand %p1090_p1, %p180_p2  ;;  %s1435_s23 = smov [#allocation3]  }
   0x7   : > { %s197_s24 = sshll.u32 %s1435_s23, 4  ;;  %s1436_s25 = smov 64   ;;  %s198_s24 = int_to_ptr.vmem [resolvable:$true] %s197_s24 }
   0x8   : > { %p1344_p5 = pneg %p181_p3  ;;  %s1437_s26 = smov 4  }
   0x9   : > { %225 = sbr.rel (%p181_p3) target bundleno = 294 (0x126), region = 28 }
   0xa   : > { %p1345_p6 = pnand %p1348_p4, %p1344_p5 }
   0xc   : > { %1347 = dma.hbm_to_vmem [thread:$0]  (!%p1345_p6), %s196_s22, 1024, %s198_s24, [#allocation4], %s1436_s25, %s1436_s25, %s1437_s26  }
   0xe   : > { %1420 = dma.done.wait (%p1348_p4), [#allocation4], 1024  }
   0xf   : > { %1422 = vsyncadd (%p1348_p4), [#allocation4], 4294966272  ;;  %v1220_v0 = vld [vmem:[#allocation3 + $0x38] sm:$0xff]  ;;  %v1219_v1 = vld [vmem:[#allocation3 + $0x30] sm:$0xff]  ;;  %s1095_s27 = sshll.u32 %s1425_s15, 5  ;;  %p289_p8 = scmp.lt.s32.totalorder %s1425_s15, 1 }
  0x10   : > { %561 = vmatpush.bf16.msra.mxu0 %v1220_v0  ;;  %1316 = vmatpush.bf16.msra.mxu1 %v1220_v0  ;;  %v1218_v2 = vld [vmem:[#allocation3 + $0x28] sm:$0xff]  ;;  %v1217_v3 = vld [vmem:[#allocation3 + $0x20] sm:$0xff]  ;;  %v1216_v4 = vld [vmem:[#allocation3 + $0x18] sm:$0xff]  ;;  %p271_p7 = scmp.lt.s32.totalorder %s1095_s27, 63 }
  0x11   : > { %1317 = vmatpush.bf16.msra.mxu2 %v1220_v0  ;;  %1318 = vmatpush.bf16.msra.mxu3 %v1220_v0  ;;  %v1215_v5 = vld [vmem:[#allocation3 + $0x10] sm:$0xff]  ;;  %v1214_v6 = vld [vmem:[#allocation3 + $0x8] sm:$0xff]  ;;  %v1213_v7 = vld [vmem:[#allocation3] sm:$0xff]  ;;  %s1680_s15 = smov (!%p289_p8, %s1425_s15), 1 }
  0x12   : > { %s1678_s27 = smov (!%p271_p7, %s1095_s27), 63  ;;  %s294_s11 = scalar_lea.vmem %s1671_s3, %s1680_s15 }
  0x13   : > { %s1096_s28 = sshll.u32 %s1678_s27, 2  ;;  %s300_s14 = scalar_lea.vmem %s1672_s4, %s1680_s15 }
  0x14   : > { %562 = vmatpush.bf16.msra.mxu0 %v1219_v1  ;;  %1319 = vmatpush.bf16.msra.mxu1 %v1219_v1  ;;  %s1496_s5 = scalar_lea.vmem %s1668_s0, %s1096_s28  ;;  %s1523_s8 = scalar_lea.vmem %s1670_s2, %s1096_s28 }
  0x15   : > { %1320 = vmatpush.bf16.msra.mxu2 %v1219_v1  ;;  %1321 = vmatpush.bf16.msra.mxu3 %v1219_v1  ;;  %v1197_v8 = vld [vmem:[%s1496_s5] sm:$0xff]  ;;  %v1198_v12 = vld [vmem:[%s1496_s5 + $0x8] sm:$0xff]  ;;  %v1199_v16 = vld [vmem:[%s1496_s5 + $0x10] sm:$0xff] }
  0x16   : > { %v1201_v9 = vld [vmem:[%s1496_s5 + $0x20] sm:$0xff]  ;;  %v1202_v13 = vld [vmem:[%s1496_s5 + $0x28] sm:$0xff]  ;;  %v1203_v17 = vld [vmem:[%s1496_s5 + $0x30] sm:$0xff] }
  0x17   : > { %v1205_v10 = vld [vmem:[%s1496_s5 + $0x40] sm:$0xff]  ;;  %v1206_v14 = vld [vmem:[%s1496_s5 + $0x48] sm:$0xff]  ;;  %v1207_v18 = vld [vmem:[%s1496_s5 + $0x50] sm:$0xff] }
  0x18   : > { %563 = vmatpush.bf16.msra.mxu0 %v1218_v2  ;;  %1322 = vmatpush.bf16.msra.mxu1 %v1218_v2  ;;  %v1209_v11 = vld [vmem:[%s1496_s5 + $0x60] sm:$0xff]  ;;  %v1210_v15 = vld [vmem:[%s1496_s5 + $0x68] sm:$0xff]  ;;  %v1211_v19 = vld [vmem:[%s1496_s5 + $0x70] sm:$0xff] }
  0x19   : > { %1323 = vmatpush.bf16.msra.mxu2 %v1218_v2  ;;  %1324 = vmatpush.bf16.msra.mxu3 %v1218_v2  ;;  %v1200_v20 = vld [vmem:[%s1496_s5 + $0x18] sm:$0xff] }
  0x1a   : > { %v1204_v21 = vld [vmem:[%s1496_s5 + $0x38] sm:$0xff] }
  0x1b   : > { %v1208_v22 = vld [vmem:[%s1496_s5 + $0x58] sm:$0xff] }
  0x1c   : > { %564 = vmatpush.bf16.msra.mxu0 %v1217_v3  ;;  %1325 = vmatpush.bf16.msra.mxu1 %v1217_v3  ;;  %v1212_v23 = vld [vmem:[%s1496_s5 + $0x78] sm:$0xff] }
  0x1d   : > { %1326 = vmatpush.bf16.msra.mxu2 %v1217_v3  ;;  %1327 = vmatpush.bf16.msra.mxu3 %v1217_v3 }
  0x20   : > { %565 = vmatpush.bf16.msra.mxu0 %v1216_v4  ;;  %1328 = vmatpush.bf16.msra.mxu1 %v1216_v4 }
  0x21   : > { %1329 = vmatpush.bf16.msra.mxu2 %v1216_v4  ;;  %1330 = vmatpush.bf16.msra.mxu3 %v1216_v4 }
  0x24   : > { %566 = vmatpush.bf16.msra.mxu0 %v1215_v5  ;;  %1331 = vmatpush.bf16.msra.mxu1 %v1215_v5 }
  0x25   : > { %1332 = vmatpush.bf16.msra.mxu2 %v1215_v5  ;;  %1333 = vmatpush.bf16.msra.mxu3 %v1215_v5 }
  0x28   : > { %567 = vmatpush.bf16.msra.mxu0 %v1214_v6  ;;  %1334 = vmatpush.bf16.msra.mxu1 %v1214_v6 }
  0x29   : > { %1335 = vmatpush.bf16.msra.mxu2 %v1214_v6  ;;  %1336 = vmatpush.bf16.msra.mxu3 %v1214_v6 }
  0x2c   : > { %568 = vmatpush.bf16.msra.mxu0 %v1213_v7  ;;  %1337 = vmatpush.bf16.msra.mxu1 %v1213_v7 }
  0x2d   : > { %1338 = vmatpush.bf16.msra.mxu2 %v1213_v7  ;;  %1339 = vmatpush.bf16.msra.mxu3 %v1213_v7 }
  0x2f   : > { %569 = vmatmul.bf16.vlgmr.msra.gmra.mxu0 %v1197_v8  ;;  %589 = vmatmul.bf16.vlgmr.msra.gmra.mxu1 %v1201_v9 }
  0x30   : > { %609 = vmatmul.bf16.vlgmr.msra.gmra.mxu2 %v1205_v10  ;;  %629 = vmatmul.bf16.vlgmr.msra.gmra.mxu3 %v1209_v11 }
  0x3f   : > { %574 = vmatmul.bf16.gmra.mxu0 %v1198_v12  ;;  %594 = vmatmul.bf16.gmra.mxu1 %v1202_v13 }
  0x40   : > { %614 = vmatmul.bf16.gmra.mxu2 %v1206_v14  ;;  %634 = vmatmul.bf16.gmra.mxu3 %v1210_v15 }
  0x4f   : > { %579 = vmatmul.bf16.gmra.mxu0 %v1199_v16  ;;  %599 = vmatmul.bf16.gmra.mxu1 %v1203_v17 }
  0x50   : > { %619 = vmatmul.bf16.gmra.mxu2 %v1207_v18  ;;  %639 = vmatmul.bf16.gmra.mxu3 %v1211_v19 }
  0x5f   : > { %584 = vmatmul.bf16.gmra.mxu0 %v1200_v20  ;;  %604 = vmatmul.bf16.gmra.mxu1 %v1204_v21 }
  0x60   : > { %624 = vmatmul.bf16.gmra.mxu2 %v1208_v22  ;;  %644 = vmatmul.bf16.gmra.mxu3 %v1212_v23 }
  0xac   : > { %v570_v24 = vpop.f32.mrf.mxu0  ;;  %v1514_v25 = vpop.f32.mrf.mxu1 }
  0xad   : > { %v851_v57 = vmul.f32 %v570_v24, %v570_v24 }
  0xb3   : > { %v1516_v26 = vpop.f32.mrf.mxu2  ;;  %v1529_v31 = vpop.f32.mrf.mxu3 }
  0xb4   : > { %v572_v27 = vpop.f32.mrf.mxu0  ;;  %v1525_v28 = vpop.f32.mrf.mxu1 }
  0xb5   : > { %v1224_v29 = vpack.c.bf16 %v572_v27, %v570_v24  ;;  %v1244_v30 = vpack.c.bf16 %v1525_v28, %v1514_v25  ;;  %v852_v56 = vmul.f32 %v572_v27, %v572_v27  ;;  %v813_v59 = vadd.f32 %v572_v27, %v570_v24 }
  0xb6   : > { %v859_v27 = vmul.f32 %v1514_v25, %v1514_v25 }
  0xb7   : > { %1225 = vst [vmem:[%s1523_s8] sm:$0xff] %v1224_v29   ;;  %v883_v60 = vadd.f32 %v852_v56, %v851_v57 }
  0xb8   : > { %1304 = vst [vmem:[%s1523_s8 + $0x20] sm:$0xff] %v1244_v30  }
  0xbb   : > { %v1533_v32 = vpop.f32.mrf.mxu2  ;;  %v1539_v36 = vpop.f32.mrf.mxu3 }
  0xbc   : > { %v575_v33 = vpop.f32.mrf.mxu0  ;;  %v1535_v34 = vpop.f32.mrf.mxu1  ;;  %v1264_v35 = vpack.c.bf16 %v1533_v32, %v1516_v26  ;;  %v1284_v37 = vpack.c.bf16 %v1539_v36, %v1529_v31 }
  0xbd   : > { %v853_v58 = vmul.f32 %v575_v33, %v575_v33  ;;  %v814_v62 = vadd.f32 %v813_v59, %v575_v33 }
  0xbe   : > { %1308 = vst [vmem:[%s1523_s8 + $0x40] sm:$0xff] %v1264_v35  }
  0xbf   : > { %1312 = vst [vmem:[%s1523_s8 + $0x60] sm:$0xff] %v1284_v37   ;;  %v884_v0 = vadd.f32 %v883_v60, %v853_v58 }
  0xc3   : > { %v1545_v38 = vpop.f32.mrf.mxu2  ;;  %v1551_v43 = vpop.f32.mrf.mxu3 }
  0xc4   : > { %v577_v39 = vpop.f32.mrf.mxu0  ;;  %v1547_v40 = vpop.f32.mrf.mxu1 }
  0xc5   : > { %v1229_v41 = vpack.c.bf16 %v577_v39, %v575_v33  ;;  %v1249_v42 = vpack.c.bf16 %v1547_v40, %v1535_v34  ;;  %v854_v61 = vmul.f32 %v577_v39, %v577_v39  ;;  %v815_v5 = vadd.f32 %v814_v62, %v577_v39 }
  0xc6   : > { %v860_v33 = vmul.f32 %v1525_v28, %v1525_v28  ;;  %v861_v39 = vmul.f32 %v1535_v34, %v1535_v34 }
  0xc7   : > { %1301 = vst [vmem:[%s1523_s8 + $0x8] sm:$0xff] %v1229_v41   ;;  %v885_v7 = vadd.f32 %v884_v0, %v854_v61 }
  0xc8   : > { %1305 = vst [vmem:[%s1523_s8 + $0x28] sm:$0xff] %v1249_v42  }
  0xcb   : > { %v1555_v44 = vpop.f32.mrf.mxu2  ;;  %v1561_v48 = vpop.f32.mrf.mxu3 }
  0xcc   : > { %v580_v45 = vpop.f32.mrf.mxu0  ;;  %v1557_v46 = vpop.f32.mrf.mxu1  ;;  %v1269_v47 = vpack.c.bf16 %v1555_v44, %v1545_v38  ;;  %v1289_v49 = vpack.c.bf16 %v1561_v48, %v1551_v43 }
  0xcd   : > { %v855_v1 = vmul.f32 %v580_v45, %v580_v45  ;;  %v816_v10 = vadd.f32 %v815_v5, %v580_v45  ;;  %v868_v5 = vmul.f32 %v1533_v32, %v1533_v32 }
  0xce   : > { %1309 = vst [vmem:[%s1523_s8 + $0x48] sm:$0xff] %v1269_v47  }
  0xcf   : > { %1313 = vst [vmem:[%s1523_s8 + $0x68] sm:$0xff] %v1289_v49   ;;  %v886_v11 = vadd.f32 %v885_v7, %v855_v1 }
  0xd3   : > { %v1567_v50 = vpop.f32.mrf.mxu2  ;;  %v1573_v55 = vpop.f32.mrf.mxu3 }
  0xd4   : > { %v582_v51 = vpop.f32.mrf.mxu0  ;;  %v1569_v52 = vpop.f32.mrf.mxu1 }
  0xd5   : > { %v1234_v53 = vpack.c.bf16 %v582_v51, %v580_v45  ;;  %v1254_v54 = vpack.c.bf16 %v1569_v52, %v1557_v46  ;;  %v856_v8 = vmul.f32 %v582_v51, %v582_v51  ;;  %v817_v13 = vadd.f32 %v816_v10, %v582_v51 }
  0xd6   : > { %v870_v10 = vmul.f32 %v1555_v44, %v1555_v44 }
  0xd7   : > { %1302 = vst [vmem:[%s1523_s8 + $0x10] sm:$0xff] %v1234_v53   ;;  %v887_v14 = vadd.f32 %v886_v11, %v856_v8 }
  0xd8   : > { %1306 = vst [vmem:[%s1523_s8 + $0x30] sm:$0xff] %v1254_v54   ;;  %v863_v54 = vmul.f32 %v1557_v46, %v1557_v46 }
  0xdb   : > { %v1577_v63 = vpop.f32.mrf.mxu2  ;;  %v1581_v6 = vpop.f32.mrf.mxu3 }
  0xdc   : > { %v585_v2 = vpop.f32.mrf.mxu0  ;;  %v605_v3 = vpop.f32.mrf.mxu1  ;;  %v1274_v4 = vpack.c.bf16 %v1577_v63, %v1567_v50  ;;  %v1294_v9 = vpack.c.bf16 %v1581_v6, %v1573_v55 }
  0xdd   : > { %v857_v12 = vmul.f32 %v585_v2, %v585_v2  ;;  %v818_v15 = vadd.f32 %v817_v13, %v585_v2  ;;  %v865_v61 = vmul.f32 %v605_v3, %v605_v3 }
  0xde   : > { %1310 = vst [vmem:[%s1523_s8 + $0x50] sm:$0xff] %v1274_v4  }
  0xdf   : > { %1314 = vst [vmem:[%s1523_s8 + $0x70] sm:$0xff] %v1294_v9   ;;  %v888_v17 = vadd.f32 %v887_v14, %v857_v12 }
  0xe3   : > { %v625_v16 = vpop.f32.mrf.mxu2  ;;  %v1587_v24 = vpop.f32.mrf.mxu3 }
  0xe4   : > { %v587_v18 = vpop.f32.mrf.mxu0  ;;  %v607_v19 = vpop.f32.mrf.mxu1 }
  0xe5   : > { %v1239_v20 = vpack.c.bf16 %v587_v18, %v585_v2  ;;  %v819_v21 = vadd.f32 %v818_v15, %v587_v18  ;;  %v858_v22 = vmul.f32 %v587_v18, %v587_v18  ;;  %v1259_v23 = vpack.c.bf16 %v607_v19, %v605_v3 }
  0xe6   : > { %v866_v1 = vmul.f32 %v607_v19, %v607_v19  ;;  %v867_v2 = vmul.f32 %v1516_v26, %v1516_v26  ;;  %v872_v15 = vmul.f32 %v1577_v63, %v1577_v63 }
  0xe7   : > { %1303 = vst [vmem:[%s1523_s8 + $0x18] sm:$0xff] %v1239_v20   ;;  %v820_v29 = vadd.f32 %v819_v21, %v1514_v25  ;;  %v889_v30 = vadd.f32 %v888_v17, %v858_v22  ;;  %v862_v25 = vmul.f32 %v1547_v40, %v1547_v40 }
  0xe8   : > { %1307 = vst [vmem:[%s1523_s8 + $0x38] sm:$0xff] %v1259_v23  }
  0xe9   : > { %v821_v35 = vadd.f32 %v820_v29, %v1525_v28  ;;  %v890_v37 = vadd.f32 %v889_v30, %v859_v27 }
  0xeb   : > { %v822_v41 = vadd.f32 %v821_v35, %v1535_v34  ;;  %v891_v42 = vadd.f32 %v890_v37, %v860_v33  ;;  %v627_v45 = vpop.f32.mrf.mxu2  ;;  %v647_v53 = vpop.f32.mrf.mxu3  ;;  %v864_v34 = vmul.f32 %v1569_v52, %v1569_v52  ;;  %v878_v35 = vmul.f32 %v1561_v48, %v1561_v48 }
  0xec   : > { %v1279_v47 = vpack.c.bf16 %v627_v45, %v625_v16  ;;  %v1299_v28 = vpack.c.bf16 %v647_v53, %v1587_v24  ;;  %v874_v22 = vmul.f32 %v627_v45, %v627_v45 }
  0xed   : > { %v892_v49 = vadd.f32 %v891_v42, %v861_v39  ;;  %v823_v51 = vadd.f32 %v822_v41, %v1547_v40  ;;  %v879_v39 = vmul.f32 %v1573_v55, %v1573_v55 }
  0xee   : > { %1311 = vst [vmem:[%s1523_s8 + $0x58] sm:$0xff] %v1279_v47  }
  0xef   : > { %v824_v56 = vadd.f32 %v823_v51, %v1557_v46  ;;  %v893_v57 = vadd.f32 %v892_v49, %v862_v25  ;;  %1315 = vst [vmem:[%s1523_s8 + $0x78] sm:$0xff] %v1299_v28   ;;  %v881_v49 = vmul.f32 %v1587_v24, %v1587_v24  ;;  %v882_v28 = vmul.f32 %v647_v53, %v647_v53 }
  0xf1   : > { %v825_v58 = vadd.f32 %v824_v56, %v1569_v52  ;;  %v894_v59 = vadd.f32 %v893_v57, %v863_v54  ;;  %v869_v52 = vmul.f32 %v1545_v38, %v1545_v38 }
  0xf3   : > { %v826_v60 = vadd.f32 %v825_v58, %v605_v3  ;;  %v895_v40 = vadd.f32 %v894_v59, %v864_v34 }
  0xf5   : > { %v896_v62 = vadd.f32 %v895_v40, %v865_v61  ;;  %v827_v0 = vadd.f32 %v826_v60, %v607_v19  ;;  %v873_v19 = vmul.f32 %v625_v16, %v625_v16 }
  0xf7   : > { %v828_v4 = vadd.f32 %v827_v0, %v1516_v26  ;;  %v897_v46 = vadd.f32 %v896_v62, %v866_v1  ;;  %v871_v26 = vmul.f32 %v1567_v50, %v1567_v50 }
  0xf9   : > { %v829_v7 = vadd.f32 %v828_v4, %v1533_v32  ;;  %v898_v8 = vadd.f32 %v897_v46, %v867_v2 }
  0xfb   : > { %v830_v3 = vadd.f32 %v829_v7, %v1545_v38  ;;  %v899_v9 = vadd.f32 %v898_v8, %v868_v5 }
  0xfd   : > { %v900_v11 = vadd.f32 %v899_v9, %v869_v52  ;;  %v831_v12 = vadd.f32 %v830_v3, %v1555_v44  ;;  %v875_v44 = vmul.f32 %v1529_v31, %v1529_v31 }
  0xff   : > { %v832_v13 = vadd.f32 %v831_v12, %v1567_v50  ;;  %v901_v14 = vadd.f32 %v900_v11, %v870_v10  ;;  %v876_v50 = vmul.f32 %v1539_v36, %v1539_v36 }
 0x101   : > { %v833_v32 = vadd.f32 %v832_v13, %v1577_v63  ;;  %v902_v17 = vadd.f32 %v901_v14, %v871_v26  ;;  %v877_v63 = vmul.f32 %v1551_v43, %v1551_v43 }
 0x103   : > { %v903_v38 = vadd.f32 %v902_v17, %v872_v15  ;;  %v834_v18 = vadd.f32 %v833_v32, %v625_v16 }
 0x105   : > { %v904_v20 = vadd.f32 %v903_v38, %v873_v19  ;;  %v835_v21 = vadd.f32 %v834_v18, %v627_v45 }
 0x107   : > { %v836_v23 = vadd.f32 %v835_v21, %v1529_v31  ;;  %v905_v27 = vadd.f32 %v904_v20, %v874_v22 }
 0x109   : > { %v837_v29 = vadd.f32 %v836_v23, %v1539_v36  ;;  %v906_v30 = vadd.f32 %v905_v27, %v875_v44 }
 0x10b   : > { %v838_v16 = vadd.f32 %v837_v29, %v1551_v43  ;;  %v907_v33 = vadd.f32 %v906_v30, %v876_v50  ;;  %v880_v43 = vmul.f32 %v1581_v6, %v1581_v6 }
 0x10d   : > { %v908_v37 = vadd.f32 %v907_v33, %v877_v63  ;;  %v839_v31 = vadd.f32 %v838_v16, %v1561_v48 }
 0x10f   : > { %v840_v41 = vadd.f32 %v839_v31, %v1573_v55  ;;  %v909_v36 = vadd.f32 %v908_v37, %v878_v35 }
 0x111   : > { %v841_v42 = vadd.f32 %v840_v41, %v1581_v6  ;;  %v910_v45 = vadd.f32 %v909_v36, %v879_v39 }
 0x113   : > { %v911_v47 = vadd.f32 %v910_v45, %v880_v43  ;;  %v842_v25 = vadd.f32 %v841_v42, %v1587_v24 }
 0x115   : > { %v912_v48 = vadd.f32 %v911_v47, %v881_v49  ;;  %v843_v51 = vadd.f32 %v842_v25, %v647_v53 }
 0x117   : > { %v844_v54 = vrot.slane %v843_v51, 4  ;;  %v913_v56 = vadd.f32 %v912_v48, %v882_v28 }
 0x119   : > { %v845_v55 = vadd.f32 %v844_v54, %v843_v51  ;;  %v914_v57 = vrot.slane %v913_v56, 4 }
 0x11b   : > { %v846_v34 = vrot.slane %v845_v55, 2  ;;  %v915_v58 = vadd.f32 %v914_v57, %v913_v56 }
 0x11d   : > { %v847_v59 = vadd.f32 %v846_v34, %v845_v55  ;;  %v916_v6 = vrot.slane %v915_v58, 2 }
 0x11f   : > { %v848_v60 = vrot.slane %v847_v59, 1  ;;  %v917_v61 = vadd.f32 %v916_v6, %v915_v58 }
 0x121   : > { %v849_v24 = vadd.f32 %v848_v60, %v847_v59  ;;  %v918_v40 = vrot.slane %v917_v61, 1 }
 0x123   : > { %850 = vst [vmem:[%s294_s11] sm:$0x1] %v849_v24  ;;  %v919_v53 = vadd.f32 %v918_v40, %v917_v61 }
 0x125   : > { %920 = vst [vmem:[%s300_s14] sm:$0x1] %v919_v53 }
 0x126 PF: > { %s16_s17 = sadd.s32 1, %s1433_s17   ;;  %s1673_s15 = smov %s1429_s16 }
 0x127   : > { %p13_p9 = scmp.ge.s32.totalorder %s16_s17, 4   ;;  %s1674_s16 = smov %s1676_s19 }
 0x129   :  { %15 = sbr.rel (!%p13_p9) target bundleno = 2 (0x2), region = 96 }
 0x12e   :  { %985 = vsyncpa [#allocation4], 1 }
 0x12f   :  { %987 = vsyncpa [#allocation4 + $0x1], 1 }

// kernel: bottleneck_forward.11
= control target key start
LH: loop header
LB: loop body
LE: loop exit
PB: predicated region body
PF: predicated region fallthrough
CT: control target
= control target key end

     0   :  { %9 = vsyncpa [#allocation3], 0  ;;  %s1302_s0 = inlined_call_operand.vmem [shape: bf16[512,128], index: 0, kind: input, shape index: {}]   ;;  %s1303_s1 = inlined_call_operand.vmem [shape: f32[1,128], index: 1, kind: input, shape index: {}]   ;;  %s1304_s2 = inlined_call_operand.vmem [shape: f32[1,128], index: 2, kind: input, shape index: {}]   ;;  %s1305_s3 = inlined_call_operand.vmem [shape: bf16[512,128], index: 3, kind: input, shape index: {}]   ;;  %s1306_s4 = inlined_call_operand.hbm [shape: f32[512,128], index: 4, kind: output, shape index: {}]  }
   0x1   :  { %11 = vsyncpa [#allocation3 + $0x1], 0  ;;  %s1054_s15 = smov 0   ;;  %s1056_s16 = smov 0  }
   0x2   :  { %s1058_s17 = smov 0   ;;  %s1060_s18 = smov 0  }
   0x3   :  { %s1062_s19 = smov 0   ;;  %s1064_s20 = smov 0  }
   0x4 LB: > { %s712_s21 = sadd.s32 4294967295, %s1025_s20   ;;  %s713_s22 = sadd.s32 4294967294, %s1025_s20   ;;  %s1025_s20 = sphi %s1064_s20, %s17_s20   ;;  %s1021_s19 = sphi %s1062_s19, %s1313_s19   ;;  %s1017_s18 = sphi %s1060_s18, %s1312_s18   ;;  %s1013_s17 = sphi %s1058_s17, %s1311_s17   ;;  %s1009_s16 = sphi %s1056_s16, %s1310_s16   ;;  %s1005_s15 = sphi %s1054_s15, %s1309_s15  }
   0x5   : > { %s29_s23 = sadd.s32 1, %s1021_s19  ;;  %s146_s24 = sadd.s32 1, %s1013_s17 }
   0x6   : > { %p31_p0 = scmp.ge.s32.totalorder %s29_s23, 2  ;;  %p156_p1 = scmp.ne.s32.totalorder %s1013_s17, %s1009_s16 }
   0x7   : > { %p157_p2 = scmp.eq.s32.totalorder %s712_s21, 1  ;;  %p162_p3 = scmp.ne.s32.totalorder %s1009_s16, %s1005_s15 }
   0x8   : > { %s1315_s23 = smov (%p31_p0, %s29_s23), 0  ;;  %p163_p5 = scmp.eq.s32.totalorder %s713_s22, 1 }
   0x9   : > { %p1094_p4 = por %p157_p2, %p156_p1  ;;  %s141_s26 = ssub.s32 %s1021_s19, %s1315_s23 }
   0xa   : > { %p718_p6 = scmp.ge.s32.totalorder %s1025_s20, 1  ;;  %p144_p7 = scmp.eq.s32.totalorder %s141_s26, 0 }
   0xb   : > { %p1101_p8 = por %p163_p5, %p162_p3  ;;  %p217_p9 = scmp.lt.s32.totalorder %s1025_s20, 3 }
   0xc   : > { %s1107_s28 = scalar_select %p144_p7, %s1013_s17, %s146_s24  }
   0xd   : > { %p218_p10 = pnand %p718_p6, %p217_p9 }
   0xe   : > { %s720_s29 = sshll.u32 (!%p218_p10), %s1017_s18, 5  ;;  %s257_s21 = sand.u32 (!%p218_p10), 1, %s1009_s16  }
   0xf   : > { %221 = sbr.rel (%p218_p10) target bundleno = 81 (0x51), region = 36  ;;  %p261_p11 = scmp.lt.s32.totalorder (!%p218_p10), %s720_s29, 63 }
  0x10   : > { %s719_s22 = sshll.u32 (!%p218_p10), %s257_s21, 8  ;;  %s729_s26 = sshll.u32 (!%p218_p10), %s1017_s18, 8 }
  0x11   : > { %s1159_s24 = scalar_lea.vmem (!%p218_p10), [#allocation2], %s719_s22  ;;  %s967_s12 = scalar_lea.hbm (!%p218_p10), %s1306_s4, 512 }
  0x12   : > { %s595_s5 = sshll.u32 (!%p218_p10), %s1159_s24, 4  ;;  %s596_s5 = int_to_ptr.vmem [resolvable:$true] %s595_s5 }
  0x14   : > { %s1317_s29 = smov (!%p261_p11, %s720_s29), 63  ;;  %v1123_v0 = vld [vmem:[%s1303_s1] ss:$0 sm:$0xff] }
  0x15   : > { %s721_s30 = sshll.u32 %s1317_s29, 2  ;;  %v1128_v1 = vld [vmem:[%s1304_s2] ss:$0 sm:$0xff] }
  0x16   : > { %s1113_s7 = scalar_lea.vmem %s1302_s0, %s721_s30  ;;  %s1118_s10 = scalar_lea.vmem %s1305_s3, %s721_s30 }
  0x17   : > { %v731_v2 = vld [vmem:[%s1113_s7] sm:$0xff]   ;;  %v858_v4 = vld [vmem:[%s1113_s7 + $0x8] sm:$0xff]   ;;  %v859_v10 = vld [vmem:[%s1113_s7 + $0x10] sm:$0xff]   ;;  %s594_s30 = scalar_lea.hbm %s1306_s4, %s729_s26 }
  0x18   : > { %v795_v3 = vld [vmem:[%s1118_s10] sm:$0xff]   ;;  %v732_v5 = vunpack.c.l.bf16 %v731_v2  ;;  %v733_v7 = vunpack.c.h.bf16 %v731_v2  ;;  %v873_v9 = vld [vmem:[%s1118_s10 + $0x8] sm:$0xff]   ;;  %v874_v11 = vld [vmem:[%s1118_s10 + $0x10] sm:$0xff]   ;;  %v736_v12 = vunpack.c.l.bf16 %v858_v4  ;;  %v737_v14 = vunpack.c.h.bf16 %v858_v4  ;;  %s597_s6 = sshll.u32 %s594_s30, 4  ;;  %s598_s6 = int_to_ptr.hbm [resolvable:$true] %s597_s6 }
  0x19   : > { %v796_v6 = vunpack.c.l.bf16 %v795_v3  ;;  %v797_v8 = vunpack.c.h.bf16 %v795_v3  ;;  %v800_v13 = vunpack.c.l.bf16 %v873_v9  ;;  %v801_v15 = vunpack.c.h.bf16 %v873_v9  ;;  %v860_v16 = vld [vmem:[%s1113_s7 + $0x18] sm:$0xff]   ;;  %v861_v42 = vld [vmem:[%s1113_s7 + $0x20] sm:$0xff]   ;;  %v862_v52 = vld [vmem:[%s1113_s7 + $0x28] sm:$0xff]   ;;  %s961_s8 = sshra.s32 %s598_s6, 4  ;;  %s962_s8 = int_to_ptr.hbm [resolvable:$true] %s961_s8 }
  0x1a   : > { %v353_v17 = vmul.f32 %v1123_v0, %v732_v5  ;;  %v354_v18 = vmul.f32 %v1123_v0, %v733_v7  ;;  %v740_v19 = vunpack.c.l.bf16 %v859_v10  ;;  %v804_v20 = vunpack.c.l.bf16 %v874_v11  ;;  %v875_v21 = vld [vmem:[%s1118_s10 + $0x18] sm:$0xff]   ;;  %v876_v47 = vld [vmem:[%s1118_s10 + $0x20] sm:$0xff]   ;;  %v877_v57 = vld [vmem:[%s1118_s10 + $0x28] sm:$0xff]   ;;  %s963_s9 = scalar_lea.hbm %s962_s8, 256  ;;  %p968_p1 = scmp.lt.s32.totalorder %s962_s8, %s1306_s4 }
  0x1b   : > { %v355_v22 = vmul.f32 %v1123_v0, %v736_v12  ;;  %v356_v23 = vmul.f32 %v1123_v0, %v737_v14  ;;  %v741_v24 = vunpack.c.h.bf16 %v859_v10  ;;  %v805_v25 = vunpack.c.h.bf16 %v874_v11  ;;  %v863_v62 = vld [vmem:[%s1113_s7 + $0x30] sm:$0xff]   ;;  %v864_v14 = vld [vmem:[%s1113_s7 + $0x38] sm:$0xff]   ;;  %p964_p12 = scmp.ne.s32.totalorder %s962_s8, %s963_s9  ;;  %p969_p2 = scmp.lt.s32.totalorder %s967_s12, %s963_s9 }
  0x1c   : > { %v389_v26 = vadd.f32 %v1128_v1, %v353_v17  ;;  %v390_v27 = vadd.f32 %v1128_v1, %v354_v18  ;;  %v357_v28 = vmul.f32 %v1123_v0, %v740_v19  ;;  %v744_v29 = vunpack.c.l.bf16 %v860_v16  ;;  %v878_v5 = vld [vmem:[%s1118_s10 + $0x30] sm:$0xff]  }
  0x1d   : > { %v391_v30 = vadd.f32 %v1128_v1, %v355_v22  ;;  %v392_v31 = vadd.f32 %v1128_v1, %v356_v23  ;;  %v358_v32 = vmul.f32 %v1123_v0, %v741_v24  ;;  %v808_v33 = vunpack.c.l.bf16 %v875_v21  ;;  %v879_v23 = vld [vmem:[%s1118_s10 + $0x38] sm:$0xff]   ;;  %p965_p13 = pnand %p964_p12, %p1094_p4  ;;  %p970_p3 = por %p969_p2, %p968_p1 }
  0x1e   : > { %v485_v34 = vadd.f32 %v796_v6, %v389_v26  ;;  %v486_v35 = vadd.f32 %v797_v8, %v390_v27  ;;  %v393_v36 = vadd.f32 %v1128_v1, %v357_v28  ;;  %v359_v37 = vmul.f32 %v1123_v0, %v744_v29 }
  0x1f   : > { %v487_v38 = vadd.f32 %v800_v13, %v391_v30  ;;  %v488_v39 = vadd.f32 %v801_v15, %v392_v31  ;;  %v394_v40 = vadd.f32 %v1128_v1, %v358_v32  ;;  %v745_v41 = vunpack.c.h.bf16 %v860_v16  ;;  %v865_v32 = vld [vmem:[%s1113_s7 + $0x40] sm:$0xff]   ;;  %p966_p0 = pneg %p965_p13 }
  0x20   : > { %v517_v43 = vmax.f32 %v485_v34, 0.0  ;;  %v518_v44 = vmax.f32 %v486_v35, 0.0  ;;  %v489_v45 = vadd.f32 %v804_v20, %v393_v36  ;;  %v395_v46 = vadd.f32 %v1128_v1, %v359_v37  ;;  %v880_v37 = vld [vmem:[%s1118_s10 + $0x40] sm:$0xff]  }
  0x21   : > { %v519_v48 = vmax.f32 %v487_v38, 0.0  ;;  %v520_v49 = vmax.f32 %v488_v39, 0.0  ;;  %v490_v50 = vadd.f32 %v805_v25, %v394_v40  ;;  %v360_v51 = vmul.f32 %v1123_v0, %v745_v41  ;;  %p971_p5 = pnand %p970_p3, %p966_p0 }
  0x22   : > { %549 = vst [vmem:[%s1159_s24] sm:$0xff] %v517_v43  ;;  %v521_v53 = vmax.f32 %v489_v45, 0.0  ;;  %v491_v54 = vadd.f32 %v808_v33, %v395_v46  ;;  %v809_v55 = vunpack.c.h.bf16 %v875_v21  ;;  %v748_v56 = vunpack.c.l.bf16 %v861_v42  ;;  %v866_v46 = vld [vmem:[%s1113_s7 + $0x48] sm:$0xff]  }
  0x23   : > { %550 = vst [vmem:[%s1159_s24 + $0x8] sm:$0xff] %v518_v44  ;;  %v522_v58 = vmax.f32 %v490_v50, 0.0  ;;  %v396_v59 = vadd.f32 %v1128_v1, %v360_v51  ;;  %v812_v60 = vunpack.c.l.bf16 %v876_v47  ;;  %v749_v61 = vunpack.c.h.bf16 %v861_v42 }
  0x24   : > { %551 = vst [vmem:[%s1159_s24 + $0x10] sm:$0xff] %v519_v48  ;;  %v523_v63 = vmax.f32 %v491_v54, 0.0  ;;  %v361_v2 = vmul.f32 %v1123_v0, %v748_v56  ;;  %v813_v3 = vunpack.c.h.bf16 %v876_v47  ;;  %v752_v4 = vunpack.c.l.bf16 %v862_v52  ;;  %v881_v47 = vld [vmem:[%s1118_s10 + $0x48] sm:$0xff]   ;;  %v867_v56 = vld [vmem:[%s1113_s7 + $0x50] sm:$0xff]  }
  0x25   : > { %552 = vst [vmem:[%s1159_s24 + $0x18] sm:$0xff] %v520_v49  ;;  %v492_v6 = vadd.f32 %v809_v55, %v396_v59  ;;  %v362_v7 = vmul.f32 %v1123_v0, %v749_v61  ;;  %v816_v8 = vunpack.c.l.bf16 %v877_v57  ;;  %v753_v9 = vunpack.c.h.bf16 %v862_v52  ;;  %v882_v61 = vld [vmem:[%s1118_s10 + $0x50] sm:$0xff]  }
  0x26   : > { %553 = vst [vmem:[%s1159_s24 + $0x20] sm:$0xff] %v521_v53  ;;  %v397_v10 = vadd.f32 %v1128_v1, %v361_v2  ;;  %v363_v11 = vmul.f32 %v1123_v0, %v752_v4  ;;  %v817_v12 = vunpack.c.h.bf16 %v877_v57  ;;  %v756_v13 = vunpack.c.l.bf16 %v863_v62 }
  0x27   : > { %554 = vst [vmem:[%s1159_s24 + $0x28] sm:$0xff] %v522_v58  ;;  %v524_v15 = vmax.f32 %v492_v6, 0.0  ;;  %v398_v16 = vadd.f32 %v1128_v1, %v362_v7  ;;  %v364_v17 = vmul.f32 %v1123_v0, %v753_v9  ;;  %v820_v18 = vunpack.c.l.bf16 %v878_v5 }
  0x28   : > { %555 = vst [vmem:[%s1159_s24 + $0x30] sm:$0xff] %v523_v63  ;;  %v493_v19 = vadd.f32 %v812_v60, %v397_v10  ;;  %v399_v20 = vadd.f32 %v1128_v1, %v363_v11  ;;  %v365_v21 = vmul.f32 %v1123_v0, %v756_v13  ;;  %v757_v22 = vunpack.c.h.bf16 %v863_v62 }
  0x29   : > { %556 = vst [vmem:[%s1159_s24 + $0x38] sm:$0xff] %v524_v15  ;;  %v494_v24 = vadd.f32 %v813_v3, %v398_v16  ;;  %v400_v25 = vadd.f32 %v1128_v1, %v364_v17  ;;  %v821_v26 = vunpack.c.h.bf16 %v878_v5  ;;  %v760_v27 = vunpack.c.l.bf16 %v864_v14  ;;  %v883_v17 = vld [vmem:[%s1118_s10 + $0x58] sm:$0xff]  }
  0x2a   : > { %v525_v28 = vmax.f32 %v493_v19, 0.0  ;;  %v495_v29 = vadd.f32 %v816_v8, %v399_v20  ;;  %v401_v30 = vadd.f32 %v1128_v1, %v365_v21  ;;  %v366_v31 = vmul.f32 %v1123_v0, %v757_v22 }
  0x2b   : > { %v526_v33 = vmax.f32 %v494_v24, 0.0  ;;  %v496_v34 = vadd.f32 %v817_v12, %v400_v25  ;;  %v367_v35 = vmul.f32 %v1123_v0, %v760_v27  ;;  %v824_v36 = vunpack.c.l.bf16 %v879_v23  ;;  %v868_v12 = vld [vmem:[%s1113_s7 + $0x58] sm:$0xff]  }
  0x2c   : > { %557 = vst [vmem:[%s1159_s24 + $0x40] sm:$0xff] %v525_v28  ;;  %v527_v38 = vmax.f32 %v495_v29, 0.0  ;;  %v497_v39 = vadd.f32 %v820_v18, %v401_v30  ;;  %v402_v40 = vadd.f32 %v1128_v1, %v366_v31  ;;  %v761_v41 = vunpack.c.h.bf16 %v864_v14  ;;  %v884_v31 = vld [vmem:[%s1118_s10 + $0x60] sm:$0xff]  }
  0x2d   : > { %558 = vst [vmem:[%s1159_s24 + $0x48] sm:$0xff] %v526_v33  ;;  %v528_v42 = vmax.f32 %v496_v34, 0.0  ;;  %v403_v43 = vadd.f32 %v1128_v1, %v367_v35  ;;  %v825_v44 = vunpack.c.h.bf16 %v879_v23  ;;  %v764_v45 = vunpack.c.l.bf16 %v865_v32 }
  0x2e   : > { %559 = vst [vmem:[%s1159_s24 + $0x50] sm:$0xff] %v527_v38  ;;  %v529_v48 = vmax.f32 %v497_v39, 0.0  ;;  %v498_v49 = vadd.f32 %v821_v26, %v402_v40  ;;  %v368_v50 = vmul.f32 %v1123_v0, %v761_v41  ;;  %v828_v51 = vunpack.c.l.bf16 %v880_v37  ;;  %v869_v26 = vld [vmem:[%s1113_s7 + $0x60] sm:$0xff]   ;;  %v870_v40 = vld [vmem:[%s1113_s7 + $0x68] sm:$0xff]  }
  0x2f   : > { %560 = vst [vmem:[%s1159_s24 + $0x58] sm:$0xff] %v528_v42  ;;  %v499_v52 = vadd.f32 %v824_v36, %v403_v43  ;;  %v369_v53 = vmul.f32 %v1123_v0, %v764_v45  ;;  %v765_v54 = vunpack.c.h.bf16 %v865_v32  ;;  %v829_v55 = vunpack.c.h.bf16 %v880_v37  ;;  %v885_v41 = vld [vmem:[%s1118_s10 + $0x68] sm:$0xff]  }
  0x30   : > { %561 = vst [vmem:[%s1159_s24 + $0x60] sm:$0xff] %v529_v48  ;;  %v530_v57 = vmax.f32 %v498_v49, 0.0  ;;  %v404_v58 = vadd.f32 %v1128_v1, %v368_v50  ;;  %v768_v59 = vunpack.c.l.bf16 %v866_v46  ;;  %v832_v60 = vunpack.c.l.bf16 %v881_v47  ;;  %v871_v50 = vld [vmem:[%s1113_s7 + $0x70] sm:$0xff]  }
  0x31   : > { %v531_v62 = vmax.f32 %v499_v52, 0.0  ;;  %v405_v63 = vadd.f32 %v1128_v1, %v369_v53  ;;  %v370_v2 = vmul.f32 %v1123_v0, %v765_v54  ;;  %v769_v3 = vunpack.c.h.bf16 %v866_v46 }
  0x32   : > { %562 = vst [vmem:[%s1159_s24 + $0x68] sm:$0xff] %v530_v57  ;;  %v500_v4 = vadd.f32 %v825_v44, %v404_v58  ;;  %v371_v5 = vmul.f32 %v1123_v0, %v768_v59  ;;  %v833_v6 = vunpack.c.h.bf16 %v881_v47  ;;  %v772_v7 = vunpack.c.l.bf16 %v867_v56  ;;  %v886_v59 = vld [vmem:[%s1118_s10 + $0x70] sm:$0xff]  }
  0x33   : > { %563 = vst [vmem:[%s1159_s24 + $0x70] sm:$0xff] %v531_v62  ;;  %v501_v8 = vadd.f32 %v828_v51, %v405_v63  ;;  %v406_v9 = vadd.f32 %v1128_v1, %v370_v2  ;;  %v372_v10 = vmul.f32 %v1123_v0, %v769_v3  ;;  %v836_v11 = vunpack.c.l.bf16 %v882_v61 }
  0x34   : > { %v532_v13 = vmax.f32 %v500_v4, 0.0  ;;  %v407_v14 = vadd.f32 %v1128_v1, %v371_v5  ;;  %v373_v15 = vmul.f32 %v1123_v0, %v772_v7  ;;  %v773_v16 = vunpack.c.h.bf16 %v867_v56 }
  0x35   : > { %v533_v18 = vmax.f32 %v501_v8, 0.0  ;;  %v502_v19 = vadd.f32 %v829_v55, %v406_v9  ;;  %v408_v20 = vadd.f32 %v1128_v1, %v372_v10  ;;  %v837_v21 = vunpack.c.h.bf16 %v882_v61 }
  0x36   : > { %564 = vst [vmem:[%s1159_s24 + $0x78] sm:$0xff] %v532_v13  ;;  %v503_v22 = vadd.f32 %v832_v60, %v407_v14  ;;  %v409_v23 = vadd.f32 %v1128_v1, %v373_v15  ;;  %v374_v24 = vmul.f32 %v1123_v0, %v773_v16  ;;  %v776_v25 = vunpack.c.l.bf16 %v868_v12 }
  0x37   : > { %565 = vst [vmem:[%s1159_s24 + $0x80] sm:$0xff] %v533_v18  ;;  %v534_v27 = vmax.f32 %v502_v19, 0.0  ;;  %v504_v28 = vadd.f32 %v833_v6, %v408_v20  ;;  %v840_v29 = vunpack.c.l.bf16 %v883_v17  ;;  %v777_v30 = vunpack.c.h.bf16 %v868_v12  ;;  %v872_v6 = vld [vmem:[%s1113_s7 + $0x78] sm:$0xff]   ;;  %s582_s7 = scalar_lea.sflag [#allocation3], %s257_s21 }
  0x38   : > { %v535_v32 = vmax.f32 %v503_v22, 0.0  ;;  %v505_v33 = vadd.f32 %v836_v11, %v409_v23  ;;  %v410_v34 = vadd.f32 %v1128_v1, %v374_v24  ;;  %v375_v35 = vmul.f32 %v1123_v0, %v776_v25  ;;  %v887_v11 = vld [vmem:[%s1118_s10 + $0x78] sm:$0xff]  }
  0x39   : > { %566 = vst [vmem:[%s1159_s24 + $0x88] sm:$0xff] %v534_v27  ;;  %v536_v36 = vmax.f32 %v504_v28, 0.0  ;;  %v376_v37 = vmul.f32 %v1123_v0, %v777_v30  ;;  %v841_v38 = vunpack.c.h.bf16 %v883_v17  ;;  %v780_v39 = vunpack.c.l.bf16 %v869_v26 }
  0x3a   : > { %567 = vst [vmem:[%s1159_s24 + $0x90] sm:$0xff] %v535_v32  ;;  %v537_v42 = vmax.f32 %v505_v33, 0.0  ;;  %v506_v43 = vadd.f32 %v837_v21, %v410_v34  ;;  %v411_v44 = vadd.f32 %v1128_v1, %v375_v35  ;;  %v844_v45 = vunpack.c.l.bf16 %v884_v31 }
  0x3b   : > { %568 = vst [vmem:[%s1159_s24 + $0x98] sm:$0xff] %v536_v36  ;;  %v412_v46 = vadd.f32 %v1128_v1, %v376_v37  ;;  %v377_v47 = vmul.f32 %v1123_v0, %v780_v39  ;;  %v781_v48 = vunpack.c.h.bf16 %v869_v26  ;;  %v845_v49 = vunpack.c.h.bf16 %v884_v31 }
  0x3c   : > { %569 = vst [vmem:[%s1159_s24 + $0xa0] sm:$0xff] %v537_v42  ;;  %v538_v51 = vmax.f32 %v506_v43, 0.0  ;;  %v507_v52 = vadd.f32 %v840_v29, %v411_v44  ;;  %v784_v53 = vunpack.c.l.bf16 %v870_v40  ;;  %v848_v54 = vunpack.c.l.bf16 %v885_v41 }
  0x3d   : > { %v508_v55 = vadd.f32 %v841_v38, %v412_v46  ;;  %v413_v56 = vadd.f32 %v1128_v1, %v377_v47  ;;  %v378_v57 = vmul.f32 %v1123_v0, %v781_v48  ;;  %v785_v58 = vunpack.c.h.bf16 %v870_v40 }
  0x3e   : > { %570 = vst [vmem:[%s1159_s24 + $0xa8] sm:$0xff] %v538_v51  ;;  %v539_v60 = vmax.f32 %v507_v52, 0.0  ;;  %v379_v61 = vmul.f32 %v1123_v0, %v784_v53  ;;  %v849_v62 = vunpack.c.h.bf16 %v885_v41  ;;  %v788_v63 = vunpack.c.l.bf16 %v871_v50 }
  0x3f   : > { %v540_v2 = vmax.f32 %v508_v55, 0.0  ;;  %v509_v3 = vadd.f32 %v844_v45, %v413_v56  ;;  %v414_v4 = vadd.f32 %v1128_v1, %v378_v57  ;;  %v380_v5 = vmul.f32 %v1123_v0, %v785_v58 }
  0x40   : > { %571 = vst [vmem:[%s1159_s24 + $0xb0] sm:$0xff] %v539_v60  ;;  %v415_v7 = vadd.f32 %v1128_v1, %v379_v61  ;;  %v381_v8 = vmul.f32 %v1123_v0, %v788_v63  ;;  %v852_v9 = vunpack.c.l.bf16 %v886_v59  ;;  %v789_v10 = vunpack.c.h.bf16 %v871_v50 }
  0x41   : > { %572 = vst [vmem:[%s1159_s24 + $0xb8] sm:$0xff] %v540_v2  ;;  %v541_v12 = vmax.f32 %v509_v3, 0.0  ;;  %v510_v13 = vadd.f32 %v845_v49, %v414_v4  ;;  %v416_v14 = vadd.f32 %v1128_v1, %v380_v5  ;;  %v853_v15 = vunpack.c.h.bf16 %v886_v59 }
  0x42   : > { %v511_v16 = vadd.f32 %v848_v54, %v415_v7  ;;  %v417_v17 = vadd.f32 %v1128_v1, %v381_v8  ;;  %v382_v18 = vmul.f32 %v1123_v0, %v789_v10  ;;  %v792_v19 = vunpack.c.l.bf16 %v872_v6 }
  0x43   : > { %573 = vst [vmem:[%s1159_s24 + $0xc0] sm:$0xff] %v541_v12  ;;  %v542_v20 = vmax.f32 %v510_v13, 0.0  ;;  %v512_v21 = vadd.f32 %v849_v62, %v416_v14  ;;  %v856_v22 = vunpack.c.l.bf16 %v887_v11  ;;  %v793_v23 = vunpack.c.h.bf16 %v872_v6 }
  0x44   : > { %v543_v24 = vmax.f32 %v511_v16, 0.0  ;;  %v513_v25 = vadd.f32 %v852_v9, %v417_v17  ;;  %v418_v26 = vadd.f32 %v1128_v1, %v382_v18  ;;  %v383_v27 = vmul.f32 %v1123_v0, %v792_v19 }
  0x45   : > { %574 = vst [vmem:[%s1159_s24 + $0xc8] sm:$0xff] %v542_v20  ;;  %v544_v28 = vmax.f32 %v512_v21, 0.0  ;;  %v384_v29 = vmul.f32 %v1123_v0, %v793_v23  ;;  %v857_v30 = vunpack.c.h.bf16 %v887_v11 }
  0x46   : > { %575 = vst [vmem:[%s1159_s24 + $0xd0] sm:$0xff] %v543_v24  ;;  %v545_v31 = vmax.f32 %v513_v25, 0.0  ;;  %v514_v32 = vadd.f32 %v853_v15, %v418_v26  ;;  %v419_v33 = vadd.f32 %v1128_v1, %v383_v27 }
  0x47   : > { %576 = vst [vmem:[%s1159_s24 + $0xd8] sm:$0xff] %v544_v28  ;;  %v420_v34 = vadd.f32 %v1128_v1, %v384_v29 }
  0x48   : > { %577 = vst [vmem:[%s1159_s24 + $0xe0] sm:$0xff] %v545_v31  ;;  %v546_v35 = vmax.f32 %v514_v32, 0.0  ;;  %v515_v36 = vadd.f32 %v856_v22, %v419_v33 }
  0x49   : > { %v516_v37 = vadd.f32 %v857_v30, %v420_v34 }
  0x4a   : > { %578 = vst [vmem:[%s1159_s24 + $0xe8] sm:$0xff] %v546_v35  ;;  %v547_v0 = vmax.f32 %v515_v36, 0.0 }
  0x4b   : > { %v548_v38 = vmax.f32 %v516_v37, 0.0 }
  0x4c   : > { %579 = vst [vmem:[%s1159_s24 + $0xf0] sm:$0xff] %v547_v0 }
  0x4d   : > { %580 = vst [vmem:[%s1159_s24 + $0xf8] sm:$0xff] %v548_v38 }
  0x4e   : > { %974 = shalt.err (!%p971_p5)
}
  0x4f   : > { %s1027_s21 = smov 128   ;;  %s1028_s22 = smov 8  }
  0x50   : > { %888 = dma.vmem_to_hbm [thread:$0]  (%p1094_p4), %s596_s5, 4096, %s598_s6, %s582_s7, %s1027_s21, %s1027_s21, %s1028_s22  }
  0x51 PF: > { %p894_p6 = scmp.ge.s32.totalorder %s1025_s20, 2  ;;  %s612_s24 = sand.u32 1, %s1005_s15  }
  0x52   : > { %s613_s26 = scalar_lea.sflag [#allocation3], %s612_s24 }
  0x53   : > { %p891_p7 = pnand %p894_p6, %p1101_p8 }
  0x55   : > { %p892_p9 = pneg %p891_p7 }
  0x57   : > { %1000 = dma.done.wait (%p892_p9), %s613_s26, 4096  }
  0x58   : > { %1002 = vsyncadd (%p892_p9), %s613_s26, 4294963200  ;;  %s17_s20 = sadd.s32 1, %s1025_s20   ;;  %s1309_s15 = smov %s1009_s16 }
  0x59   : > { %p14_p10 = scmp.ge.s32.totalorder %s17_s20, 4   ;;  %s1310_s16 = smov %s1013_s17 }
  0x5a   : > { %s1311_s17 = smov %s1107_s28  ;;  %s1312_s18 = smov %s1021_s19 }
  0x5b   : > { %s1313_s19 = smov %s1315_s23  ;;  %16 = sbr.rel (!%p14_p10) target bundleno = 4 (0x4), region = 80 }
  0x60   :  { %619 = vsyncpa [#allocation3], 1 }
  0x61   :  { %621 = vsyncpa [#allocation3 + $0x1], 1 }

// kernel: bottleneck_forward.8
= control target key start
LH: loop header
LB: loop body
LE: loop exit
PB: predicated region body
PF: predicated region fallthrough
CT: control target
= control target key end

     0   :  { %s2453_s15 = smov 0   ;;  %s2455_s16 = smov 0   ;;  %s3003_s0 = inlined_call_operand.vmem [shape: bf16[512,1152], index: 0, kind: input, shape index: {}]   ;;  %s3004_s1 = inlined_call_operand.vmem [shape: bf16[1152,128], index: 1, kind: input, shape index: {}]   ;;  %s3005_s2 = inlined_call_operand.vmem [shape: bf16[512,128], index: 2, kind: output, shape index: {0}]   ;;  %s3006_s3 = inlined_call_operand.vmem [shape: f32[2,1,128], index: 3, kind: output, shape index: {1}]   ;;  %s3007_s4 = inlined_call_operand.vmem [shape: f32[2,1,128], index: 4, kind: output, shape index: {2}]  }
   0x1   :  { %s2457_s17 = smov 0   ;;  %s2459_s18 = smov 0  }
   0x2   :  { %s2461_s19 = smov 0   ;;  %s2463_s20 = smov 0  }
   0x3   :  { %s2465_s21 = smov 0  }
   0x4 LB: > { %s27_s22 = sadd.s32 1, %s2417_s19  ;;  %s34_s23 = sadd.s32 1, %s2421_s20  ;;  %s2425_s21 = sphi %s2465_s21, %s15_s21   ;;  %s2421_s20 = sphi %s2463_s20, %s3013_s20   ;;  %s2417_s19 = sphi %s2461_s19, %s3012_s19   ;;  %s2413_s18 = sphi %s2459_s18, %s3011_s18   ;;  %s2409_s17 = sphi %s2457_s17, %s3010_s17   ;;  %s2405_s16 = sphi %s2455_s16, %s3009_s16   ;;  %s2401_s15 = sphi %s2453_s15, %s3008_s15  }
   0x5   : > { %p28_p0 = scmp.ge.s32.totalorder %s27_s22, 3  ;;  %p50_p1 = scmp.ne.s32.totalorder %s2405_s16, %s2401_s15 }
   0x6   : > { %p51_p2 = scmp.eq.s32.totalorder %s2425_s21, 0  ;;  %s43_s27 = sadd.s32 1, %s2405_s16 }
   0x7   : > { %s3015_s22 = smov (%p28_p0, %s27_s22), 0  ;;  %s3017_s23 = smov (!%p28_p0, %s34_s23), %s2421_s20 }
   0x8   : > { %p52_p3 = por %p51_p2, %p50_p1  ;;  %p36_p4 = scmp.ge.s32.totalorder %s3017_s23, 2 }
   0x9   : > { %s39_s24 = ssub.s32 %s2417_s19, %s3015_s22  ;;  %p1756_p6 = scmp.ge.s32.totalorder %s2425_s21, 6 }
   0xa   : > { %s3019_s23 = smov (%p36_p4, %s3017_s23), 0 }
   0xb   : > { %s38_s25 = ssub.s32 %s2421_s20, %s3019_s23  ;;  %188 = sbr.rel (%p1756_p6) target bundleno = 89 (0x59), region = 16 }
   0xc   : > { %s40_s26 = sor.u32 %s39_s24, %s38_s25 }
   0xd   : > { %p41_p5 = scmp.eq.s32.totalorder %s40_s26, 0 }
   0xf   : > { %s2504_s28 = scalar_select %p41_p5, %s2405_s16, %s43_s27  }
  0x10   : > { %191 = sbr.rel (!%p52_p3) target bundleno = 89 (0x59), region = 20  ;;  %s193_s29 = sand.u32 (%p52_p3), 1, %s2405_s16  }
  0x11   : > { %s197_s30 = smul.u32 (%p52_p3), 3, %s2417_s19 }
  0x12   : > { %s2311_s5 = smul.u32 (%p52_p3), 384, %s193_s29 }
  0x13   : > { %s2312_s6 = smul.u32 (%p52_p3), 288, %s2421_s20 }
  0x14   : > { %s2518_s12 = scalar_lea.vmem (%p52_p3), [#allocation3], %s2311_s5 }
  0x15   : > { %s199_s7 = sadd.s32 %s2312_s6, %s197_s30 }
  0x16   : > { %s1759_s8 = sshll.u32 %s199_s7, 2 }
  0x17   : > { %s2513_s11 = scalar_lea.vmem %s3003_s0, %s1759_s8 }
  0x18   : > { %v216_v0 = vld [vmem:[%s2513_s11] sm:$0xff]  ;;  %v220_v2 = vld [vmem:[%s2513_s11 + $0x48] sm:$0xff]  ;;  %v224_v4 = vld [vmem:[%s2513_s11 + $0x90] sm:$0xff] }
  0x19   : > { %v218_v1 = vld [vmem:[%s2513_s11 + $0x24] sm:$0xff]  ;;  %217 = vst [vmem:[%s2518_s12] sm:$0xff] %v216_v0  ;;  %v222_v3 = vld [vmem:[%s2513_s11 + $0x6c] sm:$0xff]  ;;  %v226_v5 = vld [vmem:[%s2513_s11 + $0xb4] sm:$0xff] }
  0x1a   : > { %219 = vst [vmem:[%s2518_s12 + $0xc] sm:$0xff] %v218_v1  ;;  %v228_v6 = vld [vmem:[%s2513_s11 + $0xd8] sm:$0xff]  ;;  %v232_v8 = vld [vmem:[%s2513_s11 + $0x120] sm:$0xff]  ;;  %v236_v10 = vld [vmem:[%s2513_s11 + $0x168] sm:$0xff] }
  0x1b   : > { %221 = vst [vmem:[%s2518_s12 + $0x18] sm:$0xff] %v220_v2  ;;  %v230_v7 = vld [vmem:[%s2513_s11 + $0xfc] sm:$0xff]  ;;  %v234_v9 = vld [vmem:[%s2513_s11 + $0x144] sm:$0xff]  ;;  %v238_v11 = vld [vmem:[%s2513_s11 + $0x18c] sm:$0xff] }
  0x1c   : > { %223 = vst [vmem:[%s2518_s12 + $0x24] sm:$0xff] %v222_v3  ;;  %v240_v12 = vld [vmem:[%s2513_s11 + $0x1b0] sm:$0xff]  ;;  %v244_v14 = vld [vmem:[%s2513_s11 + $0x1f8] sm:$0xff]  ;;  %v248_v16 = vld [vmem:[%s2513_s11 + $0x240] sm:$0xff] }
  0x1d   : > { %225 = vst [vmem:[%s2518_s12 + $0x30] sm:$0xff] %v224_v4  ;;  %v242_v13 = vld [vmem:[%s2513_s11 + $0x1d4] sm:$0xff]  ;;  %v246_v15 = vld [vmem:[%s2513_s11 + $0x21c] sm:$0xff]  ;;  %v250_v17 = vld [vmem:[%s2513_s11 + $0x264] sm:$0xff] }
  0x1e   : > { %227 = vst [vmem:[%s2518_s12 + $0x3c] sm:$0xff] %v226_v5  ;;  %v252_v18 = vld [vmem:[%s2513_s11 + $0x288] sm:$0xff]  ;;  %v256_v20 = vld [vmem:[%s2513_s11 + $0x2d0] sm:$0xff]  ;;  %v260_v22 = vld [vmem:[%s2513_s11 + $0x318] sm:$0xff] }
  0x1f   : > { %229 = vst [vmem:[%s2518_s12 + $0x48] sm:$0xff] %v228_v6  ;;  %v254_v19 = vld [vmem:[%s2513_s11 + $0x2ac] sm:$0xff]  ;;  %v258_v21 = vld [vmem:[%s2513_s11 + $0x2f4] sm:$0xff]  ;;  %v262_v23 = vld [vmem:[%s2513_s11 + $0x33c] sm:$0xff] }
  0x20   : > { %231 = vst [vmem:[%s2518_s12 + $0x54] sm:$0xff] %v230_v7  ;;  %v264_v24 = vld [vmem:[%s2513_s11 + $0x360] sm:$0xff]  ;;  %v268_v26 = vld [vmem:[%s2513_s11 + $0x3a8] sm:$0xff]  ;;  %v272_v28 = vld [vmem:[%s2513_s11 + $0x3f0] sm:$0xff] }
  0x21   : > { %233 = vst [vmem:[%s2518_s12 + $0x60] sm:$0xff] %v232_v8  ;;  %v266_v25 = vld [vmem:[%s2513_s11 + $0x384] sm:$0xff]  ;;  %v270_v27 = vld [vmem:[%s2513_s11 + $0x3cc] sm:$0xff]  ;;  %v274_v29 = vld [vmem:[%s2513_s11 + $0x414] sm:$0xff] }
  0x22   : > { %235 = vst [vmem:[%s2518_s12 + $0x6c] sm:$0xff] %v234_v9  ;;  %v276_v30 = vld [vmem:[%s2513_s11 + $0x438] sm:$0xff]  ;;  %v1760_v32 = vld [vmem:[%s2513_s11 + $0x8] sm:$0xf]  ;;  %v1762_v33 = vld [vmem:[%s2513_s11 + $0x2c] sm:$0xf] }
  0x23   : > { %237 = vst [vmem:[%s2518_s12 + $0x78] sm:$0xff] %v236_v10  ;;  %v278_v31 = vld [vmem:[%s2513_s11 + $0x45c] sm:$0xff]  ;;  %v1764_v34 = vld [vmem:[%s2513_s11 + $0x50] sm:$0xf]  ;;  %v1766_v35 = vld [vmem:[%s2513_s11 + $0x74] sm:$0xf] }
  0x24   : > { %239 = vst [vmem:[%s2518_s12 + $0x84] sm:$0xff] %v238_v11  ;;  %v1768_v36 = vld [vmem:[%s2513_s11 + $0x98] sm:$0xf]  ;;  %v1770_v37 = vld [vmem:[%s2513_s11 + $0xbc] sm:$0xf] }
  0x25   : > { %241 = vst [vmem:[%s2518_s12 + $0x90] sm:$0xff] %v240_v12  ;;  %v1772_v38 = vld [vmem:[%s2513_s11 + $0xe0] sm:$0xf]  ;;  %v1774_v39 = vld [vmem:[%s2513_s11 + $0x104] sm:$0xf] }
  0x26   : > { %243 = vst [vmem:[%s2518_s12 + $0x9c] sm:$0xff] %v242_v13  ;;  %v1776_v40 = vld [vmem:[%s2513_s11 + $0x128] sm:$0xf]  ;;  %v1778_v41 = vld [vmem:[%s2513_s11 + $0x14c] sm:$0xf] }
  0x27   : > { %245 = vst [vmem:[%s2518_s12 + $0xa8] sm:$0xff] %v244_v14  ;;  %v1780_v42 = vld [vmem:[%s2513_s11 + $0x170] sm:$0xf]  ;;  %v1782_v43 = vld [vmem:[%s2513_s11 + $0x194] sm:$0xf] }
  0x28   : > { %247 = vst [vmem:[%s2518_s12 + $0xb4] sm:$0xff] %v246_v15  ;;  %v1784_v44 = vld [vmem:[%s2513_s11 + $0x1b8] sm:$0xf]  ;;  %v1786_v45 = vld [vmem:[%s2513_s11 + $0x1dc] sm:$0xf] }
  0x29   : > { %249 = vst [vmem:[%s2518_s12 + $0xc0] sm:$0xff] %v248_v16  ;;  %v1788_v46 = vld [vmem:[%s2513_s11 + $0x200] sm:$0xf]  ;;  %v1790_v47 = vld [vmem:[%s2513_s11 + $0x224] sm:$0xf] }
  0x2a   : > { %251 = vst [vmem:[%s2518_s12 + $0xcc] sm:$0xff] %v250_v17  ;;  %v1792_v48 = vld [vmem:[%s2513_s11 + $0x248] sm:$0xf]  ;;  %v1794_v49 = vld [vmem:[%s2513_s11 + $0x26c] sm:$0xf] }
  0x2b   : > { %253 = vst [vmem:[%s2518_s12 + $0xd8] sm:$0xff] %v252_v18  ;;  %v1796_v50 = vld [vmem:[%s2513_s11 + $0x290] sm:$0xf]  ;;  %v1798_v51 = vld [vmem:[%s2513_s11 + $0x2b4] sm:$0xf] }
  0x2c   : > { %255 = vst [vmem:[%s2518_s12 + $0xe4] sm:$0xff] %v254_v19  ;;  %v1800_v52 = vld [vmem:[%s2513_s11 + $0x2d8] sm:$0xf]  ;;  %v1802_v53 = vld [vmem:[%s2513_s11 + $0x2fc] sm:$0xf] }
  0x2d   : > { %257 = vst [vmem:[%s2518_s12 + $0xf0] sm:$0xff] %v256_v20  ;;  %v1804_v54 = vld [vmem:[%s2513_s11 + $0x320] sm:$0xf]  ;;  %v1806_v55 = vld [vmem:[%s2513_s11 + $0x344] sm:$0xf] }
  0x2e   : > { %259 = vst [vmem:[%s2518_s12 + $0xfc] sm:$0xff] %v258_v21  ;;  %v1808_v56 = vld [vmem:[%s2513_s11 + $0x368] sm:$0xf]  ;;  %v1810_v57 = vld [vmem:[%s2513_s11 + $0x38c] sm:$0xf] }
  0x2f   : > { %261 = vst [vmem:[%s2518_s12 + $0x108] sm:$0xff] %v260_v22  ;;  %v1812_v58 = vld [vmem:[%s2513_s11 + $0x3b0] sm:$0xf]  ;;  %v1814_v59 = vld [vmem:[%s2513_s11 + $0x3d4] sm:$0xf] }
  0x30   : > { %263 = vst [vmem:[%s2518_s12 + $0x114] sm:$0xff] %v262_v23  ;;  %v1816_v60 = vld [vmem:[%s2513_s11 + $0x3f8] sm:$0xf]  ;;  %v1818_v61 = vld [vmem:[%s2513_s11 + $0x41c] sm:$0xf] }
  0x31   : > { %265 = vst [vmem:[%s2518_s12 + $0x120] sm:$0xff] %v264_v24  ;;  %v1820_v62 = vld [vmem:[%s2513_s11 + $0x440] sm:$0xf]  ;;  %v1822_v63 = vld [vmem:[%s2513_s11 + $0x464] sm:$0xf] }
  0x32   : > { %267 = vst [vmem:[%s2518_s12 + $0x12c] sm:$0xff] %v266_v25 }
  0x33   : > { %269 = vst [vmem:[%s2518_s12 + $0x138] sm:$0xff] %v268_v26 }
  0x34   : > { %271 = vst [vmem:[%s2518_s12 + $0x144] sm:$0xff] %v270_v27 }
  0x35   : > { %273 = vst [vmem:[%s2518_s12 + $0x150] sm:$0xff] %v272_v28 }
  0x36   : > { %275 = vst [vmem:[%s2518_s12 + $0x15c] sm:$0xff] %v274_v29 }
  0x37   : > { %277 = vst [vmem:[%s2518_s12 + $0x168] sm:$0xff] %v276_v30 }
  0x38   : > { %279 = vst [vmem:[%s2518_s12 + $0x174] sm:$0xff] %v278_v31 }
  0x39   : > { %1761 = vst [vmem:[%s2518_s12 + $0x8] sm:$0xf] %v1760_v32 }
  0x3a   : > { %1763 = vst [vmem:[%s2518_s12 + $0x14] sm:$0xf] %v1762_v33 }
  0x3b   : > { %1765 = vst [vmem:[%s2518_s12 + $0x20] sm:$0xf] %v1764_v34 }
  0x3c   : > { %1767 = vst [vmem:[%s2518_s12 + $0x2c] sm:$0xf] %v1766_v35 }
  0x3d   : > { %1769 = vst [vmem:[%s2518_s12 + $0x38] sm:$0xf] %v1768_v36 }
  0x3e   : > { %1771 = vst [vmem:[%s2518_s12 + $0x44] sm:$0xf] %v1770_v37 }
  0x3f   : > { %1773 = vst [vmem:[%s2518_s12 + $0x50] sm:$0xf] %v1772_v38 }
  0x40   : > { %1775 = vst [vmem:[%s2518_s12 + $0x5c] sm:$0xf] %v1774_v39 }
  0x41   : > { %1777 = vst [vmem:[%s2518_s12 + $0x68] sm:$0xf] %v1776_v40 }
  0x42   : > { %1779 = vst [vmem:[%s2518_s12 + $0x74] sm:$0xf] %v1778_v41 }
  0x43   : > { %1781 = vst [vmem:[%s2518_s12 + $0x80] sm:$0xf] %v1780_v42 }
  0x44   : > { %1783 = vst [vmem:[%s2518_s12 + $0x8c] sm:$0xf] %v1782_v43 }
  0x45   : > { %1785 = vst [vmem:[%s2518_s12 + $0x98] sm:$0xf] %v1784_v44 }
  0x46   : > { %1787 = vst [vmem:[%s2518_s12 + $0xa4] sm:$0xf] %v1786_v45 }
  0x47   : > { %1789 = vst [vmem:[%s2518_s12 + $0xb0] sm:$0xf] %v1788_v46 }
  0x48   : > { %1791 = vst [vmem:[%s2518_s12 + $0xbc] sm:$0xf] %v1790_v47 }
  0x49   : > { %1793 = vst [vmem:[%s2518_s12 + $0xc8] sm:$0xf] %v1792_v48 }
  0x4a   : > { %1795 = vst [vmem:[%s2518_s12 + $0xd4] sm:$0xf] %v1794_v49 }
  0x4b   : > { %1797 = vst [vmem:[%s2518_s12 + $0xe0] sm:$0xf] %v1796_v50 }
  0x4c   : > { %1799 = vst [vmem:[%s2518_s12 + $0xec] sm:$0xf] %v1798_v51 }
  0x4d   : > { %1801 = vst [vmem:[%s2518_s12 + $0xf8] sm:$0xf] %v1800_v52 }
  0x4e   : > { %1803 = vst [vmem:[%s2518_s12 + $0x104] sm:$0xf] %v1802_v53 }
  0x4f   : > { %1805 = vst [vmem:[%s2518_s12 + $0x110] sm:$0xf] %v1804_v54 }
  0x50   : > { %1807 = vst [vmem:[%s2518_s12 + $0x11c] sm:$0xf] %v1806_v55 }
  0x51   : > { %1809 = vst [vmem:[%s2518_s12 + $0x128] sm:$0xf] %v1808_v56 }
  0x52   : > { %1811 = vst [vmem:[%s2518_s12 + $0x134] sm:$0xf] %v1810_v57 }
  0x53   : > { %1813 = vst [vmem:[%s2518_s12 + $0x140] sm:$0xf] %v1812_v58 }
  0x54   : > { %1815 = vst [vmem:[%s2518_s12 + $0x14c] sm:$0xf] %v1814_v59 }
  0x55   : > { %1817 = vst [vmem:[%s2518_s12 + $0x158] sm:$0xf] %v1816_v60 }
  0x56   : > { %1819 = vst [vmem:[%s2518_s12 + $0x164] sm:$0xf] %v1818_v61 }
  0x57   : > { %1821 = vst [vmem:[%s2518_s12 + $0x170] sm:$0xf] %v1820_v62 }
  0x58   : > { %1823 = vst [vmem:[%s2518_s12 + $0x17c] sm:$0xf] %v1822_v63 }
  0x59 PF: > { %p1824_p7 = scmp.ge.s32.totalorder %s2425_s21, 1  ;;  %p368_p8 = scmp.lt.s32.totalorder %s2425_s21, 7 }
  0x5b   : > { %p369_p9 = pnand %p1824_p7, %p368_p8 }
  0x5c   : > { %s375_s13 = sand.u32 (!%p369_p9), 1, %s2401_s15   ;;  %s425_s14 = smul.u32 (!%p369_p9), 48, %s2409_s17 }
  0x5d   : > { %372 = sbr.rel (%p369_p9) target bundleno = 574 (0x23e), region = 50  ;;  %s1826_s25 = sshll.u32 (!%p369_p9), %s2413_s18, 5 }
  0x5e   : > { %s2313_s24 = smul.u32 (!%p369_p9), 384, %s375_s13  ;;  %p426_p10 = scmp.lt.s32.totalorder (!%p369_p9), %s425_s14, 143 }
  0x5f   : > { %p435_p11 = scmp.lt.s32.totalorder (!%p369_p9), %s1826_s25, 63  ;;  %p443_p12 = scmp.lt.s32.totalorder (!%p369_p9), %s2413_s18, 1 }
  0x60   : > { %p1828_p13 = scmp.ne.s32.totalorder (!%p369_p9), %s2409_s17, 0 }
  0x62   : > { %s3021_s14 = smov (!%p426_p10, %s425_s14), 143  ;;  %s3023_s25 = smov (!%p435_p11, %s1826_s25), 63 }
  0x63   : > { %s1825_s26 = sshll.u32 %s3021_s14, 2  ;;  %s1827_s5 = sshll.u32 %s3023_s25, 2 }
  0x64   : > { %s2654_s30 = scalar_lea.vmem %s3004_s1, %s1825_s26  ;;  %s2659_s8 = scalar_lea.vmem %s3005_s2, %s1827_s5 }
  0x65   : > { %s3025_s18 = smov (!%p443_p12, %s2413_s18), 1  ;;  %s2672_s14 = scalar_lea.vmem [#allocation3], %s2313_s24 }
  0x66   : > { %s448_s10 = scalar_lea.vmem %s3006_s3, %s3025_s18  ;;  %s454_s13 = scalar_lea.vmem %s3007_s4, %s3025_s18 }
  0x67   : > { %458 = sbr.rel (%p1828_p13) target bundleno = 141 (0x8d), region = 58 }
  0x6c   : > { %v2427_v0 = vmov 0.0  }
  0x6d   : > { %459 = vst [vmem:[#allocation2 + $0xb0] sm:$0xff] %v2427_v0 }
  0x6e   : > { %460 = vst [vmem:[#allocation2] sm:$0xff] %v2427_v0 }
  0x6f   : > { %461 = vst [vmem:[#allocation2 + $0xd8] sm:$0xff] %v2427_v0 }
  0x70   : > { %462 = vst [vmem:[#allocation2 + $0x18] sm:$0xff] %v2427_v0 }
  0x71   : > { %463 = vst [vmem:[#allocation2 + $0x50] sm:$0xff] %v2427_v0 }
  0x72   : > { %464 = vst [vmem:[#allocation2 + $0x68] sm:$0xff] %v2427_v0 }
  0x73   : > { %465 = vst [vmem:[#allocation2 + $0x30] sm:$0xff] %v2427_v0 }
  0x74   : > { %466 = vst [vmem:[#allocation2 + $0x48] sm:$0xff] %v2427_v0 }
  0x75   : > { %467 = vst [vmem:[#allocation2 + $0x80] sm:$0xff] %v2427_v0 }
  0x76   : > { %468 = vst [vmem:[#allocation2 + $0x88] sm:$0xff] %v2427_v0 }
  0x77   : > { %469 = vst [vmem:[#allocation2 + $0xe8] sm:$0xff] %v2427_v0 }
  0x78   : > { %470 = vst [vmem:[#allocation2 + $0xb8] sm:$0xff] %v2427_v0 }
  0x79   : > { %471 = vst [vmem:[#allocation2 + $0x60] sm:$0xff] %v2427_v0 }
  0x7a   : > { %472 = vst [vmem:[#allocation2 + $0xf0] sm:$0xff] %v2427_v0 }
  0x7b   : > { %473 = vst [vmem:[#allocation2 + $0x8] sm:$0xff] %v2427_v0 }
  0x7c   : > { %474 = vst [vmem:[#allocation2 + $0x78] sm:$0xff] %v2427_v0 }
  0x7d   : > { %475 = vst [vmem:[#allocation2 + $0x38] sm:$0xff] %v2427_v0 }
  0x7e   : > { %476 = vst [vmem:[#allocation2 + $0x58] sm:$0xff] %v2427_v0 }
  0x7f   : > { %477 = vst [vmem:[#allocation2 + $0x40] sm:$0xff] %v2427_v0 }
  0x80   : > { %478 = vst [vmem:[#allocation2 + $0xc8] sm:$0xff] %v2427_v0 }
  0x81   : > { %479 = vst [vmem:[#allocation2 + $0xe0] sm:$0xff] %v2427_v0 }
  0x82   : > { %480 = vst [vmem:[#allocation2 + $0x90] sm:$0xff] %v2427_v0 }
  0x83   : > { %481 = vst [vmem:[#allocation2 + $0x70] sm:$0xff] %v2427_v0 }
  0x84   : > { %482 = vst [vmem:[#allocation2 + $0xc0] sm:$0xff] %v2427_v0 }
  0x85   : > { %483 = vst [vmem:[#allocation2 + $0xa8] sm:$0xff] %v2427_v0 }
  0x86   : > { %484 = vst [vmem:[#allocation2 + $0xd0] sm:$0xff] %v2427_v0 }
  0x87   : > { %485 = vst [vmem:[#allocation2 + $0x10] sm:$0xff] %v2427_v0 }
  0x88   : > { %486 = vst [vmem:[#allocation2 + $0x28] sm:$0xff] %v2427_v0 }
  0x89   : > { %487 = vst [vmem:[#allocation2 + $0xa0] sm:$0xff] %v2427_v0 }
  0x8a   : > { %488 = vst [vmem:[#allocation2 + $0xf8] sm:$0xff] %v2427_v0 }
  0x8b   : > { %489 = vst [vmem:[#allocation2 + $0x20] sm:$0xff] %v2427_v0 }
  0x8c   : > { %490 = vst [vmem:[#allocation2 + $0x98] sm:$0xff] %v2427_v0 }
  0x8d PF: > { %v2175_v1 = vld [vmem:[%s2654_s30 + $0x38] sm:$0xff]  ;;  %v2174_v4 = vld [vmem:[%s2654_s30 + $0x30] sm:$0xff]  ;;  %v2173_v7 = vld [vmem:[%s2654_s30 + $0x28] sm:$0xff]  ;;  %p2117_p0 = scmp.ne.s32.totalorder %s2409_s17, 2 }
  0x8e   : > { %v2677_v2 = vld [vmem:[%s2654_s30 + $0x78] sm:$0xff]  ;;  %1035 = vmatpush.bf16.msra.mxu0 %v2175_v1  ;;  %2287 = vmatpush.bf16.msra.mxu3 %v2175_v1  ;;  %v2686_v5 = vld [vmem:[%s2654_s30 + $0x70] sm:$0xff]  ;;  %v2181_v8 = vld [vmem:[%s2654_s30 + $0x68] sm:$0xff] }
  0x8f   : > { %v2680_v3 = vld [vmem:[%s2654_s30 + $0xb8] sm:$0xff]  ;;  %1124 = vmatpush.bf16.msra.mxu1 %v2677_v2  ;;  %v2689_v6 = vld [vmem:[%s2654_s30 + $0xb0] sm:$0xff]  ;;  %v2696_v9 = vld [vmem:[%s2654_s30 + $0xa8] sm:$0xff] }
  0x90   : > { %1213 = vmatpush.bf16.msra.mxu2 %v2680_v3  ;;  %v2172_v10 = vld [vmem:[%s2654_s30 + $0x20] sm:$0xff]  ;;  %v2171_v13 = vld [vmem:[%s2654_s30 + $0x18] sm:$0xff]  ;;  %v2170_v16 = vld [vmem:[%s2654_s30 + $0x10] sm:$0xff] }
  0x91   : > { %v2180_v11 = vld [vmem:[%s2654_s30 + $0x60] sm:$0xff]  ;;  %v2179_v14 = vld [vmem:[%s2654_s30 + $0x58] sm:$0xff]  ;;  %v2178_v17 = vld [vmem:[%s2654_s30 + $0x50] sm:$0xff] }
  0x92   : > { %1036 = vmatpush.bf16.msra.mxu0 %v2174_v4  ;;  %2288 = vmatpush.bf16.msra.mxu3 %v2174_v4  ;;  %v2702_v12 = vld [vmem:[%s2654_s30 + $0xa0] sm:$0xff]  ;;  %v2708_v15 = vld [vmem:[%s2654_s30 + $0x98] sm:$0xff]  ;;  %v2714_v18 = vld [vmem:[%s2654_s30 + $0x90] sm:$0xff] }
  0x93   : > { %1125 = vmatpush.bf16.msra.mxu1 %v2686_v5  ;;  %v2169_v19 = vld [vmem:[%s2654_s30 + $0x8] sm:$0xff]  ;;  %v2168_v22 = vld [vmem:[%s2654_s30] sm:$0xff]  ;;  %v1833_v30 = vld [vmem:[%s2672_s14 + $0xc] sm:$0xf0] }
  0x94   : > { %1214 = vmatpush.bf16.msra.mxu2 %v2689_v6  ;;  %v2177_v20 = vld [vmem:[%s2654_s30 + $0x48] sm:$0xff]  ;;  %v2176_v23 = vld [vmem:[%s2654_s30 + $0x40] sm:$0xff]  ;;  %v2122_v32 = vld [vmem:[%s2672_s14 + $0x10] sm:$0xf0] }
  0x95   : > { %v2720_v21 = vld [vmem:[%s2654_s30 + $0x88] sm:$0xff]  ;;  %v2725_v24 = vld [vmem:[%s2654_s30 + $0x80] sm:$0xff]  ;;  %v1843_v37 = vld [vmem:[%s2672_s14 + $0x18] sm:$0xf] }
  0x96   : > { %1037 = vmatpush.bf16.msra.mxu0 %v2173_v7  ;;  %2289 = vmatpush.bf16.msra.mxu3 %v2173_v7  ;;  %v1831_v25 = vld [vmem:[%s2672_s14] sm:$0xf]  ;;  %v2121_v26 = vld [vmem:[%s2672_s14 + $0x8] sm:$0xf0]  ;;  %v2120_v29 = vld [vmem:[%s2672_s14 + $0x4] sm:$0xf] }
  0x97   : > { %1126 = vmatpush.bf16.msra.mxu1 %v2181_v8  ;;  %v1975_v27 = vld [vmem:[%s2672_s14 + $0x120] sm:$0xf]  ;;  %v2157_v28 = vld [vmem:[%s2672_s14 + $0x128] sm:$0xf0]  ;;  %v1839_v31 = vld [vmem:[%s2672_s14 + $0x8] sm:$0xf]  ;;  %v1832_v33 = vor.u32 %v2121_v26, %v1831_v25  ;;  %v1836_v35 = vor.u32 %v2120_v29, %v1833_v30 }
  0x98   : > { %1215 = vmatpush.bf16.msra.mxu2 %v2696_v9  ;;  %v1976_v34 = vor.u32 %v2157_v28, %v1975_v27  ;;  %v1840_v36 = vor.u32 %v2122_v32, %v1839_v31  ;;  %v2124_v38 = vld [vmem:[%s2672_s14 + $0x20] sm:$0xf0]  ;;  %v1987_v39 = vld [vmem:[%s2672_s14 + $0x138] sm:$0xf]  ;;  %v2123_v41 = vld [vmem:[%s2672_s14 + $0x1c] sm:$0xf] }
  0x99   : > { %v2160_v40 = vld [vmem:[%s2672_s14 + $0x140] sm:$0xf0]  ;;  %v1845_v42 = vld [vmem:[%s2672_s14 + $0x24] sm:$0xf0]  ;;  %v1851_v43 = vld [vmem:[%s2672_s14 + $0x20] sm:$0xf]  ;;  %v1844_v45 = vor.u32 %v2124_v38, %v1843_v37 }
  0x9a   : > { %1038 = vmatpush.bf16.msra.mxu0 %v2172_v10  ;;  %2290 = vmatpush.bf16.msra.mxu3 %v2172_v10  ;;  %v2125_v44 = vld [vmem:[%s2672_s14 + $0x28] sm:$0xf0]  ;;  %v1988_v46 = vor.u32 %v2160_v40, %v1987_v39  ;;  %v1848_v47 = vor.u32 %v2123_v41, %v1845_v42  ;;  %v1855_v49 = vld [vmem:[%s2672_s14 + $0x30] sm:$0xf]  ;;  %v2127_v50 = vld [vmem:[%s2672_s14 + $0x38] sm:$0xf0] }
  0x9b   : > { %1127 = vmatpush.bf16.msra.mxu1 %v2180_v11  ;;  %v1852_v48 = vor.u32 %v2125_v44, %v1851_v43  ;;  %v1999_v51 = vld [vmem:[%s2672_s14 + $0x150] sm:$0xf]  ;;  %v2163_v52 = vld [vmem:[%s2672_s14 + $0x158] sm:$0xf0]  ;;  %v2126_v53 = vld [vmem:[%s2672_s14 + $0x34] sm:$0xf]  ;;  %v1856_v57 = vor.u32 %v2127_v50, %v1855_v49 }
  0x9c   : > { %1216 = vmatpush.bf16.msra.mxu2 %v2702_v12  ;;  %v1857_v54 = vld [vmem:[%s2672_s14 + $0x3c] sm:$0xf0]  ;;  %v1863_v55 = vld [vmem:[%s2672_s14 + $0x38] sm:$0xf]  ;;  %v2128_v56 = vld [vmem:[%s2672_s14 + $0x40] sm:$0xf0]  ;;  %v2000_v58 = vor.u32 %v2163_v52, %v1999_v51 }
  0x9d   : > { %v1860_v59 = vor.u32 %v2126_v53, %v1857_v54  ;;  %v1864_v60 = vor.u32 %v2128_v56, %v1863_v55  ;;  %v1867_v61 = vld [vmem:[%s2672_s14 + $0x48] sm:$0xf]  ;;  %v2130_v62 = vld [vmem:[%s2672_s14 + $0x50] sm:$0xf0]  ;;  %v2129_v1 = vld [vmem:[%s2672_s14 + $0x4c] sm:$0xf] }
  0x9e   : > { %1039 = vmatpush.bf16.msra.mxu0 %v2171_v13  ;;  %2291 = vmatpush.bf16.msra.mxu3 %v2171_v13  ;;  %v2011_v63 = vld [vmem:[%s2672_s14 + $0x168] sm:$0xf]  ;;  %v2166_v0 = vld [vmem:[%s2672_s14 + $0x170] sm:$0xf0]  ;;  %v2131_v4 = vld [vmem:[%s2672_s14 + $0x58] sm:$0xf0] }
  0x9f   : > { %1128 = vmatpush.bf16.msra.mxu1 %v2179_v14  ;;  %v2133_v10 = vld [vmem:[%s2672_s14 + $0x68] sm:$0xf0]  ;;  %v1977_v13 = vld [vmem:[%s2672_s14 + $0x12c] sm:$0xf0]  ;;  %v2159_v25 = vld [vmem:[%s2672_s14 + $0x13c] sm:$0xf] }
  0xa0   : > { %1217 = vmatpush.bf16.msra.mxu2 %v2708_v15  ;;  %v1989_v26 = vld [vmem:[%s2672_s14 + $0x144] sm:$0xf0]  ;;  %v1899_v27 = vld [vmem:[%s2672_s14 + $0x80] sm:$0xf]  ;;  %v2137_v28 = vld [vmem:[%s2672_s14 + $0x88] sm:$0xf0] }
  0xa1   : > { %v1992_v30 = vor.u32 %v2159_v25, %v1989_v26  ;;  %v1900_v32 = vor.u32 %v2137_v28, %v1899_v27  ;;  %v2001_v37 = vld [vmem:[%s2672_s14 + $0x15c] sm:$0xf0]  ;;  %v1911_v39 = vld [vmem:[%s2672_s14 + $0x98] sm:$0xf]  ;;  %v2140_v40 = vld [vmem:[%s2672_s14 + $0xa0] sm:$0xf0] }
  0xa2   : > { %1040 = vmatpush.bf16.msra.mxu0 %v2170_v16  ;;  %2292 = vmatpush.bf16.msra.mxu3 %v2170_v16  ;;  %v2134_v16 = vld [vmem:[%s2672_s14 + $0x70] sm:$0xf0]  ;;  %v1905_v38 = vld [vmem:[%s2672_s14 + $0x9c] sm:$0xf0]  ;;  %v1912_v44 = vor.u32 %v2140_v40, %v1911_v39  ;;  %v2013_v49 = vld [vmem:[%s2672_s14 + $0x174] sm:$0xf0] }
  0xa3   : > { %1129 = vmatpush.bf16.msra.mxu1 %v2178_v17  ;;  %v1917_v50 = vld [vmem:[%s2672_s14 + $0xb4] sm:$0xf0]  ;;  %v1923_v51 = vld [vmem:[%s2672_s14 + $0xb0] sm:$0xf]  ;;  %v2143_v52 = vld [vmem:[%s2672_s14 + $0xb8] sm:$0xf0] }
  0xa4   : > { %1218 = vmatpush.bf16.msra.mxu2 %v2714_v18  ;;  %v1924_v56 = vor.u32 %v2143_v52, %v1923_v51  ;;  %v492_v26 = vld [vmem:[#allocation2] sm:$0xff] }
  0xa6   : > { %1041 = vmatpush.bf16.msra.mxu0 %v2169_v19  ;;  %2293 = vmatpush.bf16.msra.mxu3 %v2169_v19 }
  0xa7   : > { %1130 = vmatpush.bf16.msra.mxu1 %v2177_v20 }
  0xa8   : > { %1219 = vmatpush.bf16.msra.mxu2 %v2720_v21 }
  0xaa   : > { %1042 = vmatpush.bf16.msra.mxu0 %v2168_v22  ;;  %2294 = vmatpush.bf16.msra.mxu3 %v2168_v22  ;;  %v2136_v22 = vld [vmem:[%s2672_s14 + $0x80] sm:$0xf0] }
  0xab   : > { %1131 = vmatpush.bf16.msra.mxu1 %v2176_v23 }
  0xac   : > { %1220 = vmatpush.bf16.msra.mxu2 %v2725_v24 }
  0xad   : > { %1043 = vmatmul.bf16.vlgmr.msra.gmra.mxu0 %v1832_v33  ;;  %1103 = vmatmul.bf16.vlgmr.msra.gmra.mxu3 %v1976_v34  ;;  %v1903_v33 = vld [vmem:[%s2672_s14 + $0x90] sm:$0xf]  ;;  %v2139_v34 = vld [vmem:[%s2672_s14 + $0x98] sm:$0xf0] }
  0xae   : > { %2295 = vmatpush.bf16.msrb.mxu3 %v2677_v2  ;;  %1132 = vmatmul.bf16.vlgmr.msra.gmra.mxu1 %v1836_v35  ;;  %v1869_v2 = vld [vmem:[%s2672_s14 + $0x54] sm:$0xf0]  ;;  %v2138_v35 = vld [vmem:[%s2672_s14 + $0x94] sm:$0xf]  ;;  %v1904_v41 = vor.u32 %v2139_v34, %v1903_v33 }
  0xaf   : > { %1221 = vmatmul.bf16.vlgmr.msra.gmra.mxu2 %v1840_v36  ;;  %v1872_v7 = vor.u32 %v2129_v1, %v1869_v2  ;;  %v2162_v36 = vld [vmem:[%s2672_s14 + $0x154] sm:$0xf]  ;;  %v1908_v43 = vor.u32 %v2138_v35, %v1905_v38 }
  0xb0   : > { %v2004_v42 = vor.u32 %v2162_v36, %v2001_v37  ;;  %v493_v37 = vld [vmem:[#allocation2 + $0xd8] sm:$0xff] }
  0xb2   : > { %2296 = vmatpush.bf16.msrb.mxu3 %v2686_v5  ;;  %v1868_v5 = vor.u32 %v2130_v62, %v1867_v61  ;;  %v2158_v61 = vld [vmem:[%s2672_s14 + $0x130] sm:$0xf0]  ;;  %v1929_v62 = vld [vmem:[%s2672_s14 + $0xcc] sm:$0xf0] }
  0xb6   : > { %2297 = vmatpush.bf16.msrb.mxu3 %v2181_v8 }
  0xba   : > { %2298 = vmatpush.bf16.msrb.mxu3 %v2180_v11  ;;  %v2132_v11 = vld [vmem:[%s2672_s14 + $0x64] sm:$0xf] }
  0xbd   : > { %1048 = vmatmul.bf16.gmra.mxu0 %v1844_v45  ;;  %1108 = vmatmul.bf16.gmra.mxu3 %v1988_v46  ;;  %v1915_v45 = vld [vmem:[%s2672_s14 + $0xa8] sm:$0xf]  ;;  %v2142_v46 = vld [vmem:[%s2672_s14 + $0xb0] sm:$0xf0] }
  0xbe   : > { %2299 = vmatpush.bf16.msrb.mxu3 %v2179_v14  ;;  %1137 = vmatmul.bf16.gmra.mxu1 %v1848_v47  ;;  %v1881_v14 = vld [vmem:[%s2672_s14 + $0x6c] sm:$0xf0]  ;;  %v2141_v47 = vld [vmem:[%s2672_s14 + $0xac] sm:$0xf]  ;;  %v1916_v53 = vor.u32 %v2142_v46, %v1915_v45  ;;  %v2150_v45 = vld [vmem:[%s2672_s14 + $0xf4] sm:$0xf] }
  0xbf   : > { %1226 = vmatmul.bf16.gmra.mxu2 %v1852_v48  ;;  %v1884_v19 = vor.u32 %v2132_v11, %v1881_v14  ;;  %v2165_v48 = vld [vmem:[%s2672_s14 + $0x16c] sm:$0xf]  ;;  %v1920_v55 = vor.u32 %v2141_v47, %v1917_v50  ;;  %v2007_v46 = vld [vmem:[%s2672_s14 + $0x158] sm:$0xf]  ;;  %v2164_v47 = vld [vmem:[%s2672_s14 + $0x160] sm:$0xf0] }
  0xc0   : > { %v2016_v54 = vor.u32 %v2165_v48, %v2013_v49  ;;  %v1953_v48 = vld [vmem:[%s2672_s14 + $0xfc] sm:$0xf0]  ;;  %v1959_v49 = vld [vmem:[%s2672_s14 + $0xf8] sm:$0xf]  ;;  %v2152_v50 = vld [vmem:[%s2672_s14 + $0x100] sm:$0xf0] }
  0xc2   : > { %2300 = vmatpush.bf16.msrb.mxu3 %v2178_v17 }
  0xc6   : > { %2301 = vmatpush.bf16.msrb.mxu3 %v2177_v20 }
  0xca   : > { %2302 = vmatpush.bf16.msrb.mxu3 %v2176_v23  ;;  %v2135_v23 = vld [vmem:[%s2672_s14 + $0x7c] sm:$0xf] }
  0xcd   : > { %1053 = vmatmul.bf16.gmra.mxu0 %v1856_v57  ;;  %1113 = vmatmul.bf16.gmra.mxu3 %v2000_v58  ;;  %v1927_v57 = vld [vmem:[%s2672_s14 + $0xc0] sm:$0xf]  ;;  %v2145_v58 = vld [vmem:[%s2672_s14 + $0xc8] sm:$0xf0] }
  0xce   : > { %2303 = vmatpush.bf16.msra.mxu3 %v2680_v3  ;;  %1142 = vmatmul.bf16.gmra.mxu1 %v1860_v59  ;;  %v1875_v3 = vld [vmem:[%s2672_s14 + $0x50] sm:$0xf]  ;;  %v2144_v59 = vld [vmem:[%s2672_s14 + $0xc4] sm:$0xf]  ;;  %v1928_v1 = vor.u32 %v2145_v58, %v1927_v57 }
  0xcf   : > { %1231 = vmatmul.bf16.gmra.mxu2 %v1864_v60  ;;  %v1876_v8 = vor.u32 %v2131_v4, %v1875_v3  ;;  %v1983_v60 = vld [vmem:[%s2672_s14 + $0x128] sm:$0xf]  ;;  %v1932_v4 = vor.u32 %v2144_v59, %v1929_v62  ;;  %v1956_v59 = vor.u32 %v2150_v45, %v1953_v48  ;;  %v499_v48 = vld [vmem:[#allocation2 + $0x80] sm:$0xff] }
  0xd0   : > { %v1984_v2 = vor.u32 %v2158_v61, %v1983_v60  ;;  %v1960_v60 = vor.u32 %v2152_v50, %v1959_v49 }
  0xd2   : > { %2304 = vmatpush.bf16.msra.mxu3 %v2689_v6  ;;  %v2012_v6 = vor.u32 %v2166_v0, %v2011_v63  ;;  %v1935_v63 = vld [vmem:[%s2672_s14 + $0xc8] sm:$0xf]  ;;  %v2146_v0 = vld [vmem:[%s2672_s14 + $0xd0] sm:$0xf0] }
  0xd6   : > { %2305 = vmatpush.bf16.msra.mxu3 %v2696_v9  ;;  %v1879_v9 = vld [vmem:[%s2672_s14 + $0x60] sm:$0xf] }
  0xd7   : > { %v1880_v17 = vor.u32 %v2133_v10, %v1879_v9  ;;  %v491_v9 = vld [vmem:[#allocation2 + $0xb0] sm:$0xff] }
  0xda   : > { %2306 = vmatpush.bf16.msra.mxu3 %v2702_v12  ;;  %v2156_v12 = vld [vmem:[%s2672_s14 + $0x124] sm:$0xf] }
  0xdd   : > { %1058 = vmatmul.bf16.gmra.mxu0 %v1868_v5  ;;  %1118 = vmatmul.bf16.gmra.mxu3 %v2012_v6  ;;  %v1936_v5 = vor.u32 %v2146_v0, %v1935_v63 }
  0xde   : > { %2307 = vmatpush.bf16.msra.mxu3 %v2708_v15  ;;  %1147 = vmatmul.bf16.gmra.mxu1 %v1872_v7  ;;  %v1887_v15 = vld [vmem:[%s2672_s14 + $0x68] sm:$0xf] }
  0xdf   : > { %1236 = vmatmul.bf16.gmra.mxu2 %v1876_v8  ;;  %v1888_v20 = vor.u32 %v2134_v16, %v1887_v15  ;;  %v1939_v15 = vld [vmem:[%s2672_s14 + $0xd8] sm:$0xf]  ;;  %v2148_v16 = vld [vmem:[%s2672_s14 + $0xe0] sm:$0xf0] }
  0xe0   : > { %v1940_v27 = vor.u32 %v2148_v16, %v1939_v15  ;;  %v2155_v15 = vld [vmem:[%s2672_s14 + $0x118] sm:$0xf0] }
  0xe2   : > { %2308 = vmatpush.bf16.msra.mxu3 %v2714_v18  ;;  %v1980_v18 = vor.u32 %v2156_v12, %v1977_v13 }
  0xe6   : > { %2309 = vmatpush.bf16.msra.mxu3 %v2720_v21  ;;  %v1891_v21 = vld [vmem:[%s2672_s14 + $0x78] sm:$0xf] }
  0xe7   : > { %v1892_v29 = vor.u32 %v2136_v22, %v1891_v21  ;;  %v1947_v21 = vld [vmem:[%s2672_s14 + $0xe0] sm:$0xf]  ;;  %v2149_v22 = vld [vmem:[%s2672_s14 + $0xe8] sm:$0xf0] }
  0xea   : > { %2310 = vmatpush.bf16.msra.mxu3 %v2725_v24  ;;  %v1893_v24 = vld [vmem:[%s2672_s14 + $0x84] sm:$0xf0] }
  0xeb   : > { %v1896_v31 = vor.u32 %v2135_v23, %v1893_v24 }
  0xed   : > { %1063 = vmatmul.bf16.gmra.mxu0 %v1880_v17  ;;  %1192 = vmatmul.bf16.vlgmr.msrb.gmra.mxu3 %v1980_v18  ;;  %v2147_v17 = vld [vmem:[%s2672_s14 + $0xdc] sm:$0xf]  ;;  %v1995_v18 = vld [vmem:[%s2672_s14 + $0x140] sm:$0xf] }
  0xee   : > { %1152 = vmatmul.bf16.gmra.mxu1 %v1884_v19  ;;  %v2161_v19 = vld [vmem:[%s2672_s14 + $0x148] sm:$0xf0] }
  0xef   : > { %1241 = vmatmul.bf16.gmra.mxu2 %v1888_v20  ;;  %v1941_v20 = vld [vmem:[%s2672_s14 + $0xe4] sm:$0xf0]  ;;  %v1996_v28 = vor.u32 %v2161_v19, %v1995_v18 }
  0xf0   : > { %v496_v18 = vld [vmem:[#allocation2 + $0x68] sm:$0xff] }
  0xfd   : > { %1068 = vmatmul.bf16.gmra.mxu0 %v1892_v29  ;;  %1197 = vmatmul.bf16.gmra.mxu3 %v1992_v30 }
  0xfe   : > { %1157 = vmatmul.bf16.gmra.mxu1 %v1896_v31  ;;  %v1944_v31 = vor.u32 %v2147_v17, %v1941_v20 }
  0xff   : > { %1246 = vmatmul.bf16.gmra.mxu2 %v1900_v32  ;;  %v1948_v32 = vor.u32 %v2149_v22, %v1947_v21 }
 0x10d   : > { %1073 = vmatmul.bf16.gmra.mxu0 %v1904_v41  ;;  %1202 = vmatmul.bf16.gmra.mxu3 %v2004_v42 }
 0x10e   : > { %1162 = vmatmul.bf16.gmra.mxu1 %v1908_v43  ;;  %v1951_v43 = vld [vmem:[%s2672_s14 + $0xf0] sm:$0xf] }
 0x10f   : > { %1251 = vmatmul.bf16.gmra.mxu2 %v1912_v44  ;;  %v2151_v44 = vld [vmem:[%s2672_s14 + $0xf8] sm:$0xf0] }
 0x11d   : > { %1078 = vmatmul.bf16.gmra.mxu0 %v1916_v53  ;;  %1207 = vmatmul.bf16.gmra.mxu3 %v2016_v54  ;;  %v494_v53 = vld [vmem:[#allocation2 + $0x18] sm:$0xff] }
 0x11e   : > { %1167 = vmatmul.bf16.gmra.mxu1 %v1920_v55  ;;  %v1952_v55 = vor.u32 %v2151_v44, %v1951_v43 }
 0x11f   : > { %1256 = vmatmul.bf16.gmra.mxu2 %v1924_v56  ;;  %v2008_v56 = vor.u32 %v2164_v47, %v2007_v46 }
 0x12a   : > { %v1044_v3 = vpop.f32.mrf.mxu0 }
 0x12b   : > { %v1133_v6 = vpop.f32.mrf.mxu1 }
 0x12c   : > { %v1134_v7 = vadd.f32 %v1133_v6, %v1044_v3 }
 0x12d   : > { %1083 = vmatmul.bf16.gmra.mxu0 %v1928_v1  ;;  %1281 = vmatmul.bf16.vlgmr.msra.gmra.mxu3 %v1984_v2  ;;  %v495_v1 = vld [vmem:[#allocation2 + $0x50] sm:$0xff] }
 0x12e   : > { %1172 = vmatmul.bf16.gmra.mxu1 %v1932_v4 }
 0x12f   : > { %1261 = vmatmul.bf16.gmra.mxu2 %v1936_v5 }
 0x130   : > { %v2811_v8 = vpop.f32.mrf.mxu3 }
 0x132   : > { %v1222_v10 = vpop.f32.mrf.mxu2  ;;  %v1046_v12 = vpop.f32.mrf.mxu0 }
 0x133   : > { %v1223_v11 = vadd.f32 %v1222_v10, %v1134_v7  ;;  %v1135_v13 = vpop.f32.mrf.mxu1  ;;  %v1963_v7 = vld [vmem:[%s2672_s14 + $0x108] sm:$0xf]  ;;  %v2153_v10 = vld [vmem:[%s2672_s14 + $0x10c] sm:$0xf] }
 0x134   : > { %v1136_v23 = vadd.f32 %v1135_v13, %v1046_v12  ;;  %v2167_v12 = vld [vmem:[%s2672_s14 + $0x178] sm:$0xf0]  ;;  %v1965_v13 = vld [vmem:[%s2672_s14 + $0x114] sm:$0xf0] }
 0x135   : > { %v1302_v14 = vadd.f32 %v1223_v11, %v491_v9  ;;  %v2154_v9 = vld [vmem:[%s2672_s14 + $0x110] sm:$0xf0]  ;;  %v2019_v11 = vld [vmem:[%s2672_s14 + $0x170] sm:$0xf] }
 0x136   : > { %v1964_v20 = vor.u32 %v2154_v9, %v1963_v7  ;;  %v2020_v21 = vor.u32 %v2167_v12, %v2019_v11  ;;  %v502_v11 = vld [vmem:[#allocation2 + $0xb8] sm:$0xff] }
 0x137   : > { %1334 = vst [vmem:[#allocation2 + $0xb0] sm:$0xff] %v1302_v14  ;;  %v1971_v14 = vld [vmem:[%s2672_s14 + $0x110] sm:$0xf] }
 0x138   : > { %v2821_v25 = vpop.f32.mrf.mxu3 }
 0x13a   : > { %v1224_v24 = vpop.f32.mrf.mxu2  ;;  %v1049_v30 = vpop.f32.mrf.mxu0 }
 0x13b   : > { %v1225_v29 = vadd.f32 %v1224_v24, %v1136_v23  ;;  %v1138_v33 = vpop.f32.mrf.mxu1  ;;  %v1972_v24 = vor.u32 %v2155_v15, %v1971_v14 }
 0x13c   : > { %v1139_v35 = vadd.f32 %v1138_v33, %v1049_v30 }
 0x13d   : > { %v1303_v34 = vadd.f32 %v1225_v29, %v492_v26  ;;  %1088 = vmatmul.bf16.gmra.mxu0 %v1940_v27  ;;  %1286 = vmatmul.bf16.gmra.mxu3 %v1996_v28  ;;  %v1968_v26 = vor.u32 %v2153_v10, %v1965_v13 }
 0x13e   : > { %1177 = vmatmul.bf16.gmra.mxu1 %v1944_v31  ;;  %v497_v31 = vld [vmem:[#allocation2 + $0x30] sm:$0xff] }
 0x13f   : > { %1335 = vst [vmem:[#allocation2] sm:$0xff] %v1303_v34  ;;  %1266 = vmatmul.bf16.gmra.mxu2 %v1948_v32 }
 0x140   : > { %v2823_v36 = vpop.f32.mrf.mxu3 }
 0x142   : > { %v1227_v38 = vpop.f32.mrf.mxu2  ;;  %v1051_v40 = vpop.f32.mrf.mxu0 }
 0x143   : > { %v1228_v39 = vadd.f32 %v1227_v38, %v1139_v35  ;;  %v1140_v41 = vpop.f32.mrf.mxu1 }
 0x144   : > { %v1141_v51 = vadd.f32 %v1140_v41, %v1051_v40  ;;  %v498_v40 = vld [vmem:[#allocation2 + $0x48] sm:$0xff] }
 0x145   : > { %v1304_v42 = vadd.f32 %v1228_v39, %v493_v37 }
 0x147   : > { %1336 = vst [vmem:[#allocation2 + $0xd8] sm:$0xff] %v1304_v42 }
 0x148   : > { %v2833_v52 = vpop.f32.mrf.mxu3 }
 0x14a   : > { %v1229_v54 = vpop.f32.mrf.mxu2  ;;  %v1054_v58 = vpop.f32.mrf.mxu0 }
 0x14b   : > { %v1230_v57 = vadd.f32 %v1229_v54, %v1141_v51  ;;  %v1143_v61 = vpop.f32.mrf.mxu1 }
 0x14c   : > { %v1144_v63 = vadd.f32 %v1143_v61, %v1054_v58 }
 0x14d   : > { %v1305_v62 = vadd.f32 %v1230_v57, %v494_v53  ;;  %1093 = vmatmul.bf16.gmra.mxu0 %v1952_v55  ;;  %1291 = vmatmul.bf16.gmra.mxu3 %v2008_v56  ;;  %v500_v57 = vld [vmem:[#allocation2 + $0x88] sm:$0xff] }
 0x14e   : > { %1182 = vmatmul.bf16.gmra.mxu1 %v1956_v59 }
 0x14f   : > { %1337 = vst [vmem:[#allocation2 + $0x18] sm:$0xff] %v1305_v62  ;;  %1271 = vmatmul.bf16.gmra.mxu2 %v1960_v60 }
 0x150   : > { %v2835_v0 = vpop.f32.mrf.mxu3 }
 0x152   : > { %v1232_v2 = vpop.f32.mrf.mxu2  ;;  %v1056_v4 = vpop.f32.mrf.mxu0 }
 0x153   : > { %v1233_v3 = vadd.f32 %v1232_v2, %v1144_v63  ;;  %v1145_v5 = vpop.f32.mrf.mxu1  ;;  %v501_v2 = vld [vmem:[#allocation2 + $0xe8] sm:$0xff] }
 0x154   : > { %v1146_v16 = vadd.f32 %v1145_v5, %v1056_v4 }
 0x155   : > { %v1306_v6 = vadd.f32 %v1233_v3, %v495_v1 }
 0x157   : > { %1338 = vst [vmem:[#allocation2 + $0x50] sm:$0xff] %v1306_v6 }
 0x158   : > { %v2845_v17 = vpop.f32.mrf.mxu3 }
 0x15a   : > { %v1234_v19 = vpop.f32.mrf.mxu2  ;;  %v1059_v23 = vpop.f32.mrf.mxu0 }
 0x15b   : > { %v1235_v22 = vadd.f32 %v1234_v19, %v1146_v16  ;;  %v1148_v27 = vpop.f32.mrf.mxu1 }
 0x15c   : > { %v1149_v29 = vadd.f32 %v1148_v27, %v1059_v23 }
 0x15d   : > { %v1307_v28 = vadd.f32 %v1235_v22, %v496_v18  ;;  %1098 = vmatmul.bf16.gmra.mxu0 %v1964_v20  ;;  %1296 = vmatmul.bf16.gmra.mxu3 %v2020_v21  ;;  %v503_v20 = vld [vmem:[#allocation2 + $0x60] sm:$0xff] }
 0x15e   : > { %1187 = vmatmul.bf16.gmra.mxu1 %v1968_v26 }
 0x15f   : > { %1339 = vst [vmem:[#allocation2 + $0x68] sm:$0xff] %v1307_v28  ;;  %1276 = vmatmul.bf16.gmra.mxu2 %v1972_v24 }
 0x160   : > { %v2847_v30 = vpop.f32.mrf.mxu3 }
 0x162   : > { %v1237_v32 = vpop.f32.mrf.mxu2  ;;  %v1061_v34 = vpop.f32.mrf.mxu0 }
 0x163   : > { %v1238_v33 = vadd.f32 %v1237_v32, %v1149_v29  ;;  %v1150_v35 = vpop.f32.mrf.mxu1  ;;  %v504_v29 = vld [vmem:[#allocation2 + $0xf0] sm:$0xff] }
 0x164   : > { %v1151_v38 = vadd.f32 %v1150_v35, %v1061_v34 }
 0x165   : > { %v1308_v37 = vadd.f32 %v1238_v33, %v497_v31 }
 0x167   : > { %1340 = vst [vmem:[#allocation2 + $0x30] sm:$0xff] %v1308_v37 }
 0x168   : > { %v2849_v39 = vpop.f32.mrf.mxu3 }
 0x16a   : > { %v1239_v41 = vpop.f32.mrf.mxu2  ;;  %v1064_v43 = vpop.f32.mrf.mxu0 }
 0x16b   : > { %v1240_v42 = vadd.f32 %v1239_v41, %v1151_v38  ;;  %v1153_v44 = vpop.f32.mrf.mxu1 }
 0x16c   : > { %v1154_v46 = vadd.f32 %v1153_v44, %v1064_v43 }
 0x16d   : > { %v1309_v45 = vadd.f32 %v1240_v42, %v498_v40  ;;  %v505_v40 = vld [vmem:[#allocation2 + $0x8] sm:$0xff] }
 0x16f   : > { %1341 = vst [vmem:[#allocation2 + $0x48] sm:$0xff] %v1309_v45 }
 0x170   : > { %v2851_v47 = vpop.f32.mrf.mxu3 }
 0x172   : > { %v1242_v49 = vpop.f32.mrf.mxu2  ;;  %v1066_v51 = vpop.f32.mrf.mxu0 }
 0x173   : > { %v1243_v50 = vadd.f32 %v1242_v49, %v1154_v46  ;;  %v1155_v53 = vpop.f32.mrf.mxu1  ;;  %v506_v49 = vld [vmem:[#allocation2 + $0x78] sm:$0xff] }
 0x174   : > { %v1156_v55 = vadd.f32 %v1155_v53, %v1066_v51 }
 0x175   : > { %v1310_v54 = vadd.f32 %v1243_v50, %v499_v48 }
 0x177   : > { %1342 = vst [vmem:[#allocation2 + $0x80] sm:$0xff] %v1310_v54 }
 0x178   : > { %v2853_v56 = vpop.f32.mrf.mxu3 }
 0x17a   : > { %v1244_v58 = vpop.f32.mrf.mxu2  ;;  %v1069_v60 = vpop.f32.mrf.mxu0 }
 0x17b   : > { %v1245_v59 = vadd.f32 %v1244_v58, %v1156_v55  ;;  %v1158_v61 = vpop.f32.mrf.mxu1  ;;  %v1194_v58 = vadd.f32 %v2851_v47, %v2811_v8 }
 0x17c   : > { %v1159_v63 = vadd.f32 %v1158_v61, %v1069_v60  ;;  %v507_v61 = vld [vmem:[#allocation2 + $0x38] sm:$0xff] }
 0x17d   : > { %v1311_v62 = vadd.f32 %v1245_v59, %v500_v57  ;;  %v515_v59 = vld [vmem:[#allocation2 + $0xa8] sm:$0xff] }
 0x17f   : > { %1343 = vst [vmem:[#allocation2 + $0x88] sm:$0xff] %v1311_v62 }
 0x180   : > { %v2855_v1 = vpop.f32.mrf.mxu3 }
 0x182   : > { %v1247_v3 = vpop.f32.mrf.mxu2  ;;  %v1071_v5 = vpop.f32.mrf.mxu0 }
 0x183   : > { %v1248_v4 = vadd.f32 %v1247_v3, %v1159_v63  ;;  %v1160_v6 = vpop.f32.mrf.mxu1 }
 0x184   : > { %v1161_v9 = vadd.f32 %v1160_v6, %v1071_v5 }
 0x185   : > { %v1312_v7 = vadd.f32 %v1248_v4, %v501_v2 }
 0x187   : > { %1344 = vst [vmem:[#allocation2 + $0xe8] sm:$0xff] %v1312_v7  ;;  %v1196_v7 = vadd.f32 %v2853_v56, %v2821_v25  ;;  %v509_v25 = vld [vmem:[#allocation2 + $0x40] sm:$0xff] }
 0x188   : > { %v2857_v10 = vpop.f32.mrf.mxu3 }
 0x18a   : > { %v1249_v12 = vpop.f32.mrf.mxu2  ;;  %v1074_v14 = vpop.f32.mrf.mxu0 }
 0x18b   : > { %v1250_v13 = vadd.f32 %v1249_v12, %v1161_v9  ;;  %v1163_v15 = vpop.f32.mrf.mxu1 }
 0x18c   : > { %v1164_v18 = vadd.f32 %v1163_v15, %v1074_v14 }
 0x18d   : > { %v1313_v16 = vadd.f32 %v1250_v13, %v502_v11  ;;  %v516_v11 = vld [vmem:[#allocation2 + $0xd0] sm:$0xff]  ;;  %v508_v13 = vld [vmem:[#allocation2 + $0x58] sm:$0xff] }
 0x18f   : > { %1345 = vst [vmem:[#allocation2 + $0xb8] sm:$0xff] %v1313_v16 }
 0x190   : > { %v2859_v19 = vpop.f32.mrf.mxu3 }
 0x192   : > { %v1252_v21 = vpop.f32.mrf.mxu2  ;;  %v1076_v23 = vpop.f32.mrf.mxu0 }
 0x193   : > { %v1253_v22 = vadd.f32 %v1252_v21, %v1164_v18  ;;  %v1165_v26 = vpop.f32.mrf.mxu1 }
 0x194   : > { %v1166_v27 = vadd.f32 %v1165_v26, %v1076_v23  ;;  %v517_v23 = vld [vmem:[#allocation2 + $0x10] sm:$0xff] }
 0x195   : > { %v1314_v24 = vadd.f32 %v1253_v22, %v503_v20  ;;  %v1199_v22 = vadd.f32 %v2855_v1, %v2823_v36 }
 0x197   : > { %1346 = vst [vmem:[#allocation2 + $0x60] sm:$0xff] %v1314_v24 }
 0x198   : > { %v2861_v28 = vpop.f32.mrf.mxu3 }
 0x19a   : > { %v1254_v31 = vpop.f32.mrf.mxu2  ;;  %v1079_v33 = vpop.f32.mrf.mxu0 }
 0x19b   : > { %v1255_v32 = vadd.f32 %v1254_v31, %v1166_v27  ;;  %v1168_v34 = vpop.f32.mrf.mxu1 }
 0x19c   : > { %v1169_v37 = vadd.f32 %v1168_v34, %v1079_v33  ;;  %v1201_v34 = vadd.f32 %v2857_v10, %v2833_v52  ;;  %v511_v52 = vld [vmem:[#allocation2 + $0xe0] sm:$0xff] }
 0x19d   : > { %v1315_v35 = vadd.f32 %v1255_v32, %v504_v29 }
 0x19f   : > { %1347 = vst [vmem:[#allocation2 + $0xf0] sm:$0xff] %v1315_v35 }
 0x1a0   : > { %v2863_v38 = vpop.f32.mrf.mxu3 }
 0x1a2   : > { %v1257_v41 = vpop.f32.mrf.mxu2  ;;  %v1081_v43 = vpop.f32.mrf.mxu0 }
 0x1a3   : > { %v1258_v42 = vadd.f32 %v1257_v41, %v1169_v37  ;;  %v1170_v44 = vpop.f32.mrf.mxu1  ;;  %v518_v37 = vld [vmem:[#allocation2 + $0x28] sm:$0xff] }
 0x1a4   : > { %v1171_v46 = vadd.f32 %v1170_v44, %v1081_v43  ;;  %v510_v41 = vld [vmem:[#allocation2 + $0xc8] sm:$0xff] }
 0x1a5   : > { %v1316_v45 = vadd.f32 %v1258_v42, %v505_v40 }
 0x1a7   : > { %1348 = vst [vmem:[#allocation2 + $0x8] sm:$0xff] %v1316_v45 }
 0x1a8   : > { %v2865_v48 = vpop.f32.mrf.mxu3 }
 0x1aa   : > { %v1259_v50 = vpop.f32.mrf.mxu2  ;;  %v1084_v53 = vpop.f32.mrf.mxu0 }
 0x1ab   : > { %v1260_v51 = vadd.f32 %v1259_v50, %v1171_v46  ;;  %v1173_v54 = vpop.f32.mrf.mxu1  ;;  %v1204_v50 = vadd.f32 %v2859_v19, %v2835_v0 }
 0x1ac   : > { %v1174_v57 = vadd.f32 %v1173_v54, %v1084_v53 }
 0x1ad   : > { %v1317_v55 = vadd.f32 %v1260_v51, %v506_v49  ;;  %v519_v51 = vld [vmem:[#allocation2 + $0xa0] sm:$0xff] }
 0x1af   : > { %1349 = vst [vmem:[#allocation2 + $0x78] sm:$0xff] %v1317_v55 }
 0x1b0   : > { %v1282_v60 = vpop.f32.mrf.mxu3 }
 0x1b1   : > { %v1283_v63 = vadd.f32 %v1282_v60, %v1194_v58 }
 0x1b2   : > { %v1262_v62 = vpop.f32.mrf.mxu2  ;;  %v1086_v3 = vpop.f32.mrf.mxu0 }
 0x1b3   : > { %v1263_v2 = vadd.f32 %v1262_v62, %v1174_v57  ;;  %v1326_v4 = vadd.f32 %v1283_v63, %v515_v59  ;;  %v1175_v5 = vpop.f32.mrf.mxu1  ;;  %v520_v63 = vld [vmem:[#allocation2 + $0xf8] sm:$0xff] }
 0x1b4   : > { %v1176_v9 = vadd.f32 %v1175_v5, %v1086_v3  ;;  %v512_v3 = vld [vmem:[#allocation2 + $0x90] sm:$0xff] }
 0x1b5   : > { %v1318_v6 = vadd.f32 %v1263_v2, %v507_v61  ;;  %1358 = vst [vmem:[#allocation2 + $0xa8] sm:$0xff] %v1326_v4  ;;  %v1206_v61 = vadd.f32 %v2861_v28, %v2845_v17  ;;  %v513_v17 = vld [vmem:[#allocation2 + $0x70] sm:$0xff] }
 0x1b7   : > { %1350 = vst [vmem:[#allocation2 + $0x38] sm:$0xff] %v1318_v6 }
 0x1b8   : > { %v1284_v12 = vpop.f32.mrf.mxu3 }
 0x1b9   : > { %v1285_v47 = vadd.f32 %v1284_v12, %v1196_v7  ;;  %v1209_v12 = vadd.f32 %v2863_v38, %v2847_v30 }
 0x1ba   : > { %v1264_v8 = vpop.f32.mrf.mxu2  ;;  %v1089_v15 = vpop.f32.mrf.mxu0 }
 0x1bb   : > { %v1265_v14 = vadd.f32 %v1264_v8, %v1176_v9  ;;  %v1327_v16 = vadd.f32 %v1285_v47, %v516_v11  ;;  %v1178_v18 = vpop.f32.mrf.mxu1 }
 0x1bc   : > { %v1179_v21 = vadd.f32 %v1178_v18, %v1089_v15 }
 0x1bd   : > { %v1319_v20 = vadd.f32 %v1265_v14, %v508_v13  ;;  %1359 = vst [vmem:[#allocation2 + $0xd0] sm:$0xff] %v1327_v16  ;;  %v521_v13 = vld [vmem:[#allocation2 + $0x20] sm:$0xff] }
 0x1bf   : > { %1351 = vst [vmem:[#allocation2 + $0x58] sm:$0xff] %v1319_v20 }
 0x1c0   : > { %v1287_v26 = vpop.f32.mrf.mxu3 }
 0x1c1   : > { %v1288_v24 = vadd.f32 %v1287_v26, %v1199_v22 }
 0x1c2   : > { %v1267_v56 = vpop.f32.mrf.mxu2  ;;  %v1091_v29 = vpop.f32.mrf.mxu0 }
 0x1c3   : > { %v1268_v27 = vadd.f32 %v1267_v56, %v1179_v21  ;;  %v1328_v31 = vadd.f32 %v1288_v24, %v517_v23  ;;  %v1180_v32 = vpop.f32.mrf.mxu1  ;;  %v1211_v21 = vadd.f32 %v2865_v48, %v2849_v39  ;;  %v522_v23 = vld [vmem:[#allocation2 + $0x98] sm:$0xff] }
 0x1c4   : > { %v1181_v35 = vadd.f32 %v1180_v32, %v1091_v29 }
 0x1c5   : > { %v1320_v33 = vadd.f32 %v1268_v27, %v509_v25  ;;  %1360 = vst [vmem:[#allocation2 + $0x10] sm:$0xff] %v1328_v31  ;;  %v514_v25 = vld [vmem:[#allocation2 + $0xc0] sm:$0xff] }
 0x1c7   : > { %1352 = vst [vmem:[#allocation2 + $0x40] sm:$0xff] %v1320_v33 }
 0x1c8   : > { %v1289_v40 = vpop.f32.mrf.mxu3 }
 0x1c9   : > { %v1290_v1 = vadd.f32 %v1289_v40, %v1201_v34 }
 0x1ca   : > { %v1269_v36 = vpop.f32.mrf.mxu2  ;;  %v1094_v43 = vpop.f32.mrf.mxu0 }
 0x1cb   : > { %v1270_v42 = vadd.f32 %v1269_v36, %v1181_v35  ;;  %v1329_v44 = vadd.f32 %v1290_v1, %v518_v37  ;;  %v1183_v45 = vpop.f32.mrf.mxu1 }
 0x1cc   : > { %v1184_v49 = vadd.f32 %v1183_v45, %v1094_v43 }
 0x1cd   : > { %v1321_v46 = vadd.f32 %v1270_v42, %v510_v41  ;;  %1361 = vst [vmem:[#allocation2 + $0x28] sm:$0xff] %v1329_v44 }
 0x1cf   : > { %1353 = vst [vmem:[#allocation2 + $0xc8] sm:$0xff] %v1321_v46 }
 0x1d0   : > { %v1292_v53 = vpop.f32.mrf.mxu3 }
 0x1d1   : > { %v1293_v54 = vadd.f32 %v1292_v53, %v1204_v50 }
 0x1d2   : > { %v1272_v10 = vpop.f32.mrf.mxu2  ;;  %v1096_v57 = vpop.f32.mrf.mxu0 }
 0x1d3   : > { %v1273_v55 = vadd.f32 %v1272_v10, %v1184_v49  ;;  %v1330_v58 = vadd.f32 %v1293_v54, %v519_v51  ;;  %v1185_v59 = vpop.f32.mrf.mxu1 }
 0x1d4   : > { %v1186_v62 = vadd.f32 %v1185_v59, %v1096_v57 }
 0x1d5   : > { %v1322_v60 = vadd.f32 %v1273_v55, %v511_v52  ;;  %1362 = vst [vmem:[#allocation2 + $0xa0] sm:$0xff] %v1330_v58 }
 0x1d7   : > { %1354 = vst [vmem:[#allocation2 + $0xe0] sm:$0xff] %v1322_v60 }
 0x1d8   : > { %v1294_v2 = vpop.f32.mrf.mxu3 }
 0x1d9   : > { %v1295_v19 = vadd.f32 %v1294_v2, %v1206_v61 }
 0x1da   : > { %v1274_v0 = vpop.f32.mrf.mxu2  ;;  %v1099_v6 = vpop.f32.mrf.mxu0 }
 0x1db   : > { %v1275_v4 = vadd.f32 %v1274_v0, %v1186_v62  ;;  %v1331_v5 = vadd.f32 %v1295_v19, %v520_v63  ;;  %v1188_v7 = vpop.f32.mrf.mxu1 }
 0x1dc   : > { %v1189_v11 = vadd.f32 %v1188_v7, %v1099_v6 }
 0x1dd   : > { %v1323_v9 = vadd.f32 %v1275_v4, %v512_v3  ;;  %1363 = vst [vmem:[#allocation2 + $0xf8] sm:$0xff] %v1331_v5 }
 0x1df   : > { %1355 = vst [vmem:[#allocation2 + $0x90] sm:$0xff] %v1323_v9 }
 0x1e0   : > { %v1297_v8 = vpop.f32.mrf.mxu3 }
 0x1e1   : > { %v1298_v47 = vadd.f32 %v1297_v8, %v1209_v12 }
 0x1e2   : > { %v1277_v28 = vpop.f32.mrf.mxu2  ;;  %v1101_v18 = vpop.f32.mrf.mxu0 }
 0x1e3   : > { %v1278_v14 = vadd.f32 %v1277_v28, %v1189_v11  ;;  %v1332_v15 = vadd.f32 %v1298_v47, %v521_v13  ;;  %v1190_v20 = vpop.f32.mrf.mxu1 }
 0x1e4   : > { %v1191_v22 = vadd.f32 %v1190_v20, %v1101_v18 }
 0x1e5   : > { %v1324_v16 = vadd.f32 %v1278_v14, %v513_v17  ;;  %1364 = vst [vmem:[#allocation2 + $0x20] sm:$0xff] %v1332_v15 }
 0x1e7   : > { %1356 = vst [vmem:[#allocation2 + $0x70] sm:$0xff] %v1324_v16 }
 0x1e8   : > { %v1299_v26 = vpop.f32.mrf.mxu3 }
 0x1e9   : > { %v1300_v38 = vadd.f32 %v1299_v26, %v1211_v21 }
 0x1ea   : > { %v1279_v30 = vpop.f32.mrf.mxu2 }
 0x1eb   : > { %v1280_v56 = vadd.f32 %v1279_v30, %v1191_v22  ;;  %v1333_v24 = vadd.f32 %v1300_v38, %v522_v23  ;;  %1369 = sbr.rel (%p2117_p0) target bundleno = 574 (0x23e), region = 62 }
 0x1ed   : > { %v1325_v27 = vadd.f32 %v1280_v56, %v514_v25  ;;  %1365 = vst [vmem:[#allocation2 + $0x98] sm:$0xff] %v1333_v24 }
 0x1ef   : > { %1357 = vst [vmem:[#allocation2 + $0xc0] sm:$0xff] %v1325_v27 }
 0x1f0   : > { %v1370_v29 = vld [vmem:[#allocation2 + $0xb0] sm:$0xff]  ;;  %v1371_v31 = vld [vmem:[#allocation2] sm:$0xff]  ;;  %v1372_v32 = vld [vmem:[#allocation2 + $0xd8] sm:$0xff] }
 0x1f1   : > { %v2195_v33 = vpack.c.bf16 %v1371_v31, %v1370_v29  ;;  %v1466_v39 = vadd.f32 %v1371_v31, %v1370_v29  ;;  %v1504_v48 = vmul.f32 %v1370_v29, %v1370_v29  ;;  %v1505_v34 = vmul.f32 %v1371_v31, %v1371_v31  ;;  %v1373_v35 = vld [vmem:[#allocation2 + $0x18] sm:$0xff]  ;;  %v1374_v37 = vld [vmem:[#allocation2 + $0x50] sm:$0xff]  ;;  %v1375_v40 = vld [vmem:[#allocation2 + $0x68] sm:$0xff] }
 0x1f2   : > { %v2200_v41 = vpack.c.bf16 %v1373_v35, %v1372_v32  ;;  %v1506_v36 = vmul.f32 %v1372_v32, %v1372_v32  ;;  %v2205_v1 = vpack.c.bf16 %v1375_v40, %v1374_v37  ;;  %v1376_v42 = vld [vmem:[#allocation2 + $0x30] sm:$0xff]  ;;  %v1507_v45 = vmul.f32 %v1373_v35, %v1373_v35  ;;  %v1377_v46 = vld [vmem:[#allocation2 + $0x48] sm:$0xff]  ;;  %v1378_v49 = vld [vmem:[#allocation2 + $0x80] sm:$0xff] }
 0x1f3   : > { %2196 = vst [vmem:[%s2659_s8] sm:$0xff] %v2195_v33   ;;  %v1536_v43 = vadd.f32 %v1505_v34, %v1504_v48  ;;  %v1467_v44 = vadd.f32 %v1466_v39, %v1372_v32  ;;  %v1379_v50 = vld [vmem:[#allocation2 + $0x88] sm:$0xff]  ;;  %v2210_v51 = vpack.c.bf16 %v1377_v46, %v1376_v42  ;;  %v1508_v55 = vmul.f32 %v1374_v37, %v1374_v37  ;;  %v1381_v57 = vld [vmem:[#allocation2 + $0xb8] sm:$0xff]  ;;  %v1382_v58 = vld [vmem:[#allocation2 + $0x60] sm:$0xff] }
 0x1f4   : > { %2272 = vst [vmem:[%s2659_s8 + $0x8] sm:$0xff] %v2200_v41   ;;  %v2215_v53 = vpack.c.bf16 %v1379_v50, %v1378_v49  ;;  %v1380_v52 = vld [vmem:[#allocation2 + $0xe8] sm:$0xff]  ;;  %v2887_v59 = vld [vmem:[#allocation2 + $0xf0] sm:$0xff]  ;;  %v1509_v3 = vmul.f32 %v1375_v40, %v1375_v40  ;;  %v2894_v0 = vld [vmem:[#allocation2 + $0x78] sm:$0xff]  ;;  %v1510_v12 = vmul.f32 %v1376_v42, %v1376_v42  ;;  %v1511_v16 = vmul.f32 %v1377_v46, %v1377_v46 }
 0x1f5   : > { %v1468_v10 = vadd.f32 %v1467_v44, %v1373_v35  ;;  %v1537_v54 = vadd.f32 %v1536_v43, %v1506_v36  ;;  %2273 = vst [vmem:[%s2659_s8 + $0x10] sm:$0xff] %v2205_v1   ;;  %v2220_v60 = vpack.c.bf16 %v1381_v57, %v1380_v52  ;;  %v2225_v61 = vpack.c.bf16 %v2887_v59, %v1382_v58  ;;  %v2891_v62 = vld [vmem:[#allocation2 + $0x8] sm:$0xff]  ;;  %v2896_v19 = vld [vmem:[#allocation2 + $0x38] sm:$0xff]  ;;  %v2905_v7 = vld [vmem:[#allocation2 + $0x40] sm:$0xff] }
 0x1f6   : > { %2274 = vst [vmem:[%s2659_s8 + $0x18] sm:$0xff] %v2210_v51   ;;  %v2898_v4 = vld [vmem:[#allocation2 + $0x58] sm:$0xff]  ;;  %v2230_v5 = vpack.c.bf16 %v2894_v0, %v2891_v62  ;;  %v2908_v13 = vld [vmem:[#allocation2 + $0xc8] sm:$0xff]  ;;  %v2910_v8 = vld [vmem:[#allocation2 + $0xe0] sm:$0xff]  ;;  %v1512_v26 = vmul.f32 %v1378_v49, %v1378_v49  ;;  %v1513_v38 = vmul.f32 %v1379_v50, %v1379_v50  ;;  %v1514_v32 = vmul.f32 %v1380_v52, %v1380_v52 }
 0x1f7   : > { %v1538_v63 = vadd.f32 %v1537_v54, %v1507_v45  ;;  %v1469_v2 = vadd.f32 %v1468_v10, %v1374_v37  ;;  %2275 = vst [vmem:[%s2659_s8 + $0x20] sm:$0xff] %v2215_v53   ;;  %v2235_v6 = vpack.c.bf16 %v2898_v4, %v2896_v19  ;;  %v2912_v17 = vld [vmem:[#allocation2 + $0x90] sm:$0xff]  ;;  %v2240_v28 = vpack.c.bf16 %v2908_v13, %v2905_v7  ;;  %v2922_v20 = vld [vmem:[#allocation2 + $0xc0] sm:$0xff]  ;;  %v1394_v56 = vld [vmem:[#allocation2 + $0xa8] sm:$0xff] }
 0x1f8   : > { %2276 = vst [vmem:[%s2659_s8 + $0x28] sm:$0xff] %v2220_v60   ;;  %v2245_v47 = vpack.c.bf16 %v2912_v17, %v2910_v8  ;;  %v2920_v18 = vld [vmem:[#allocation2 + $0x70] sm:$0xff]  ;;  %v1515_v48 = vmul.f32 %v1381_v57, %v1381_v57  ;;  %v1397_v35 = vld [vmem:[#allocation2 + $0x28] sm:$0xff]  ;;  %v1516_v36 = vmul.f32 %v1382_v58, %v1382_v58  ;;  %v1517_v43 = vmul.f32 %v2887_v59, %v2887_v59  ;;  %v1398_v44 = vld [vmem:[#allocation2 + $0xa0] sm:$0xff] }
 0x1f9   : > { %v1470_v9 = vadd.f32 %v1469_v2, %v1375_v40  ;;  %v1539_v11 = vadd.f32 %v1538_v63, %v1508_v55  ;;  %2277 = vst [vmem:[%s2659_s8 + $0x30] sm:$0xff] %v2225_v61   ;;  %v2250_v21 = vpack.c.bf16 %v2922_v20, %v2920_v18  ;;  %v2929_v24 = vld [vmem:[#allocation2 + $0xd0] sm:$0xff]  ;;  %v1399_v45 = vld [vmem:[#allocation2 + $0xf8] sm:$0xff]  ;;  %v1518_v51 = vmul.f32 %v2891_v62, %v2891_v62  ;;  %v1400_v54 = vld [vmem:[#allocation2 + $0x20] sm:$0xff] }
 0x1fa   : > { %2278 = vst [vmem:[%s2659_s8 + $0x38] sm:$0xff] %v2230_v5   ;;  %v2255_v27 = vpack.c.bf16 %v2929_v24, %v1394_v56  ;;  %v1396_v34 = vld [vmem:[#allocation2 + $0x10] sm:$0xff]  ;;  %v1519_v10 = vmul.f32 %v2894_v0, %v2894_v0  ;;  %v1401_v55 = vld [vmem:[#allocation2 + $0x98] sm:$0xff]  ;;  %v1521_v2 = vmul.f32 %v2898_v4, %v2898_v4  ;;  %v1522_v5 = vmul.f32 %v2905_v7, %v2905_v7 }
 0x1fb   : > { %v1540_v14 = vadd.f32 %v1539_v11, %v1509_v3  ;;  %v1471_v15 = vadd.f32 %v1470_v9, %v1376_v42  ;;  %2279 = vst [vmem:[%s2659_s8 + $0x40] sm:$0xff] %v2235_v6   ;;  %v2260_v37 = vpack.c.bf16 %v1397_v35, %v1396_v34  ;;  %v1523_v9 = vmul.f32 %v2908_v13, %v2908_v13 }
 0x1fc   : > { %2280 = vst [vmem:[%s2659_s8 + $0x48] sm:$0xff] %v2240_v28  }
 0x1fd   : > { %v1472_v22 = vadd.f32 %v1471_v15, %v1377_v46  ;;  %v1541_v23 = vadd.f32 %v1540_v14, %v1510_v12  ;;  %2281 = vst [vmem:[%s2659_s8 + $0x50] sm:$0xff] %v2245_v47   ;;  %v2265_v46 = vpack.c.bf16 %v1399_v45, %v1398_v44 }
 0x1fe   : > { %2282 = vst [vmem:[%s2659_s8 + $0x58] sm:$0xff] %v2250_v21  }
 0x1ff   : > { %v1542_v25 = vadd.f32 %v1541_v23, %v1511_v16  ;;  %v1473_v30 = vadd.f32 %v1472_v22, %v1378_v49  ;;  %2283 = vst [vmem:[%s2659_s8 + $0x60] sm:$0xff] %v2255_v27   ;;  %v1530_v27 = vmul.f32 %v1396_v34, %v1396_v34 }
 0x200   : > { %2284 = vst [vmem:[%s2659_s8 + $0x68] sm:$0xff] %v2260_v37  }
 0x201   : > { %v1474_v29 = vadd.f32 %v1473_v30, %v1379_v50  ;;  %v1543_v31 = vadd.f32 %v1542_v25, %v1512_v26  ;;  %2285 = vst [vmem:[%s2659_s8 + $0x70] sm:$0xff] %v2265_v46   ;;  %v1528_v26 = vmul.f32 %v1394_v56, %v1394_v56  ;;  %v1529_v30 = vmul.f32 %v2929_v24, %v2929_v24 }
 0x203   : > { %v1544_v33 = vadd.f32 %v1543_v31, %v1513_v38  ;;  %v1475_v39 = vadd.f32 %v1474_v29, %v1380_v52 }
 0x205   : > { %v1476_v40 = vadd.f32 %v1475_v39, %v1381_v57  ;;  %v1545_v41 = vadd.f32 %v1544_v33, %v1514_v32  ;;  %v2270_v57 = vpack.c.bf16 %v1401_v55, %v1400_v54  ;;  %v1531_v32 = vmul.f32 %v1397_v35, %v1397_v35 }
 0x206   : > { %v1532_v39 = vmul.f32 %v1398_v44, %v1398_v44 }
 0x207   : > { %v1546_v1 = vadd.f32 %v1545_v41, %v1515_v48  ;;  %v1477_v42 = vadd.f32 %v1476_v40, %v1382_v58  ;;  %2286 = vst [vmem:[%s2659_s8 + $0x78] sm:$0xff] %v2270_v57  }
 0x209   : > { %v1478_v49 = vadd.f32 %v1477_v42, %v2887_v59  ;;  %v1547_v50 = vadd.f32 %v1546_v1, %v1516_v36  ;;  %v1520_v59 = vmul.f32 %v2896_v19, %v2896_v19  ;;  %v1534_v36 = vmul.f32 %v1400_v54, %v1400_v54 }
 0x20a   : > { %v1535_v42 = vmul.f32 %v1401_v55, %v1401_v55 }
 0x20b   : > { %v1548_v53 = vadd.f32 %v1547_v50, %v1517_v43  ;;  %v1479_v52 = vadd.f32 %v1478_v49, %v2891_v62 }
 0x20d   : > { %v1480_v58 = vadd.f32 %v1479_v52, %v2894_v0  ;;  %v1549_v60 = vadd.f32 %v1548_v53, %v1518_v51 }
 0x20f   : > { %v1550_v61 = vadd.f32 %v1549_v60, %v1519_v10  ;;  %v1481_v63 = vadd.f32 %v1480_v58, %v2896_v19  ;;  %v1524_v19 = vmul.f32 %v2910_v8, %v2910_v8 }
 0x211   : > { %v1482_v62 = vadd.f32 %v1481_v63, %v2898_v4  ;;  %v1551_v3 = vadd.f32 %v1550_v61, %v1520_v59  ;;  %v1525_v4 = vmul.f32 %v2912_v17, %v2912_v17 }
 0x213   : > { %v1552_v6 = vadd.f32 %v1551_v3, %v1521_v2  ;;  %v1483_v0 = vadd.f32 %v1482_v62, %v2905_v7  ;;  %v1526_v7 = vmul.f32 %v2920_v18, %v2920_v18 }
 0x215   : > { %v1484_v11 = vadd.f32 %v1483_v0, %v2908_v13  ;;  %v1553_v12 = vadd.f32 %v1552_v6, %v1522_v5  ;;  %v1527_v13 = vmul.f32 %v2922_v20, %v2922_v20 }
 0x217   : > { %v1554_v28 = vadd.f32 %v1553_v12, %v1523_v9  ;;  %v1485_v47 = vadd.f32 %v1484_v11, %v2910_v8 }
 0x219   : > { %v1486_v14 = vadd.f32 %v1485_v47, %v2912_v17  ;;  %v1555_v15 = vadd.f32 %v1554_v28, %v1524_v19 }
 0x21b   : > { %v1556_v16 = vadd.f32 %v1555_v15, %v1525_v4  ;;  %v1487_v21 = vadd.f32 %v1486_v14, %v2920_v18 }
 0x21d   : > { %v1488_v22 = vadd.f32 %v1487_v21, %v2922_v20  ;;  %v1557_v23 = vadd.f32 %v1556_v16, %v1526_v7  ;;  %v1533_v20 = vmul.f32 %v1399_v45, %v1399_v45 }
 0x21f   : > { %v1558_v8 = vadd.f32 %v1557_v23, %v1527_v13  ;;  %v1489_v25 = vadd.f32 %v1488_v22, %v1394_v56 }
 0x221   : > { %v1490_v17 = vadd.f32 %v1489_v25, %v2929_v24  ;;  %v1559_v38 = vadd.f32 %v1558_v8, %v1528_v26 }
 0x223   : > { %v1560_v29 = vadd.f32 %v1559_v38, %v1529_v30  ;;  %v1491_v31 = vadd.f32 %v1490_v17, %v1396_v34 }
 0x225   : > { %v1492_v18 = vadd.f32 %v1491_v31, %v1397_v35  ;;  %v1561_v33 = vadd.f32 %v1560_v29, %v1530_v27 }
 0x227   : > { %v1562_v48 = vadd.f32 %v1561_v33, %v1531_v32  ;;  %v1493_v37 = vadd.f32 %v1492_v18, %v1398_v44 }
 0x229   : > { %v1494_v40 = vadd.f32 %v1493_v37, %v1399_v45  ;;  %v1563_v41 = vadd.f32 %v1562_v48, %v1532_v39 }
 0x22b   : > { %v1564_v56 = vadd.f32 %v1563_v41, %v1533_v20  ;;  %v1495_v1 = vadd.f32 %v1494_v40, %v1400_v54 }
 0x22d   : > { %v1496_v43 = vadd.f32 %v1495_v1, %v1401_v55  ;;  %v1565_v24 = vadd.f32 %v1564_v56, %v1534_v36 }
 0x22f   : > { %v1497_v46 = vrot.slane %v1496_v43, 4  ;;  %v1566_v49 = vadd.f32 %v1565_v24, %v1535_v42 }
 0x231   : > { %v1498_v34 = vadd.f32 %v1497_v46, %v1496_v43  ;;  %v1567_v50 = vrot.slane %v1566_v49, 4 }
 0x233   : > { %v1499_v35 = vrot.slane %v1498_v34, 2  ;;  %v1568_v51 = vadd.f32 %v1567_v50, %v1566_v49 }
 0x235   : > { %v1500_v53 = vadd.f32 %v1499_v35, %v1498_v34  ;;  %v1569_v52 = vrot.slane %v1568_v51, 2 }
 0x237   : > { %v1501_v44 = vrot.slane %v1500_v53, 1  ;;  %v1570_v10 = vadd.f32 %v1569_v52, %v1568_v51 }
 0x239   : > { %v1502_v45 = vadd.f32 %v1501_v44, %v1500_v53  ;;  %v1571_v57 = vrot.slane %v1570_v10, 1 }
 0x23b   : > { %1503 = vst [vmem:[%s448_s10] sm:$0x1] %v1502_v45  ;;  %v1572_v54 = vadd.f32 %v1571_v57, %v1570_v10 }
 0x23d   : > { %1573 = vst [vmem:[%s454_s13] sm:$0x1] %v1572_v54 }
 0x23e PF: > { %s15_s21 = sadd.s32 1, %s2425_s21   ;;  %s3008_s15 = smov %s2405_s16 }
 0x23f   : > { %p12_p1 = scmp.ge.s32.totalorder %s15_s21, 8   ;;  %s3009_s16 = smov %s2504_s28 }
 0x240   : > { %s3010_s17 = smov %s2417_s19  ;;  %s3011_s18 = smov %s2421_s20 }
 0x241   : > { %s3012_s19 = smov %s3015_s22  ;;  %s3013_s20 = smov %s3019_s23 }
 0x242   :  { %14 = sbr.rel (!%p12_p1) target bundleno = 4 (0x4), region = 130 }

// kernel: bottleneck_forward.10
= control target key start
LH: loop header
LB: loop body
LE: loop exit
PB: predicated region body
PF: predicated region fallthrough
CT: control target
= control target key end

     0   :  { %s1418_s15 = smov 0   ;;  %s1420_s16 = smov 0   ;;  %s1643_s0 = inlined_call_operand.vmem [shape: bf16[512,128], index: 0, kind: input, shape index: {}]   ;;  %s1644_s1 = inlined_call_operand.vmem [shape: bf16[128,128], index: 1, kind: input, shape index: {}]   ;;  %s1645_s2 = inlined_call_operand.vmem [shape: bf16[512,128], index: 2, kind: output, shape index: {0}]   ;;  %s1646_s3 = inlined_call_operand.vmem [shape: f32[2,1,128], index: 3, kind: output, shape index: {1}]   ;;  %s1647_s4 = inlined_call_operand.vmem [shape: f32[2,1,128], index: 4, kind: output, shape index: {2}]  }
   0x1   :  { %s1422_s17 = smov 0  }
   0x2 LB: > { %s34_s18 = sadd.s32 1, %s1387_s16  ;;  %p1099_p0 = scmp.ge.s32.totalorder %s1391_s17, 1  ;;  %s1391_s17 = sphi %s1422_s17, %s15_s17   ;;  %s1387_s16 = sphi %s1420_s16, %s1649_s16   ;;  %s1383_s15 = sphi %s1418_s15, %s1648_s15  }
   0x3   : > { %p36_p1 = scmp.ge.s32.totalorder %s34_s18, 2  ;;  %p214_p2 = scmp.lt.s32.totalorder %s1391_s17, 3 }
   0x5   : > { %s1651_s18 = smov (%p36_p1, %s34_s18), 0  ;;  %p215_p3 = pnand %p1099_p0, %p214_p2 }
   0x6   : > { %s1100_s27 = sshll.u32 (!%p215_p3), %s1383_s15, 5  ;;  %p293_p5 = scmp.lt.s32.totalorder (!%p215_p3), %s1383_s15, 1 }
   0x7   : > { %218 = sbr.rel (%p215_p3) target bundleno = 291 (0x123), region = 28  ;;  %p267_p4 = scmp.lt.s32.totalorder (!%p215_p3), %s1100_s27, 63 }
   0xc   : > { %v1225_v0 = vld [vmem:[%s1644_s1 + $0x38] sm:$0xff]  ;;  %v1224_v1 = vld [vmem:[%s1644_s1 + $0x30] sm:$0xff]  ;;  %v1223_v2 = vld [vmem:[%s1644_s1 + $0x28] sm:$0xff]  ;;  %s1653_s27 = smov (!%p267_p4, %s1100_s27), 63  ;;  %s1655_s15 = smov (!%p293_p5, %s1383_s15), 1 }
   0xd   : > { %565 = vmatpush.bf16.msra.mxu0 %v1225_v0  ;;  %1321 = vmatpush.bf16.msra.mxu1 %v1225_v0  ;;  %v1222_v3 = vld [vmem:[%s1644_s1 + $0x20] sm:$0xff]  ;;  %v1221_v4 = vld [vmem:[%s1644_s1 + $0x18] sm:$0xff]  ;;  %v1220_v5 = vld [vmem:[%s1644_s1 + $0x10] sm:$0xff]  ;;  %s1101_s8 = sshll.u32 %s1653_s27, 2  ;;  %s298_s23 = scalar_lea.vmem %s1646_s3, %s1655_s15 }
   0xe   : > { %1322 = vmatpush.bf16.msra.mxu2 %v1225_v0  ;;  %1323 = vmatpush.bf16.msra.mxu3 %v1225_v0  ;;  %v1219_v6 = vld [vmem:[%s1644_s1 + $0x8] sm:$0xff]  ;;  %v1218_v7 = vld [vmem:[%s1644_s1] sm:$0xff]  ;;  %s1471_s13 = scalar_lea.vmem %s1643_s0, %s1101_s8  ;;  %s1498_s20 = scalar_lea.vmem %s1645_s2, %s1101_s8 }
   0xf   : > { %v1202_v8 = vld [vmem:[%s1471_s13] sm:$0xff]  ;;  %v1203_v12 = vld [vmem:[%s1471_s13 + $0x8] sm:$0xff]  ;;  %v1204_v16 = vld [vmem:[%s1471_s13 + $0x10] sm:$0xff]  ;;  %s304_s26 = scalar_lea.vmem %s1647_s4, %s1655_s15 }
  0x10   : > { %v1206_v9 = vld [vmem:[%s1471_s13 + $0x20] sm:$0xff]  ;;  %v1207_v13 = vld [vmem:[%s1471_s13 + $0x28] sm:$0xff]  ;;  %v1208_v17 = vld [vmem:[%s1471_s13 + $0x30] sm:$0xff] }
  0x11   : > { %566 = vmatpush.bf16.msra.mxu0 %v1224_v1  ;;  %1324 = vmatpush.bf16.msra.mxu1 %v1224_v1  ;;  %v1210_v10 = vld [vmem:[%s1471_s13 + $0x40] sm:$0xff]  ;;  %v1211_v14 = vld [vmem:[%s1471_s13 + $0x48] sm:$0xff]  ;;  %v1212_v18 = vld [vmem:[%s1471_s13 + $0x50] sm:$0xff] }
  0x12   : > { %1325 = vmatpush.bf16.msra.mxu2 %v1224_v1  ;;  %1326 = vmatpush.bf16.msra.mxu3 %v1224_v1  ;;  %v1214_v11 = vld [vmem:[%s1471_s13 + $0x60] sm:$0xff]  ;;  %v1215_v15 = vld [vmem:[%s1471_s13 + $0x68] sm:$0xff]  ;;  %v1216_v19 = vld [vmem:[%s1471_s13 + $0x70] sm:$0xff] }
  0x13   : > { %v1205_v20 = vld [vmem:[%s1471_s13 + $0x18] sm:$0xff] }
  0x14   : > { %v1209_v21 = vld [vmem:[%s1471_s13 + $0x38] sm:$0xff] }
  0x15   : > { %567 = vmatpush.bf16.msra.mxu0 %v1223_v2  ;;  %1327 = vmatpush.bf16.msra.mxu1 %v1223_v2  ;;  %v1213_v22 = vld [vmem:[%s1471_s13 + $0x58] sm:$0xff] }
  0x16   : > { %1328 = vmatpush.bf16.msra.mxu2 %v1223_v2  ;;  %1329 = vmatpush.bf16.msra.mxu3 %v1223_v2  ;;  %v1217_v23 = vld [vmem:[%s1471_s13 + $0x78] sm:$0xff] }
  0x19   : > { %568 = vmatpush.bf16.msra.mxu0 %v1222_v3  ;;  %1330 = vmatpush.bf16.msra.mxu1 %v1222_v3 }
  0x1a   : > { %1331 = vmatpush.bf16.msra.mxu2 %v1222_v3  ;;  %1332 = vmatpush.bf16.msra.mxu3 %v1222_v3 }
  0x1d   : > { %569 = vmatpush.bf16.msra.mxu0 %v1221_v4  ;;  %1333 = vmatpush.bf16.msra.mxu1 %v1221_v4 }
  0x1e   : > { %1334 = vmatpush.bf16.msra.mxu2 %v1221_v4  ;;  %1335 = vmatpush.bf16.msra.mxu3 %v1221_v4 }
  0x21   : > { %570 = vmatpush.bf16.msra.mxu0 %v1220_v5  ;;  %1336 = vmatpush.bf16.msra.mxu1 %v1220_v5 }
  0x22   : > { %1337 = vmatpush.bf16.msra.mxu2 %v1220_v5  ;;  %1338 = vmatpush.bf16.msra.mxu3 %v1220_v5 }
  0x25   : > { %571 = vmatpush.bf16.msra.mxu0 %v1219_v6  ;;  %1339 = vmatpush.bf16.msra.mxu1 %v1219_v6 }
  0x26   : > { %1340 = vmatpush.bf16.msra.mxu2 %v1219_v6  ;;  %1341 = vmatpush.bf16.msra.mxu3 %v1219_v6 }
  0x29   : > { %572 = vmatpush.bf16.msra.mxu0 %v1218_v7  ;;  %1342 = vmatpush.bf16.msra.mxu1 %v1218_v7 }
  0x2a   : > { %1343 = vmatpush.bf16.msra.mxu2 %v1218_v7  ;;  %1344 = vmatpush.bf16.msra.mxu3 %v1218_v7 }
  0x2c   : > { %573 = vmatmul.bf16.vlgmr.msra.gmra.mxu0 %v1202_v8  ;;  %593 = vmatmul.bf16.vlgmr.msra.gmra.mxu1 %v1206_v9 }
  0x2d   : > { %613 = vmatmul.bf16.vlgmr.msra.gmra.mxu2 %v1210_v10  ;;  %633 = vmatmul.bf16.vlgmr.msra.gmra.mxu3 %v1214_v11 }
  0x3c   : > { %578 = vmatmul.bf16.gmra.mxu0 %v1203_v12  ;;  %598 = vmatmul.bf16.gmra.mxu1 %v1207_v13 }
  0x3d   : > { %618 = vmatmul.bf16.gmra.mxu2 %v1211_v14  ;;  %638 = vmatmul.bf16.gmra.mxu3 %v1215_v15 }
  0x4c   : > { %583 = vmatmul.bf16.gmra.mxu0 %v1204_v16  ;;  %603 = vmatmul.bf16.gmra.mxu1 %v1208_v17 }
  0x4d   : > { %623 = vmatmul.bf16.gmra.mxu2 %v1212_v18  ;;  %643 = vmatmul.bf16.gmra.mxu3 %v1216_v19 }
  0x5c   : > { %588 = vmatmul.bf16.gmra.mxu0 %v1205_v20  ;;  %608 = vmatmul.bf16.gmra.mxu1 %v1209_v21 }
  0x5d   : > { %628 = vmatmul.bf16.gmra.mxu2 %v1213_v22  ;;  %648 = vmatmul.bf16.gmra.mxu3 %v1217_v23 }
  0xa9   : > { %v574_v24 = vpop.f32.mrf.mxu0  ;;  %v1489_v25 = vpop.f32.mrf.mxu1 }
  0xaa   : > { %v855_v57 = vmul.f32 %v574_v24, %v574_v24 }
  0xb0   : > { %v1491_v26 = vpop.f32.mrf.mxu2  ;;  %v1504_v31 = vpop.f32.mrf.mxu3 }
  0xb1   : > { %v576_v27 = vpop.f32.mrf.mxu0  ;;  %v1500_v28 = vpop.f32.mrf.mxu1 }
  0xb2   : > { %v1229_v29 = vpack.c.bf16 %v576_v27, %v574_v24  ;;  %v1249_v30 = vpack.c.bf16 %v1500_v28, %v1489_v25  ;;  %v856_v56 = vmul.f32 %v576_v27, %v576_v27  ;;  %v817_v59 = vadd.f32 %v576_v27, %v574_v24 }
  0xb3   : > { %v863_v27 = vmul.f32 %v1489_v25, %v1489_v25 }
  0xb4   : > { %1230 = vst [vmem:[%s1498_s20] sm:$0xff] %v1229_v29   ;;  %v887_v60 = vadd.f32 %v856_v56, %v855_v57 }
  0xb5   : > { %1309 = vst [vmem:[%s1498_s20 + $0x20] sm:$0xff] %v1249_v30  }
  0xb8   : > { %v1508_v32 = vpop.f32.mrf.mxu2  ;;  %v1514_v36 = vpop.f32.mrf.mxu3 }
  0xb9   : > { %v579_v33 = vpop.f32.mrf.mxu0  ;;  %v1510_v34 = vpop.f32.mrf.mxu1  ;;  %v1269_v35 = vpack.c.bf16 %v1508_v32, %v1491_v26  ;;  %v1289_v37 = vpack.c.bf16 %v1514_v36, %v1504_v31 }
  0xba   : > { %v857_v58 = vmul.f32 %v579_v33, %v579_v33  ;;  %v818_v62 = vadd.f32 %v817_v59, %v579_v33 }
  0xbb   : > { %1313 = vst [vmem:[%s1498_s20 + $0x40] sm:$0xff] %v1269_v35  }
  0xbc   : > { %1317 = vst [vmem:[%s1498_s20 + $0x60] sm:$0xff] %v1289_v37   ;;  %v888_v0 = vadd.f32 %v887_v60, %v857_v58 }
  0xc0   : > { %v1520_v38 = vpop.f32.mrf.mxu2  ;;  %v1526_v43 = vpop.f32.mrf.mxu3 }
  0xc1   : > { %v581_v39 = vpop.f32.mrf.mxu0  ;;  %v1522_v40 = vpop.f32.mrf.mxu1 }
  0xc2   : > { %v1234_v41 = vpack.c.bf16 %v581_v39, %v579_v33  ;;  %v1254_v42 = vpack.c.bf16 %v1522_v40, %v1510_v34  ;;  %v858_v61 = vmul.f32 %v581_v39, %v581_v39  ;;  %v819_v5 = vadd.f32 %v818_v62, %v581_v39 }
  0xc3   : > { %v864_v33 = vmul.f32 %v1500_v28, %v1500_v28  ;;  %v865_v39 = vmul.f32 %v1510_v34, %v1510_v34 }
  0xc4   : > { %1306 = vst [vmem:[%s1498_s20 + $0x8] sm:$0xff] %v1234_v41   ;;  %v889_v7 = vadd.f32 %v888_v0, %v858_v61 }
  0xc5   : > { %1310 = vst [vmem:[%s1498_s20 + $0x28] sm:$0xff] %v1254_v42  }
  0xc8   : > { %v1530_v44 = vpop.f32.mrf.mxu2  ;;  %v1536_v48 = vpop.f32.mrf.mxu3 }
  0xc9   : > { %v584_v45 = vpop.f32.mrf.mxu0  ;;  %v1532_v46 = vpop.f32.mrf.mxu1  ;;  %v1274_v47 = vpack.c.bf16 %v1530_v44, %v1520_v38  ;;  %v1294_v49 = vpack.c.bf16 %v1536_v48, %v1526_v43 }
  0xca   : > { %v859_v1 = vmul.f32 %v584_v45, %v584_v45  ;;  %v820_v10 = vadd.f32 %v819_v5, %v584_v45  ;;  %v872_v5 = vmul.f32 %v1508_v32, %v1508_v32 }
  0xcb   : > { %1314 = vst [vmem:[%s1498_s20 + $0x48] sm:$0xff] %v1274_v47  }
  0xcc   : > { %1318 = vst [vmem:[%s1498_s20 + $0x68] sm:$0xff] %v1294_v49   ;;  %v890_v11 = vadd.f32 %v889_v7, %v859_v1 }
  0xd0   : > { %v1542_v50 = vpop.f32.mrf.mxu2  ;;  %v1548_v55 = vpop.f32.mrf.mxu3 }
  0xd1   : > { %v586_v51 = vpop.f32.mrf.mxu0  ;;  %v1544_v52 = vpop.f32.mrf.mxu1 }
  0xd2   : > { %v1239_v53 = vpack.c.bf16 %v586_v51, %v584_v45  ;;  %v1259_v54 = vpack.c.bf16 %v1544_v52, %v1532_v46  ;;  %v860_v8 = vmul.f32 %v586_v51, %v586_v51  ;;  %v821_v13 = vadd.f32 %v820_v10, %v586_v51 }
  0xd3   : > { %v874_v10 = vmul.f32 %v1530_v44, %v1530_v44 }
  0xd4   : > { %1307 = vst [vmem:[%s1498_s20 + $0x10] sm:$0xff] %v1239_v53   ;;  %v891_v14 = vadd.f32 %v890_v11, %v860_v8 }
  0xd5   : > { %1311 = vst [vmem:[%s1498_s20 + $0x30] sm:$0xff] %v1259_v54   ;;  %v867_v54 = vmul.f32 %v1532_v46, %v1532_v46 }
  0xd8   : > { %v1552_v63 = vpop.f32.mrf.mxu2  ;;  %v1556_v6 = vpop.f32.mrf.mxu3 }
  0xd9   : > { %v589_v2 = vpop.f32.mrf.mxu0  ;;  %v609_v3 = vpop.f32.mrf.mxu1  ;;  %v1279_v4 = vpack.c.bf16 %v1552_v63, %v1542_v50  ;;  %v1299_v9 = vpack.c.bf16 %v1556_v6, %v1548_v55 }
  0xda   : > { %v861_v12 = vmul.f32 %v589_v2, %v589_v2  ;;  %v822_v15 = vadd.f32 %v821_v13, %v589_v2  ;;  %v869_v61 = vmul.f32 %v609_v3, %v609_v3 }
  0xdb   : > { %1315 = vst [vmem:[%s1498_s20 + $0x50] sm:$0xff] %v1279_v4  }
  0xdc   : > { %1319 = vst [vmem:[%s1498_s20 + $0x70] sm:$0xff] %v1299_v9   ;;  %v892_v17 = vadd.f32 %v891_v14, %v861_v12 }
  0xe0   : > { %v629_v16 = vpop.f32.mrf.mxu2  ;;  %v1562_v24 = vpop.f32.mrf.mxu3 }
  0xe1   : > { %v591_v18 = vpop.f32.mrf.mxu0  ;;  %v611_v19 = vpop.f32.mrf.mxu1 }
  0xe2   : > { %v1244_v20 = vpack.c.bf16 %v591_v18, %v589_v2  ;;  %v823_v21 = vadd.f32 %v822_v15, %v591_v18  ;;  %v862_v22 = vmul.f32 %v591_v18, %v591_v18  ;;  %v1264_v23 = vpack.c.bf16 %v611_v19, %v609_v3 }
  0xe3   : > { %v870_v1 = vmul.f32 %v611_v19, %v611_v19  ;;  %v871_v2 = vmul.f32 %v1491_v26, %v1491_v26  ;;  %v876_v15 = vmul.f32 %v1552_v63, %v1552_v63 }
  0xe4   : > { %1308 = vst [vmem:[%s1498_s20 + $0x18] sm:$0xff] %v1244_v20   ;;  %v824_v29 = vadd.f32 %v823_v21, %v1489_v25  ;;  %v893_v30 = vadd.f32 %v892_v17, %v862_v22  ;;  %v866_v25 = vmul.f32 %v1522_v40, %v1522_v40 }
  0xe5   : > { %1312 = vst [vmem:[%s1498_s20 + $0x38] sm:$0xff] %v1264_v23  }
  0xe6   : > { %v825_v35 = vadd.f32 %v824_v29, %v1500_v28  ;;  %v894_v37 = vadd.f32 %v893_v30, %v863_v27 }
  0xe8   : > { %v826_v41 = vadd.f32 %v825_v35, %v1510_v34  ;;  %v895_v42 = vadd.f32 %v894_v37, %v864_v33  ;;  %v631_v45 = vpop.f32.mrf.mxu2  ;;  %v651_v53 = vpop.f32.mrf.mxu3  ;;  %v868_v34 = vmul.f32 %v1544_v52, %v1544_v52  ;;  %v882_v35 = vmul.f32 %v1536_v48, %v1536_v48 }
  0xe9   : > { %v1284_v47 = vpack.c.bf16 %v631_v45, %v629_v16  ;;  %v1304_v28 = vpack.c.bf16 %v651_v53, %v1562_v24  ;;  %v878_v22 = vmul.f32 %v631_v45, %v631_v45 }
  0xea   : > { %v896_v49 = vadd.f32 %v895_v42, %v865_v39  ;;  %v827_v51 = vadd.f32 %v826_v41, %v1522_v40  ;;  %v883_v39 = vmul.f32 %v1548_v55, %v1548_v55 }
  0xeb   : > { %1316 = vst [vmem:[%s1498_s20 + $0x58] sm:$0xff] %v1284_v47  }
  0xec   : > { %v828_v56 = vadd.f32 %v827_v51, %v1532_v46  ;;  %v897_v57 = vadd.f32 %v896_v49, %v866_v25  ;;  %1320 = vst [vmem:[%s1498_s20 + $0x78] sm:$0xff] %v1304_v28   ;;  %v885_v49 = vmul.f32 %v1562_v24, %v1562_v24  ;;  %v886_v28 = vmul.f32 %v651_v53, %v651_v53 }
  0xee   : > { %v829_v58 = vadd.f32 %v828_v56, %v1544_v52  ;;  %v898_v59 = vadd.f32 %v897_v57, %v867_v54  ;;  %v873_v52 = vmul.f32 %v1520_v38, %v1520_v38 }
  0xf0   : > { %v830_v60 = vadd.f32 %v829_v58, %v609_v3  ;;  %v899_v40 = vadd.f32 %v898_v59, %v868_v34 }
  0xf2   : > { %v900_v62 = vadd.f32 %v899_v40, %v869_v61  ;;  %v831_v0 = vadd.f32 %v830_v60, %v611_v19  ;;  %v877_v19 = vmul.f32 %v629_v16, %v629_v16 }
  0xf4   : > { %v832_v4 = vadd.f32 %v831_v0, %v1491_v26  ;;  %v901_v46 = vadd.f32 %v900_v62, %v870_v1  ;;  %v875_v26 = vmul.f32 %v1542_v50, %v1542_v50 }
  0xf6   : > { %v833_v7 = vadd.f32 %v832_v4, %v1508_v32  ;;  %v902_v8 = vadd.f32 %v901_v46, %v871_v2 }
  0xf8   : > { %v834_v3 = vadd.f32 %v833_v7, %v1520_v38  ;;  %v903_v9 = vadd.f32 %v902_v8, %v872_v5 }
  0xfa   : > { %v904_v11 = vadd.f32 %v903_v9, %v873_v52  ;;  %v835_v12 = vadd.f32 %v834_v3, %v1530_v44  ;;  %v879_v44 = vmul.f32 %v1504_v31, %v1504_v31 }
  0xfc   : > { %v836_v13 = vadd.f32 %v835_v12, %v1542_v50  ;;  %v905_v14 = vadd.f32 %v904_v11, %v874_v10  ;;  %v880_v50 = vmul.f32 %v1514_v36, %v1514_v36 }
  0xfe   : > { %v837_v32 = vadd.f32 %v836_v13, %v1552_v63  ;;  %v906_v17 = vadd.f32 %v905_v14, %v875_v26  ;;  %v881_v63 = vmul.f32 %v1526_v43, %v1526_v43 }
 0x100   : > { %v907_v38 = vadd.f32 %v906_v17, %v876_v15  ;;  %v838_v18 = vadd.f32 %v837_v32, %v629_v16 }
 0x102   : > { %v908_v20 = vadd.f32 %v907_v38, %v877_v19  ;;  %v839_v21 = vadd.f32 %v838_v18, %v631_v45 }
 0x104   : > { %v840_v23 = vadd.f32 %v839_v21, %v1504_v31  ;;  %v909_v27 = vadd.f32 %v908_v20, %v878_v22 }
 0x106   : > { %v841_v29 = vadd.f32 %v840_v23, %v1514_v36  ;;  %v910_v30 = vadd.f32 %v909_v27, %v879_v44 }
 0x108   : > { %v842_v16 = vadd.f32 %v841_v29, %v1526_v43  ;;  %v911_v33 = vadd.f32 %v910_v30, %v880_v50  ;;  %v884_v43 = vmul.f32 %v1556_v6, %v1556_v6 }
 0x10a   : > { %v912_v37 = vadd.f32 %v911_v33, %v881_v63  ;;  %v843_v31 = vadd.f32 %v842_v16, %v1536_v48 }
 0x10c   : > { %v844_v41 = vadd.f32 %v843_v31, %v1548_v55  ;;  %v913_v36 = vadd.f32 %v912_v37, %v882_v35 }
 0x10e   : > { %v845_v42 = vadd.f32 %v844_v41, %v1556_v6  ;;  %v914_v45 = vadd.f32 %v913_v36, %v883_v39 }
 0x110   : > { %v915_v47 = vadd.f32 %v914_v45, %v884_v43  ;;  %v846_v25 = vadd.f32 %v845_v42, %v1562_v24 }
 0x112   : > { %v916_v48 = vadd.f32 %v915_v47, %v885_v49  ;;  %v847_v51 = vadd.f32 %v846_v25, %v651_v53 }
 0x114   : > { %v848_v54 = vrot.slane %v847_v51, 4  ;;  %v917_v56 = vadd.f32 %v916_v48, %v886_v28 }
 0x116   : > { %v849_v55 = vadd.f32 %v848_v54, %v847_v51  ;;  %v918_v57 = vrot.slane %v917_v56, 4 }
 0x118   : > { %v850_v34 = vrot.slane %v849_v55, 2  ;;  %v919_v58 = vadd.f32 %v918_v57, %v917_v56 }
 0x11a   : > { %v851_v59 = vadd.f32 %v850_v34, %v849_v55  ;;  %v920_v6 = vrot.slane %v919_v58, 2 }
 0x11c   : > { %v852_v60 = vrot.slane %v851_v59, 1  ;;  %v921_v61 = vadd.f32 %v920_v6, %v919_v58 }
 0x11e   : > { %v853_v24 = vadd.f32 %v852_v60, %v851_v59  ;;  %v922_v40 = vrot.slane %v921_v61, 1 }
 0x120   : > { %854 = vst [vmem:[%s298_s23] sm:$0x1] %v853_v24  ;;  %v923_v53 = vadd.f32 %v922_v40, %v921_v61 }
 0x122   : > { %924 = vst [vmem:[%s304_s26] sm:$0x1] %v923_v53 }
 0x123 PF: > { %s15_s17 = sadd.s32 1, %s1391_s17   ;;  %s1648_s15 = smov %s1387_s16 }
 0x124   : > { %p12_p6 = scmp.ge.s32.totalorder %s15_s17, 4   ;;  %s1649_s16 = smov %s1651_s18 }
 0x126   :  { %14 = sbr.rel (!%p12_p6) target bundleno = 2 (0x2), region = 93 }

</bundles_post_ra>
